<compile_context>
chip_gen: v7x
topology: tpu7x:2x2x1
jax: 0.10.0
libtpu: 0.0.40
codegen_flags: <defaults>
</compile_context>

<pallas_src>
import math

import jax
import jax.numpy as jnp
import numpy as np
from jax import lax
from jax.experimental import pallas as pl
from jax.experimental.pallas import tpu as pltpu  # noqa: F401  (no TPU params needed for this grid-less call)


# ----------------------- static model geometry (from the PyTorch module) -----
# conv_t1: ConvTranspose1d(35, 91, 2, stride=2, padding=1)            on x12 (1, 35, 40)
C1_IN, C1_OUT, K1, S1, P1, OP1 = 35, 91, 2, 2, 1, 0
THR1, ALPHA1 = -1.958, 0.24
# conv_t2: ConvTranspose1d(12, 23, 4, stride=4, padding=2, out_pad=3) on x4  (2, 12, 16)
C2_IN, C2_OUT, K2, S2, P2, OP2 = 12, 23, 4, 4, 2, 3
THR2, ALPHA2 = 0.763, -0.051

L1, L2 = 40, 16
LOUT1 = (L1 - 1) * S1 - 2 * P1 + K1 + OP1      # 78
LOUT2 = (L2 - 1) * S2 - 2 * P2 + K2 + OP2      # 63


# ------------------------------- Pallas kernel -------------------------------
def _fused_convt_kernel(x12_ref, x4_ref, w1_ref, e1_ref, b1_ref,
                        w2_ref, e2_ref, b2_ref, o1_ref, o2_ref):
    f32 = jnp.float32
    hi = lax.Precision.HIGHEST

    # ---- branch 1: ConvTranspose1d(35 -> 91, k=2, s=2, p=1) + leaky where ----
    x1 = x12_ref[0]                                            # (35, 40), raw NCL
    acc1 = None
    for k in range(w1_ref.shape[0]):
        s = jnp.dot(w1_ref[k], x1,                              # (91, 40)
                    preferred_element_type=f32, precision=hi)
        g = jnp.dot(s, e1_ref[k],                               # (91, 78) scatter+crop
                    preferred_element_type=f32, precision=hi)
        acc1 = g if acc1 is None else acc1 + g
    z1 = acc1 + b1_ref[...]                                     # (91,78) + (91,1)
    o1_ref[0] = jnp.where(z1 > THR1, z1, z1 * ALPHA1)

    # ---- branch 2: ConvTranspose1d(12 -> 23, k=4, s=4, p=2, op=3) + leaky where ----
    for n in range(x4_ref.shape[0]):
        xn = x4_ref[n]                                          # (12, 16), raw NCL
        acc2 = None
        for k in range(w2_ref.shape[0]):
            s = jnp.dot(w2_ref[k], xn,                          # (23, 16)
                        preferred_element_type=f32, precision=hi)
            g = jnp.dot(s, e2_ref[k],                           # (23, 63) scatter+crop
                        preferred_element_type=f32, precision=hi)
            acc2 = g if acc2 is None else acc2 + g
        z2 = acc2 + b2_ref[...]                                 # output_padding tail -> bias only
        o2_ref[n] = jnp.where(z2 > THR2, z2, z2 * ALPHA2)


# ------------------------- one-time parameter packing -------------------------
def prepare_convt_params(W, b, L, stride, padding, output_padding):
    """Pack PyTorch ConvTranspose1d params (weight (C_in, C_out, K), bias (C_out,))
    with stride == K into per-tap matmul operands:
      Wp (K, C_out, C_in) : Wp[k] = W[:, :, k]^T                (stage-1 LHS)
      E  (K, L, Lout)     : 0/1 scatter, E[k, l, l*K + k - P]=1 (stage-2 RHS;
                            does the stride interleave AND the `padding` crop)
      bc (C_out, 1)       : bias column for lane-broadcast add
    Numpy, once.
    """
    W = np.asarray(W, np.float32)
    b = np.asarray(b, np.float32)
    cin, cout, K = W.shape
    assert stride == K, "stride == kernel_size is required by this packing"
    Lout = (L - 1) * stride - 2 * padding + K + output_padding
    assert Lout > 0

    Wp = np.ascontiguousarray(np.transpose(W, (2, 1, 0)))       # (K, C_out, C_in)

    E = np.zeros((K, L, Lout), np.float32)
    for k in range(K):
        for l in range(L):
            t = l * stride + k - padding
            if 0 <= t < Lout:
                E[k, l, t] = 1.0
    # Sanity: each output position gets exactly one (l, k) contribution, except
    # the (output_padding-induced) tail positions t >= L*K - padding, which get
    # none and therefore become bias-only — identical to PyTorch semantics.
    hits = E.sum(axis=(0, 1))
    covered = min(Lout, L * K - padding)
    assert np.all(hits[:covered] == 1.0), "scatter matrix mis-covers output"
    assert np.all(hits[covered:] == 0.0), "scatter matrix double-covers output"

    bc = b.reshape(cout, 1)
    return jnp.asarray(Wp), jnp.asarray(E), jnp.asarray(bc), Lout


# --------------------------------- forward -----------------------------------
def fused_forward(x4, x12, w1p, e1, b1c, w2p, e2, b2c):
    """Equivalent of Model.forward(x4, x12) -> (v4, v5). NCL in / NCL out.
    No wrapper-side transposes / pads / slices — the kernel emits final layout."""
    n1, c1_in, l1 = x12.shape
    n2, c2_in, l2 = x4.shape
    lout1, lout2 = e1.shape[-1], e2.shape[-1]
    assert (c1_in, l1) == (C1_IN, e1.shape[1])
    assert (c2_in, l2) == (C2_IN, e2.shape[1])

    flops = (K1 * 2 * C1_OUT * (C1_IN * l1 + l1 * lout1) * n1
             + K2 * 2 * C2_OUT * (C2_IN * l2 + l2 * lout2) * n2)
    nbytes = 4 * (x12.size + x4.size + w1p.size + e1.size + b1c.size
                  + w2p.size + e2.size + b2c.size
                  + n1 * C1_OUT * lout1 + n2 * C2_OUT * lout2)

    v4, v5 = pl.pallas_call(
        _fused_convt_kernel,
        out_shape=(jax.ShapeDtypeStruct((n1, C1_OUT, lout1), jnp.float32),
                   jax.ShapeDtypeStruct((n2, C2_OUT, lout2), jnp.float32)),
        cost_estimate=pl.CostEstimate(flops=flops, transcendentals=0,
                                      bytes_accessed=nbytes),
    )(x12, x4, w1p, e1, b1c, w2p, e2, b2c)
    return v4, v5


fused_forward_jit = jax.jit(fused_forward)


# ---------------- pure-numpy reference (verification only) --------------------
def _convt1d_preact_ref_np(x, W, b, stride, padding, output_padding):
    """Pre-activation ConvTranspose1d reference in float64."""
    x = np.asarray(x, np.float64)
    W = np.asarray(W, np.float64)
    b = np.asarray(b, np.float64)
    N, _, L = x.shape
    _, Cout, K = W.shape
    Lout = (L - 1) * stride - 2 * padding + K + output_padding
    y = np.zeros((N, Cout, Lout), np.float64)
    for n in range(N):
        for l in range(L):
            for k in range(K):
                t = l * stride - padding + k
                if 0 <= t < Lout:
                    y[n, :, t] += W[:, :, k].T @ x[n, :, l]
    return y + b[None, :, None]


def _check_leaky_where(v, z_ref, thr, alpha, tol=2e-5, thr_band=1e-4):
    """Tight f32-level check; elements within thr_band of the threshold may
    legitimately take either where() branch, so accept both there only."""
    v = np.asarray(v, np.float64)
    ref = np.where(z_ref > thr, z_ref, z_ref * alpha)
    alt = np.where(z_ref > thr, z_ref * alpha, z_ref)
    near = np.abs(z_ref - thr) < thr_band
    np.testing.assert_allclose(v[~near], ref[~near], rtol=tol, atol=tol)
    if near.any():
        ok = (np.isclose(v[near], ref[near], rtol=tol, atol=thr_band)
              | np.isclose(v[near], alt[near], rtol=tol, atol=thr_band))
        assert ok.all(), "near-threshold mismatch beyond branch ambiguity"


if __name__ == "__main__":
    key = jax.random.PRNGKey(0)
    kx4, kx12, kw1, kb1, kw2, kb2 = jax.random.split(key, 6)

    # forward(x4, x12): x4 -> conv_t2 branch, x12 -> conv_t1 branch
    x4 = jax.random.normal(kx4, (2, C2_IN, L2), dtype=jnp.float32)
    x12 = jax.random.normal(kx12, (1, C1_IN, L1), dtype=jnp.float32)

    bound1 = 1.0 / math.sqrt(C1_OUT * K1)
    W1 = jax.random.uniform(kw1, (C1_IN, C1_OUT, K1), minval=-bound1,
                            maxval=bound1, dtype=jnp.float32)
    b1 = jax.random.uniform(kb1, (C1_OUT,), minval=-bound1, maxval=bound1,
                            dtype=jnp.float32)

    bound2 = 1.0 / math.sqrt(C2_OUT * K2)
    W2 = jax.random.uniform(kw2, (C2_IN, C2_OUT, K2), minval=-bound2,
                            maxval=bound2, dtype=jnp.float32)
    b2 = jax.random.uniform(kb2, (C2_OUT,), minval=-bound2, maxval=bound2,
                            dtype=jnp.float32)

    # One-time packing (hoisted out of the forward path).
    w1p, e1, b1c, lout1 = prepare_convt_params(W1, b1, L1, S1, P1, OP1)
    w2p, e2, b2c, lout2 = prepare_convt_params(W2, b2, L2, S2, P2, OP2)
    assert (lout1, lout2) == (LOUT1, LOUT2)

    v4, v5 = jax.block_until_ready(
        fused_forward_jit(x4, x12, w1p, e1, b1c, w2p, e2, b2c))

    assert v4.shape == (1, C1_OUT, LOUT1), v4.shape     # (1, 91, 78)
    assert v5.shape == (2, C2_OUT, LOUT2), v5.shape     # (2, 23, 63)

    # Verify against a float64 reference of the exact PyTorch semantics.
    z4 = _convt1d_preact_ref_np(x12, W1, b1, S1, P1, OP1)
    z5 = _convt1d_preact_ref_np(x4, W2, b2, S2, P2, OP2)
    _check_leaky_where(v4, z4, THR1, ALPHA1)
    _check_leaky_where(v5, z5, THR2, ALPHA2)

    print("KERNEL_OK")
</pallas_src>

<mosaic_0001>
module attributes {stable_mosaic.version = 11 : i64} {
  func.func @_fused_convt_kernel(%arg0: memref<1x35x40xf32, #tpu.memory_space<vmem>>, %arg1: memref<2x12x16xf32, #tpu.memory_space<vmem>>, %arg2: memref<2x91x35xf32, #tpu.memory_space<vmem>>, %arg3: memref<2x40x78xf32, #tpu.memory_space<vmem>>, %arg4: memref<91x1xf32, #tpu.memory_space<vmem>>, %arg5: memref<4x23x12xf32, #tpu.memory_space<vmem>>, %arg6: memref<4x16x63xf32, #tpu.memory_space<vmem>>, %arg7: memref<23x1xf32, #tpu.memory_space<vmem>>, %arg8: memref<1x91x78xf32, #tpu.memory_space<vmem>>, %arg9: memref<2x23x63xf32, #tpu.memory_space<vmem>>) attributes {dimension_semantics = [], scalar_prefetch = 0 : i64, scratch_operands = 0 : i64, tpu.core_type = #tpu.core_type<tc>} {
    %c0 = arith.constant 0 : index
    %c0_0 = arith.constant 0 : index
    %c0_1 = arith.constant 0 : index
    %0 = vector.load %arg0[%c0, %c0_0, %c0_1] : memref<1x35x40xf32, #tpu.memory_space<vmem>>, vector<1x35x40xf32>
    %1 = vector.shape_cast %0 : vector<1x35x40xf32> to vector<35x40xf32>
    %c0_2 = arith.constant 0 : index
    %c0_3 = arith.constant 0 : index
    %c0_4 = arith.constant 0 : index
    %2 = vector.load %arg2[%c0_2, %c0_3, %c0_4] : memref<2x91x35xf32, #tpu.memory_space<vmem>>, vector<1x91x35xf32>
    %3 = vector.shape_cast %2 : vector<1x91x35xf32> to vector<91x35xf32>
    %cst = arith.constant dense<0.000000e+00> : vector<91x40xf32>
    %4 = tpu.matmul %3, %1, %cst {dimension_numbers = #tpu.dot_dimension_numbers<[1], [0], [0], [1], [0, 0, 1, 1], [], []>, precision = #tpu.contract_precision<fp32>} : vector<91x35xf32>, vector<35x40xf32>, vector<91x40xf32> -> vector<91x40xf32>
    %c0_5 = arith.constant 0 : index
    %c0_6 = arith.constant 0 : index
    %c0_7 = arith.constant 0 : index
    %5 = vector.load %arg3[%c0_5, %c0_6, %c0_7] : memref<2x40x78xf32, #tpu.memory_space<vmem>>, vector<1x40x78xf32>
    %6 = vector.shape_cast %5 : vector<1x40x78xf32> to vector<40x78xf32>
    %cst_8 = arith.constant dense<0.000000e+00> : vector<91x78xf32>
    %7 = tpu.matmul %4, %6, %cst_8 {dimension_numbers = #tpu.dot_dimension_numbers<[1], [0], [0], [1], [0, 0, 1, 1], [], []>, precision = #tpu.contract_precision<fp32>} : vector<91x40xf32>, vector<40x78xf32>, vector<91x78xf32> -> vector<91x78xf32>
    %c1 = arith.constant 1 : index
    %c0_9 = arith.constant 0 : index
    %c0_10 = arith.constant 0 : index
    %8 = vector.load %arg2[%c1, %c0_9, %c0_10] : memref<2x91x35xf32, #tpu.memory_space<vmem>>, vector<1x91x35xf32>
    %9 = vector.shape_cast %8 : vector<1x91x35xf32> to vector<91x35xf32>
    %cst_11 = arith.constant dense<0.000000e+00> : vector<91x40xf32>
    %10 = tpu.matmul %9, %1, %cst_11 {dimension_numbers = #tpu.dot_dimension_numbers<[1], [0], [0], [1], [0, 0, 1, 1], [], []>, precision = #tpu.contract_precision<fp32>} : vector<91x35xf32>, vector<35x40xf32>, vector<91x40xf32> -> vector<91x40xf32>
    %c1_12 = arith.constant 1 : index
    %c0_13 = arith.constant 0 : index
    %c0_14 = arith.constant 0 : index
    %11 = vector.load %arg3[%c1_12, %c0_13, %c0_14] : memref<2x40x78xf32, #tpu.memory_space<vmem>>, vector<1x40x78xf32>
    %12 = vector.shape_cast %11 : vector<1x40x78xf32> to vector<40x78xf32>
    %cst_15 = arith.constant dense<0.000000e+00> : vector<91x78xf32>
    %13 = tpu.matmul %10, %12, %cst_15 {dimension_numbers = #tpu.dot_dimension_numbers<[1], [0], [0], [1], [0, 0, 1, 1], [], []>, precision = #tpu.contract_precision<fp32>} : vector<91x40xf32>, vector<40x78xf32>, vector<91x78xf32> -> vector<91x78xf32>
    %14 = arith.addf %7, %13 : vector<91x78xf32>
    %c0_16 = arith.constant 0 : index
    %c0_17 = arith.constant 0 : index
    %15 = vector.load %arg4[%c0_16, %c0_17] : memref<91x1xf32, #tpu.memory_space<vmem>>, vector<91x1xf32>
    %16 = vector.broadcast %15 : vector<91x1xf32> to vector<91x78xf32>
    %17 = arith.addf %14, %16 : vector<91x78xf32>
    %cst_18 = arith.constant -1.958000e+00 : f32
    %18 = vector.broadcast %cst_18 : f32 to vector<91x78xf32>
    %19 = arith.cmpf ogt, %17, %18 : vector<91x78xf32>
    %cst_19 = arith.constant 2.400000e-01 : f32
    %20 = vector.broadcast %cst_19 : f32 to vector<91x78xf32>
    %21 = arith.mulf %17, %20 : vector<91x78xf32>
    %22 = arith.select %19, %17, %21 : vector<91x78xi1>, vector<91x78xf32>
    %c0_20 = arith.constant 0 : index
    %c0_21 = arith.constant 0 : index
    %c0_22 = arith.constant 0 : index
    %23 = vector.load %arg8[%c0_20, %c0_21, %c0_22] : memref<1x91x78xf32, #tpu.memory_space<vmem>>, vector<1x91x78xf32>
    %24 = vector.shape_cast %23 : vector<1x91x78xf32> to vector<91x78xf32>
    %25 = vector.shape_cast %22 : vector<91x78xf32> to vector<1x91x78xf32>
    tpu.vector_store %arg8[%c0_20, %c0_21, %c0_22], %25 {strides = array<i32>} : memref<1x91x78xf32, #tpu.memory_space<vmem>>, vector<1x91x78xf32>,
    %c0_23 = arith.constant 0 : index
    %c0_24 = arith.constant 0 : index
    %c0_25 = arith.constant 0 : index
    %26 = vector.load %arg1[%c0_23, %c0_24, %c0_25] : memref<2x12x16xf32, #tpu.memory_space<vmem>>, vector<1x12x16xf32>
    %27 = vector.shape_cast %26 : vector<1x12x16xf32> to vector<12x16xf32>
    %c0_26 = arith.constant 0 : index
    %c0_27 = arith.constant 0 : index
    %c0_28 = arith.constant 0 : index
    %28 = vector.load %arg5[%c0_26, %c0_27, %c0_28] : memref<4x23x12xf32, #tpu.memory_space<vmem>>, vector<1x23x12xf32>
    %29 = vector.shape_cast %28 : vector<1x23x12xf32> to vector<23x12xf32>
    %cst_29 = arith.constant dense<0.000000e+00> : vector<23x16xf32>
    %30 = tpu.matmul %29, %27, %cst_29 {dimension_numbers = #tpu.dot_dimension_numbers<[1], [0], [0], [1], [0, 0, 1, 1], [], []>, precision = #tpu.contract_precision<fp32>} : vector<23x12xf32>, vector<12x16xf32>, vector<23x16xf32> -> vector<23x16xf32>
    %c0_30 = arith.constant 0 : index
    %c0_31 = arith.constant 0 : index
    %c0_32 = arith.constant 0 : index
    %31 = vector.load %arg6[%c0_30, %c0_31, %c0_32] : memref<4x16x63xf32, #tpu.memory_space<vmem>>, vector<1x16x63xf32>
    %32 = vector.shape_cast %31 : vector<1x16x63xf32> to vector<16x63xf32>
    %cst_33 = arith.constant dense<0.000000e+00> : vector<23x63xf32>
    %33 = tpu.matmul %30, %32, %cst_33 {dimension_numbers = #tpu.dot_dimension_numbers<[1], [0], [0], [1], [0, 0, 1, 1], [], []>, precision = #tpu.contract_precision<fp32>} : vector<23x16xf32>, vector<16x63xf32>, vector<23x63xf32> -> vector<23x63xf32>
    %c1_34 = arith.constant 1 : index
    %c0_35 = arith.constant 0 : index
    %c0_36 = arith.constant 0 : index
    %34 = vector.load %arg5[%c1_34, %c0_35, %c0_36] : memref<4x23x12xf32, #tpu.memory_space<vmem>>, vector<1x23x12xf32>
    %35 = vector.shape_cast %34 : vector<1x23x12xf32> to vector<23x12xf32>
    %cst_37 = arith.constant dense<0.000000e+00> : vector<23x16xf32>
    %36 = tpu.matmul %35, %27, %cst_37 {dimension_numbers = #tpu.dot_dimension_numbers<[1], [0], [0], [1], [0, 0, 1, 1], [], []>, precision = #tpu.contract_precision<fp32>} : vector<23x12xf32>, vector<12x16xf32>, vector<23x16xf32> -> vector<23x16xf32>
    %c1_38 = arith.constant 1 : index
    %c0_39 = arith.constant 0 : index
    %c0_40 = arith.constant 0 : index
    %37 = vector.load %arg6[%c1_38, %c0_39, %c0_40] : memref<4x16x63xf32, #tpu.memory_space<vmem>>, vector<1x16x63xf32>
    %38 = vector.shape_cast %37 : vector<1x16x63xf32> to vector<16x63xf32>
    %cst_41 = arith.constant dense<0.000000e+00> : vector<23x63xf32>
    %39 = tpu.matmul %36, %38, %cst_41 {dimension_numbers = #tpu.dot_dimension_numbers<[1], [0], [0], [1], [0, 0, 1, 1], [], []>, precision = #tpu.contract_precision<fp32>} : vector<23x16xf32>, vector<16x63xf32>, vector<23x63xf32> -> vector<23x63xf32>
    %40 = arith.addf %33, %39 : vector<23x63xf32>
    %c2 = arith.constant 2 : index
    %c0_42 = arith.constant 0 : index
    %c0_43 = arith.constant 0 : index
    %41 = vector.load %arg5[%c2, %c0_42, %c0_43] : memref<4x23x12xf32, #tpu.memory_space<vmem>>, vector<1x23x12xf32>
    %42 = vector.shape_cast %41 : vector<1x23x12xf32> to vector<23x12xf32>
    %cst_44 = arith.constant dense<0.000000e+00> : vector<23x16xf32>
    %43 = tpu.matmul %42, %27, %cst_44 {dimension_numbers = #tpu.dot_dimension_numbers<[1], [0], [0], [1], [0, 0, 1, 1], [], []>, precision = #tpu.contract_precision<fp32>} : vector<23x12xf32>, vector<12x16xf32>, vector<23x16xf32> -> vector<23x16xf32>
    %c2_45 = arith.constant 2 : index
    %c0_46 = arith.constant 0 : index
    %c0_47 = arith.constant 0 : index
    %44 = vector.load %arg6[%c2_45, %c0_46, %c0_47] : memref<4x16x63xf32, #tpu.memory_space<vmem>>, vector<1x16x63xf32>
    %45 = vector.shape_cast %44 : vector<1x16x63xf32> to vector<16x63xf32>
    %cst_48 = arith.constant dense<0.000000e+00> : vector<23x63xf32>
    %46 = tpu.matmul %43, %45, %cst_48 {dimension_numbers = #tpu.dot_dimension_numbers<[1], [0], [0], [1], [0, 0, 1, 1], [], []>, precision = #tpu.contract_precision<fp32>} : vector<23x16xf32>, vector<16x63xf32>, vector<23x63xf32> -> vector<23x63xf32>
    %47 = arith.addf %40, %46 : vector<23x63xf32>
    %c3 = arith.constant 3 : index
    %c0_49 = arith.constant 0 : index
    %c0_50 = arith.constant 0 : index
    %48 = vector.load %arg5[%c3, %c0_49, %c0_50] : memref<4x23x12xf32, #tpu.memory_space<vmem>>, vector<1x23x12xf32>
    %49 = vector.shape_cast %48 : vector<1x23x12xf32> to vector<23x12xf32>
    %cst_51 = arith.constant dense<0.000000e+00> : vector<23x16xf32>
    %50 = tpu.matmul %49, %27, %cst_51 {dimension_numbers = #tpu.dot_dimension_numbers<[1], [0], [0], [1], [0, 0, 1, 1], [], []>, precision = #tpu.contract_precision<fp32>} : vector<23x12xf32>, vector<12x16xf32>, vector<23x16xf32> -> vector<23x16xf32>
    %c3_52 = arith.constant 3 : index
    %c0_53 = arith.constant 0 : index
    %c0_54 = arith.constant 0 : index
    %51 = vector.load %arg6[%c3_52, %c0_53, %c0_54] : memref<4x16x63xf32, #tpu.memory_space<vmem>>, vector<1x16x63xf32>
    %52 = vector.shape_cast %51 : vector<1x16x63xf32> to vector<16x63xf32>
    %cst_55 = arith.constant dense<0.000000e+00> : vector<23x63xf32>
    %53 = tpu.matmul %50, %52, %cst_55 {dimension_numbers = #tpu.dot_dimension_numbers<[1], [0], [0], [1], [0, 0, 1, 1], [], []>, precision = #tpu.contract_precision<fp32>} : vector<23x16xf32>, vector<16x63xf32>, vector<23x63xf32> -> vector<23x63xf32>
    %54 = arith.addf %47, %53 : vector<23x63xf32>
    %c0_56 = arith.constant 0 : index
    %c0_57 = arith.constant 0 : index
    %55 = vector.load %arg7[%c0_56, %c0_57] : memref<23x1xf32, #tpu.memory_space<vmem>>, vector<23x1xf32>
    %56 = vector.broadcast %55 : vector<23x1xf32> to vector<23x63xf32>
    %57 = arith.addf %54, %56 : vector<23x63xf32>
    %cst_58 = arith.constant 7.630000e-01 : f32
    %58 = vector.broadcast %cst_58 : f32 to vector<23x63xf32>
    %59 = arith.cmpf ogt, %57, %58 : vector<23x63xf32>
    %cst_59 = arith.constant -5.100000e-02 : f32
    %60 = vector.broadcast %cst_59 : f32 to vector<23x63xf32>
    %61 = arith.mulf %57, %60 : vector<23x63xf32>
    %62 = arith.select %59, %57, %61 : vector<23x63xi1>, vector<23x63xf32>
    %c0_60 = arith.constant 0 : index
    %c0_61 = arith.constant 0 : index
    %c0_62 = arith.constant 0 : index
    %63 = vector.load %arg9[%c0_60, %c0_61, %c0_62] : memref<2x23x63xf32, #tpu.memory_space<vmem>>, vector<1x23x63xf32>
    %64 = vector.shape_cast %63 : vector<1x23x63xf32> to vector<23x63xf32>
    %65 = vector.shape_cast %62 : vector<23x63xf32> to vector<1x23x63xf32>
    tpu.vector_store %arg9[%c0_60, %c0_61, %c0_62], %65 {strides = array<i32>} : memref<2x23x63xf32, #tpu.memory_space<vmem>>, vector<1x23x63xf32>,
    %c1_63 = arith.constant 1 : index
    %c0_64 = arith.constant 0 : index
    %c0_65 = arith.constant 0 : index
    %66 = vector.load %arg1[%c1_63, %c0_64, %c0_65] : memref<2x12x16xf32, #tpu.memory_space<vmem>>, vector<1x12x16xf32>
    %67 = vector.shape_cast %66 : vector<1x12x16xf32> to vector<12x16xf32>
    %c0_66 = arith.constant 0 : index
    %c0_67 = arith.constant 0 : index
    %c0_68 = arith.constant 0 : index
    %68 = vector.load %arg5[%c0_66, %c0_67, %c0_68] : memref<4x23x12xf32, #tpu.memory_space<vmem>>, vector<1x23x12xf32>
    %69 = vector.shape_cast %68 : vector<1x23x12xf32> to vector<23x12xf32>
    %cst_69 = arith.constant dense<0.000000e+00> : vector<23x16xf32>
    %70 = tpu.matmul %69, %67, %cst_69 {dimension_numbers = #tpu.dot_dimension_numbers<[1], [0], [0], [1], [0, 0, 1, 1], [], []>, precision = #tpu.contract_precision<fp32>} : vector<23x12xf32>, vector<12x16xf32>, vector<23x16xf32> -> vector<23x16xf32>
    %c0_70 = arith.constant 0 : index
    %c0_71 = arith.constant 0 : index
    %c0_72 = arith.constant 0 : index
    %71 = vector.load %arg6[%c0_70, %c0_71, %c0_72] : memref<4x16x63xf32, #tpu.memory_space<vmem>>, vector<1x16x63xf32>
    %72 = vector.shape_cast %71 : vector<1x16x63xf32> to vector<16x63xf32>
    %cst_73 = arith.constant dense<0.000000e+00> : vector<23x63xf32>
    %73 = tpu.matmul %70, %72, %cst_73 {dimension_numbers = #tpu.dot_dimension_numbers<[1], [0], [0], [1], [0, 0, 1, 1], [], []>, precision = #tpu.contract_precision<fp32>} : vector<23x16xf32>, vector<16x63xf32>, vector<23x63xf32> -> vector<23x63xf32>
    %c1_74 = arith.constant 1 : index
    %c0_75 = arith.constant 0 : index
    %c0_76 = arith.constant 0 : index
    %74 = vector.load %arg5[%c1_74, %c0_75, %c0_76] : memref<4x23x12xf32, #tpu.memory_space<vmem>>, vector<1x23x12xf32>
    %75 = vector.shape_cast %74 : vector<1x23x12xf32> to vector<23x12xf32>
    %cst_77 = arith.constant dense<0.000000e+00> : vector<23x16xf32>
    %76 = tpu.matmul %75, %67, %cst_77 {dimension_numbers = #tpu.dot_dimension_numbers<[1], [0], [0], [1], [0, 0, 1, 1], [], []>, precision = #tpu.contract_precision<fp32>} : vector<23x12xf32>, vector<12x16xf32>, vector<23x16xf32> -> vector<23x16xf32>
    %c1_78 = arith.constant 1 : index
    %c0_79 = arith.constant 0 : index
    %c0_80 = arith.constant 0 : index
    %77 = vector.load %arg6[%c1_78, %c0_79, %c0_80] : memref<4x16x63xf32, #tpu.memory_space<vmem>>, vector<1x16x63xf32>
    %78 = vector.shape_cast %77 : vector<1x16x63xf32> to vector<16x63xf32>
    %cst_81 = arith.constant dense<0.000000e+00> : vector<23x63xf32>
    %79 = tpu.matmul %76, %78, %cst_81 {dimension_numbers = #tpu.dot_dimension_numbers<[1], [0], [0], [1], [0, 0, 1, 1], [], []>, precision = #tpu.contract_precision<fp32>} : vector<23x16xf32>, vector<16x63xf32>, vector<23x63xf32> -> vector<23x63xf32>
    %80 = arith.addf %73, %79 : vector<23x63xf32>
    %c2_82 = arith.constant 2 : index
    %c0_83 = arith.constant 0 : index
    %c0_84 = arith.constant 0 : index
    %81 = vector.load %arg5[%c2_82, %c0_83, %c0_84] : memref<4x23x12xf32, #tpu.memory_space<vmem>>, vector<1x23x12xf32>
    %82 = vector.shape_cast %81 : vector<1x23x12xf32> to vector<23x12xf32>
    %cst_85 = arith.constant dense<0.000000e+00> : vector<23x16xf32>
    %83 = tpu.matmul %82, %67, %cst_85 {dimension_numbers = #tpu.dot_dimension_numbers<[1], [0], [0], [1], [0, 0, 1, 1], [], []>, precision = #tpu.contract_precision<fp32>} : vector<23x12xf32>, vector<12x16xf32>, vector<23x16xf32> -> vector<23x16xf32>
    %c2_86 = arith.constant 2 : index
    %c0_87 = arith.constant 0 : index
    %c0_88 = arith.constant 0 : index
    %84 = vector.load %arg6[%c2_86, %c0_87, %c0_88] : memref<4x16x63xf32, #tpu.memory_space<vmem>>, vector<1x16x63xf32>
    %85 = vector.shape_cast %84 : vector<1x16x63xf32> to vector<16x63xf32>
    %cst_89 = arith.constant dense<0.000000e+00> : vector<23x63xf32>
    %86 = tpu.matmul %83, %85, %cst_89 {dimension_numbers = #tpu.dot_dimension_numbers<[1], [0], [0], [1], [0, 0, 1, 1], [], []>, precision = #tpu.contract_precision<fp32>} : vector<23x16xf32>, vector<16x63xf32>, vector<23x63xf32> -> vector<23x63xf32>
    %87 = arith.addf %80, %86 : vector<23x63xf32>
    %c3_90 = arith.constant 3 : index
    %c0_91 = arith.constant 0 : index
    %c0_92 = arith.constant 0 : index
    %88 = vector.load %arg5[%c3_90, %c0_91, %c0_92] : memref<4x23x12xf32, #tpu.memory_space<vmem>>, vector<1x23x12xf32>
    %89 = vector.shape_cast %88 : vector<1x23x12xf32> to vector<23x12xf32>
    %cst_93 = arith.constant dense<0.000000e+00> : vector<23x16xf32>
    %90 = tpu.matmul %89, %67, %cst_93 {dimension_numbers = #tpu.dot_dimension_numbers<[1], [0], [0], [1], [0, 0, 1, 1], [], []>, precision = #tpu.contract_precision<fp32>} : vector<23x12xf32>, vector<12x16xf32>, vector<23x16xf32> -> vector<23x16xf32>
    %c3_94 = arith.constant 3 : index
    %c0_95 = arith.constant 0 : index
    %c0_96 = arith.constant 0 : index
    %91 = vector.load %arg6[%c3_94, %c0_95, %c0_96] : memref<4x16x63xf32, #tpu.memory_space<vmem>>, vector<1x16x63xf32>
    %92 = vector.shape_cast %91 : vector<1x16x63xf32> to vector<16x63xf32>
    %cst_97 = arith.constant dense<0.000000e+00> : vector<23x63xf32>
    %93 = tpu.matmul %90, %92, %cst_97 {dimension_numbers = #tpu.dot_dimension_numbers<[1], [0], [0], [1], [0, 0, 1, 1], [], []>, precision = #tpu.contract_precision<fp32>} : vector<23x16xf32>, vector<16x63xf32>, vector<23x63xf32> -> vector<23x63xf32>
    %94 = arith.addf %87, %93 : vector<23x63xf32>
    %c0_98 = arith.constant 0 : index
    %c0_99 = arith.constant 0 : index
    %95 = vector.load %arg7[%c0_98, %c0_99] : memref<23x1xf32, #tpu.memory_space<vmem>>, vector<23x1xf32>
    %96 = vector.broadcast %95 : vector<23x1xf32> to vector<23x63xf32>
    %97 = arith.addf %94, %96 : vector<23x63xf32>
    %cst_100 = arith.constant 7.630000e-01 : f32
    %98 = vector.broadcast %cst_100 : f32 to vector<23x63xf32>
    %99 = arith.cmpf ogt, %97, %98 : vector<23x63xf32>
    %cst_101 = arith.constant -5.100000e-02 : f32
    %100 = vector.broadcast %cst_101 : f32 to vector<23x63xf32>
    %101 = arith.mulf %97, %100 : vector<23x63xf32>
    %102 = arith.select %99, %97, %101 : vector<23x63xi1>, vector<23x63xf32>
    %c1_102 = arith.constant 1 : index
    %c0_103 = arith.constant 0 : index
    %c0_104 = arith.constant 0 : index
    %103 = vector.load %arg9[%c1_102, %c0_103, %c0_104] : memref<2x23x63xf32, #tpu.memory_space<vmem>>, vector<1x23x63xf32>
    %104 = vector.shape_cast %103 : vector<1x23x63xf32> to vector<23x63xf32>
    %105 = vector.shape_cast %102 : vector<23x63xf32> to vector<1x23x63xf32>
    tpu.vector_store %arg9[%c1_102, %c0_103, %c0_104], %105 {strides = array<i32>} : memref<2x23x63xf32, #tpu.memory_space<vmem>>, vector<1x23x63xf32>,
    return
  }
}

</mosaic_0001>

<bundles_post_ra>
// kernel: fused_forward.1
= control target key start
LH: loop header
LB: loop body
LE: loop exit
PB: predicated region body
PF: predicated region fallthrough
CT: control target
= control target key end

     0   :  { %vm85_vm0 = vcmask 1042432   ;;  %vm48_vm1 = vcmask 285696   ;;  %vm4255_vm2 = vcmask 1043456   ;;  %vm4245_vm3 = vcmask 97280   ;;  %s20196_s0 = inlined_call_operand.vmem [shape: f32[1,35,40], index: 0, kind: input, shape index: {}]   ;;  %s20197_s2 = inlined_call_operand.vmem [shape: f32[2,91,35], index: 2, kind: input, shape index: {}]   ;;  %s20198_s1 = inlined_call_operand.vmem [shape: f32[2,12,16], index: 1, kind: input, shape index: {}]   ;;  %s20199_s5 = inlined_call_operand.vmem [shape: f32[4,23,12], index: 5, kind: input, shape index: {}]   ;;  %s20200_s3 = inlined_call_operand.vmem [shape: f32[2,40,78], index: 3, kind: input, shape index: {}]   ;;  %s20201_s6 = inlined_call_operand.vmem [shape: f32[4,16,63], index: 6, kind: input, shape index: {}]   ;;  %s20202_s4 = inlined_call_operand.vmem [shape: f32[91,1], index: 4, kind: input, shape index: {}]   ;;  %s20203_s8 = inlined_call_operand.vmem [shape: f32[1,91,78], index: 8, kind: output, shape index: {0}]   ;;  %s20204_s7 = inlined_call_operand.vmem [shape: f32[23,1], index: 7, kind: input, shape index: {}]   ;;  %s20205_s9 = inlined_call_operand.vmem [shape: f32[2,23,63], index: 9, kind: output, shape index: {1}]  }
   0x1   :  { %v31_v0 = vld [vmem:[%s20196_s0] sm:$0xff]  ;;  %v32_v1 = vld [vmem:[%s20196_s0 + $0x8] sm:$0xff]  ;;  %v17154_v2 = vld [vmem:[%s20196_s0 + $0x10] sm:$0xff]  ;;  %vm17092_vm4 = vmmov 0   ;;  %vm2091_vm5 = vcmask 326656   ;;  %vm5367_vm6 = vcmask 130048  }
   0x2   :  { %v90_v3 = vand.u32 4294901760, %v31_v0  ;;  %v93_v4 = vand.u32 4294901760, %v32_v1  ;;  %v17159_v5 = vld [vmem:[%s20196_s0 + $0x18] sm:$0xff]  ;;  %v96_v6 = vand.u32 4294901760, %v17154_v2  ;;  %v35_v7 = vld [vmem:[%s20196_s0 + $0x20] sm:$0x7] }
   0x3   :  { %v99_v8 = vand.u32 4294901760, %v17159_v5  ;;  %v17166_v9 = vsel %vm85_vm0, %v35_v7, 0  ;;  %v13253_v10 = vld [vmem:[%s20197_s2 + $0x60] sm:$0xff]  ;;  %v13254_v11 = vld [vmem:[%s20197_s2 + $0x68] sm:$0xff]  ;;  %v13255_v12 = vld [vmem:[%s20197_s2 + $0x70] sm:$0xff]  ;;  %vm4226_vm8 = vcmask 637952  }
   0x4   :  { %v17177_v13 = vpack.c.bf16 %v93_v4, %v90_v3  ;;  %v17180_v14 = vand.u32 4294901760, %v17166_v9  ;;  %v1079_v15 = vsel %vm48_vm1, %v13253_v10, 0  ;;  %v1082_v16 = vsel %vm48_vm1, %v13254_v11, 0  ;;  %v13256_v17 = vld [vmem:[%s20197_s2 + $0x78] sm:$0xff]  ;;  %v13257_v18 = vld [vmem:[%s20197_s2 + $0x80] sm:$0xff]  ;;  %v13258_v23 = vld [vmem:[%s20197_s2 + $0x88] sm:$0xff] }
   0x5   :  { %v17192_v19 = vpack.c.bf16 %v99_v8, %v96_v6  ;;  %v17194_v20 = vand.u32 4294901760, %v1079_v15  ;;  %v17196_v21 = vand.u32 4294901760, %v1082_v16  ;;  %v17198_v22 = vsub.f32 %v31_v0, %v90_v3  ;;  %v13259_v52 = vld [vmem:[%s20197_s2 + $0x90] sm:$0xff]  ;;  %v13260_v61 = vld [vmem:[%s20197_s2 + $0x98] sm:$0xff]  ;;  %v13261_v62 = vld [vmem:[%s20197_s2 + $0xa0] sm:$0xff] }
   0x6   :  { %16162 = vmatprep.subr.bf16.mxu1 %v17177_v13  ;;  %v17204_v24 = vsub.f32 %v32_v1, %v93_v4  ;;  %v1085_v25 = vsel %vm48_vm1, %v13255_v12, 0  ;;  %v1088_v26 = vsel %vm48_vm1, %v13256_v17, 0  ;;  %v1091_v27 = vsel %vm48_vm1, %v13257_v18, 0  ;;  %16114 = vmatprep.subr.bf16.mxu0 %v17177_v13  ;;  %v13262_v10 = vld [vmem:[%s20197_s2 + $0xa8] sm:$0xff] }
   0x7   :  { %20278 = vst [vmem:[#allocation2_spill] sm:$0xff] %v17194_v20  ;;  %20279 = vst [vmem:[#allocation3_spill] sm:$0xff] %v17196_v21  ;;  %16164 = vmatpush3.bf16.msra.mxu1 %v17177_v13  ;;  %v17212_v28 = vsub.f32 %v1079_v15, %v17194_v20  ;;  %v17215_v29 = vsub.f32 %v1082_v16, %v17196_v21  ;;  %v20224_v30 = vand.u32 4294901760, %v17198_v22  ;;  %v17218_v31 = vand.u32 4294901760, %v1085_v25 }
   0x8   :  { %16116 = vmatpush3.bf16.msra.mxu0 %v17177_v13  ;;  %16166 = vmatprep.subr.bf16.mxu1 %v17192_v19  ;;  %v20223_v32 = vand.u32 4294901760, %v17204_v24  ;;  %v17223_v33 = vand.u32 4294901760, %v1088_v26  ;;  %v17225_v34 = vand.u32 4294901760, %v1091_v27  ;;  %v1094_v35 = vsel %vm48_vm1, %v13258_v23, 0  ;;  %v36_v23 = vld [vmem:[%s20197_s2] sm:$0xff] }
   0x9   :  { %16118 = vmatprep.subr.bf16.mxu0 %v17192_v19  ;;  %v20217_v36 = vand.u32 4294901760, %v17212_v28  ;;  %v20216_v37 = vand.u32 4294901760, %v17215_v29  ;;  %v283_v38 = vsub.f32 %v17198_v22, %v20224_v30  ;;  %v17235_v39 = vsub.f32 %v1085_v25, %v17218_v31  ;;  %v13263_v25 = vld [vmem:[%s20197_s2 + $0xb0] sm:$0xff] }
   0xa   :  { %v290_v40 = vsub.f32 %v17204_v24, %v20223_v32  ;;  %v17241_v41 = vsub.f32 %v1088_v26, %v17223_v33  ;;  %v17244_v42 = vsub.f32 %v1091_v27, %v17225_v34  ;;  %v17246_v43 = vand.u32 4294901760, %v1094_v35 }
   0xb   :  { %16168 = vmatpush3.bf16.msra.mxu1 %v17192_v19  ;;  %v1187_v44 = vsub.f32 %v17212_v28, %v20217_v36  ;;  %v1197_v45 = vsub.f32 %v17215_v29, %v20216_v37  ;;  %v284_v46 = vand.u32 4294901760, %v283_v38  ;;  %v20215_v47 = vand.u32 4294901760, %v17235_v39 }
   0xc   :  { %16120 = vmatpush3.bf16.msra.mxu0 %v17192_v19  ;;  %14369 = vmatprep.subr.mxu1 %v17180_v14  ;;  %v291_v48 = vand.u32 4294901760, %v290_v40  ;;  %v20214_v49 = vand.u32 4294901760, %v17241_v41  ;;  %v20213_v50 = vand.u32 4294901760, %v17244_v42  ;;  %v17261_v51 = vsub.f32 %v1094_v35, %v17246_v43 }
   0xd   :  { %14201 = vmatprep.subr.mxu0 %v17180_v14  ;;  %v1188_v53 = vand.u32 4294901760, %v1187_v44  ;;  %v1198_v54 = vand.u32 4294901760, %v1197_v45  ;;  %v1207_v55 = vsub.f32 %v17235_v39, %v20215_v47  ;;  %v17271_v56 = vsub.f32 %v17154_v2, %v96_v6 }
   0xe   :  { %v17273_v57 = vpack.c.bf16 %v291_v48, %v284_v46  ;;  %v1217_v58 = vsub.f32 %v17241_v41, %v20214_v49  ;;  %v1227_v59 = vsub.f32 %v17244_v42, %v20213_v50  ;;  %v20210_v60 = vand.u32 4294901760, %v17261_v51 }
   0xf   :  { %14370 = vmatpush3.msra.mxu1 %v17180_v14  ;;  %14371 = vmatprep.mubr.f32.mxu1 %v1188_v53  ;;  %v1208_v63 = vand.u32 4294901760, %v1207_v55  ;;  %v20220_v0 = vand.u32 4294901760, %v17271_v56  ;;  %v17293_v1 = vsub.f32 %v17159_v5, %v99_v8  ;;  %v1097_v2 = vsel %vm48_vm1, %v13259_v52, 0 }
  0x10   :  { %14372 = vmatmul.mubr.f32.vlgmr.msra.gmra.mrb[0].mxu1 %v1198_v54  ;;  %16170 = vmatprep.subr.bf16.mxu1 %v17273_v57  ;;  %v1218_v3 = vand.u32 4294901760, %v1217_v58  ;;  %v1228_v4 = vand.u32 4294901760, %v1227_v59  ;;  %v1237_v6 = vsub.f32 %v17261_v51, %v20210_v60  ;;  %v17300_v7 = vand.u32 4294901760, %v1097_v2 }
  0x11   :  { %16172 = vmatpush3.bf16.msra.mxu1 %v17273_v57  ;;  %14374 = vmatprep.mubr.f32.mxu1 %v1208_v63  ;;  %v297_v5 = vsub.f32 %v17271_v56, %v20220_v0  ;;  %v20218_v8 = vand.u32 4294901760, %v17293_v1  ;;  %v1100_v11 = vsel %vm48_vm1, %v13260_v61, 0  ;;  %v1103_v12 = vsel %vm48_vm1, %v13261_v62, 0  ;;  %v37_v61 = vld [vmem:[%s20197_s2 + $0x8] sm:$0xff] }
  0x12   :  { %v1238_v15 = vand.u32 4294901760, %v1237_v6  ;;  %v17313_v16 = vsub.f32 %v1097_v2, %v17300_v7  ;;  %v17315_v17 = vand.u32 4294901760, %v1100_v11  ;;  %v17317_v18 = vand.u32 4294901760, %v1103_v12  ;;  %14202 = vmatpush3.msra.mxu0 %v17180_v14 }
  0x13   :  { %v298_v26 = vand.u32 4294901760, %v297_v5  ;;  %v304_v27 = vsub.f32 %v17293_v1, %v20218_v8  ;;  %v1106_v35 = vsel %vm48_vm1, %v13262_v10, 0  ;;  %v17332_v38 = vsub.f32 %v17166_v9, %v17180_v14  ;;  %16122 = vmatprep.subr.bf16.mxu0 %v17273_v57 }
  0x14   :  { %14375 = vmatmul.mubr.f32.gmra.mrb[2].mxu1 %v1218_v3  ;;  %v20209_v40 = vand.u32 4294901760, %v17313_v16  ;;  %v17337_v44 = vsub.f32 %v1100_v11, %v17315_v17  ;;  %v17340_v45 = vsub.f32 %v1103_v12, %v17317_v18  ;;  %v17342_v46 = vand.u32 4294901760, %v1106_v35  ;;  %v13264_v11 = vld [vmem:[%s20197_s2 + $0xb8] sm:$0x7]  ;;  %v38_v12 = vld [vmem:[%s20197_s2 + $0x10] sm:$0xff] }
  0x15   :  { %14377 = vmatprep.mubr.f32.mxu1 %v1228_v4  ;;  %v305_v48 = vand.u32 4294901760, %v304_v27  ;;  %v17345_v52 = vand.u32 4294901760, %v17332_v38  ;;  %v50_v9 = vsel %vm48_vm1, %v36_v23, 0  ;;  %v1109_v53 = vsel %vm48_vm1, %v13263_v25, 0 }
  0x16   :  { %v1247_v54 = vsub.f32 %v17313_v16, %v20209_v40  ;;  %v20208_v55 = vand.u32 4294901760, %v17337_v44  ;;  %v20207_v58 = vand.u32 4294901760, %v17340_v45  ;;  %v17355_v59 = vsub.f32 %v1106_v35, %v17342_v46  ;;  %v41_v40 = vld [vmem:[%s20197_s2 + $0x28] sm:$0xff] }
  0x17   :  { %20280 = vst [vmem:[#allocation4_spill] sm:$0xff] %v17345_v52  ;;  %v17360_v62 = vpack.c.bf16 %v305_v48, %v298_v26  ;;  %v311_v63 = vsub.f32 %v17332_v38, %v17345_v52  ;;  %v17364_v2 = vand.u32 4294901760, %v50_v9  ;;  %v17366_v3 = vand.u32 4294901760, %v1109_v53 }
  0x18   :  { %14378 = vmatmul.mubr.f32.gmra.mrb[4].mxu1 %v1238_v15  ;;  %v1248_v4 = vand.u32 4294901760, %v1247_v54  ;;  %v1257_v6 = vsub.f32 %v17337_v44, %v20208_v55  ;;  %v1267_v10 = vsub.f32 %v17340_v45, %v20207_v58  ;;  %v20206_v5 = vand.u32 4294901760, %v17355_v59  ;;  %v40_v55 = vld [vmem:[%s20197_s2 + $0x20] sm:$0xff] }
  0x19   :  { %16174 = vmatprep.subr.bf16.mxu1 %v17360_v62  ;;  %v17382_v15 = vand.u32 4294901760, %v311_v63  ;;  %v17385_v23 = vsub.f32 %v50_v9, %v17364_v2  ;;  %v17388_v25 = vsub.f32 %v1109_v53, %v17366_v3  ;;  %v53_v26 = vsel %vm48_vm1, %v37_v61, 0  ;;  %v39_v9 = vld [vmem:[%s20197_s2 + $0x18] sm:$0xff] }
  0x1a   :  { %16176 = vmatpush3.bf16.msra.mxu1 %v17360_v62  ;;  %14380 = vmatprep.mubr.f32.mxu1 %v1248_v4  ;;  %v1258_v27 = vand.u32 4294901760, %v1257_v6  ;;  %v1268_v35 = vand.u32 4294901760, %v1267_v10  ;;  %v1277_v48 = vsub.f32 %v17355_v59, %v20206_v5  ;;  %v17395_v54 = vand.u32 4294901760, %v53_v26 }
  0x1b   :  { %14397 = vmatprep.subr.mxu1 %v17382_v15  ;;  %v20211_v53 = vand.u32 4294901760, %v17385_v23  ;;  %v20212_v61 = vand.u32 4294901760, %v17388_v25  ;;  %v1112_v63 = vsel %vm48_vm1, %v13264_v11, 0  ;;  %v56_v4 = vsel %vm48_vm1, %v38_v12, 0 }
  0x1c   :  { %14381 = vmatmul.mubr.f32.gmra.mrb[6].mxu1 %v1258_v27  ;;  %v1278_v6 = vand.u32 4294901760, %v1277_v48  ;;  %v17406_v10 = vsub.f32 %v53_v26, %v17395_v54  ;;  %v17408_v5 = vand.u32 4294901760, %v1112_v63  ;;  %v17410_v58 = vand.u32 4294901760, %v56_v4 }
  0x1d   :  { %14383 = vmatprep.mubr.f32.mxu1 %v1268_v35  ;;  %v162_v11 = vsub.f32 %v17385_v23, %v20211_v53  ;;  %v1287_v12 = vsub.f32 %v17388_v25, %v20212_v61  ;;  %v59_v26 = vsel %vm48_vm1, %v39_v9, 0  ;;  %v17427_v27 = vpack.c.bf16 %v17204_v24, %v17198_v22  ;;  %v42_v9 = vld [vmem:[%s20197_s2 + $0x30] sm:$0xff]  ;;  %v43_v61 = vld [vmem:[%s20197_s2 + $0x38] sm:$0xff] }
  0x1e   :  { %20281 = vst [vmem:[#allocation5_spill] sm:$0xff] %v17406_v10  ;;  %14398 = vmatpush3.msra.mxu1 %v17382_v15  ;;  %v20219_v48 = vand.u32 4294901760, %v17406_v10  ;;  %v17432_v35 = vsub.f32 %v1112_v63, %v17408_v5  ;;  %v17435_v60 = vsub.f32 %v56_v4, %v17410_v58  ;;  %v17437_v53 = vand.u32 4294901760, %v59_v26 }
  0x1f   :  { %v163_v50 = vand.u32 4294901760, %v162_v11  ;;  %v1288_v49 = vand.u32 4294901760, %v1287_v12  ;;  %16178 = vmatprep.subr.bf16.mxu1 %v17427_v27  ;;  %v62_v63 = vsel %vm48_vm1, %v40_v55, 0  ;;  %v65_v47 = vsel %vm48_vm1, %v41_v40, 0 }
  0x20   :  { %20282 = vst [vmem:[#allocation6_spill] sm:$0xff] %v17432_v35  ;;  %20283 = vst [vmem:[#allocation7_spill] sm:$0xff] %v17435_v60  ;;  %14384 = vmatmul.mubr.f32.gmra.mrb[8].mxu1 %v1278_v6  ;;  %v172_v4 = vsub.f32 %v17406_v10, %v20219_v48  ;;  %v20221_v37 = vand.u32 4294901760, %v17432_v35  ;;  %v20222_v36 = vand.u32 4294901760, %v17435_v60  ;;  %v17454_v8 = vsub.f32 %v59_v26, %v17437_v53 }
  0x21   :  { %14203 = vmatprep.mubr.f32.mxu0 %v163_v50  ;;  %14386 = vmatprep.mubr.f32.mxu1 %v1288_v49  ;;  %v17456_v11 = vand.u32 4294901760, %v62_v63  ;;  %v17458_v12 = vand.u32 4294901760, %v65_v47  ;;  %v68_v40 = vsel %vm48_vm1, %v42_v9, 0  ;;  %v71_v55 = vsel %vm48_vm1, %v43_v61, 0 }
  0x22   :  { %v173_v6 = vand.u32 4294901760, %v172_v4  ;;  %v1297_v48 = vsub.f32 %v17432_v35, %v20221_v37  ;;  %v182_v26 = vsub.f32 %v17435_v60, %v20222_v36  ;;  %v20233_v50 = vand.u32 4294901760, %v17454_v8  ;;  %v44_v4 = vld [vmem:[%s20197_s2 + $0x40] sm:$0xff]  ;;  %v45_v37 = vld [vmem:[%s20197_s2 + $0x48] sm:$0xff] }
  0x23   :  { %v17470_v49 = vsub.f32 %v62_v63, %v17456_v11  ;;  %v17473_v0 = vsub.f32 %v65_v47, %v17458_v12  ;;  %v17475_v9 = vand.u32 4294901760, %v68_v40  ;;  %v17477_v61 = vand.u32 4294901760, %v71_v55  ;;  %v46_v63 = vld [vmem:[%s20197_s2 + $0x50] sm:$0xff] }
  0x24   :  { %14204 = vmatmul.mubr.f32.vlgmr.msra.gmra.mrb[0].mxu0 %v173_v6  ;;  %v1298_v36 = vand.u32 4294901760, %v1297_v48  ;;  %v183_v47 = vand.u32 4294901760, %v182_v26  ;;  %v192_v32 = vsub.f32 %v17454_v8, %v20233_v50  ;;  %v17493_v30 = vpack.c.bf16 %v17293_v1, %v17271_v56  ;;  %v47_v48 = vld [vmem:[%s20197_s2 + $0x58] sm:$0x7] }
  0x25   :  { %20284 = vst [vmem:[#allocation8_spill] sm:$0xff] %v17470_v49  ;;  %20285 = vst [vmem:[#allocation9_spill] sm:$0xff] %v17473_v0  ;;  %v20234_v52 = vand.u32 4294901760, %v17470_v49  ;;  %v17498_v60 = vsub.f32 %v68_v40, %v17475_v9  ;;  %v17501_v10 = vsub.f32 %v71_v55, %v17477_v61  ;;  %16124 = vmatpush3.bf16.msra.mxu0 %v17273_v57  ;;  %v74_v26 = vsel %vm48_vm1, %v44_v4, 0 }
  0x26   :  { %14387 = vmatmul.mubr.f32.gmra.mrb[10].mxu1 %v1298_v36  ;;  %14206 = vmatprep.mubr.f32.mxu0 %v183_v47  ;;  %v193_v6 = vand.u32 4294901760, %v192_v32  ;;  %v77_v50 = vsel %vm48_vm1, %v45_v37, 0  ;;  %v80_v35 = vsel %vm48_vm1, %v46_v63, 0  ;;  %v20287_v57 = vand.u32 4294901760, %v17473_v0 }
  0x27   :  { %20286 = vst [vmem:[#allocation10_spill] sm:$0xff] %v17501_v10  ;;  %14399 = vmatprep.mubr.f32.mxu1 %v17194_v20  ;;  %v202_v40 = vsub.f32 %v17470_v49, %v20234_v52  ;;  %v20242_v36 = vand.u32 4294901760, %v17498_v60  ;;  %v20241_v32 = vand.u32 4294901760, %v17501_v10  ;;  %16126 = vmatprep.subr.bf16.mxu0 %v17360_v62  ;;  %v17520_v37 = vand.u32 4294901760, %v74_v26 }
  0x28   :  { %v212_v55 = vsub.f32 %v17473_v0, %v20287_v57  ;;  %14207 = vmatmul.mubr.f32.gmra.mrb[2].mxu0 %v193_v6  ;;  %v17522_v4 = vand.u32 4294901760, %v77_v50  ;;  %v17524_v63 = vand.u32 4294901760, %v80_v35  ;;  %v83_v47 = vsel %vm48_vm1, %v47_v48, 0 }
  0x29   :  { %v203_v52 = vand.u32 4294901760, %v202_v40  ;;  %v222_v57 = vsub.f32 %v17498_v60, %v20242_v36  ;;  %v232_v0 = vsub.f32 %v17501_v10, %v20241_v32  ;;  %16128 = vmatpush3.bf16.msra.mxu0 %v17360_v62  ;;  %v17536_v6 = vsub.f32 %v74_v26, %v17520_v37 }
  0x2a   :  { %v213_v20 = vand.u32 4294901760, %v212_v55  ;;  %14400 = vmatmul.mubr.f32.vlgmr.msra.gmra.mrb[0].mxu1 %v17196_v21  ;;  %v17539_v49 = vsub.f32 %v77_v50, %v17522_v4  ;;  %v17542_v48 = vsub.f32 %v80_v35, %v17524_v63  ;;  %v17544_v40 = vand.u32 4294901760, %v83_v47  ;;  %14229 = vmatprep.subr.mxu0 %v17382_v15 }
  0x2b   :  { %16180 = vmatpush3.bf16.msra.mxu1 %v17427_v27  ;;  %14209 = vmatprep.mubr.f32.mxu0 %v203_v52  ;;  %v223_v55 = vand.u32 4294901760, %v222_v57  ;;  %v233_v62 = vand.u32 4294901760, %v232_v0  ;;  %v20288_v32 = vand.u32 4294901760, %v17198_v22  ;;  %v20289_v26 = vand.u32 4294901760, %v17204_v24 }
  0x2c   :  { %v20290_v50 = vand.u32 4294901760, %v17271_v56  ;;  %v20291_v35 = vand.u32 4294901760, %v17293_v1  ;;  %14402 = vmatprep.mubr.f32.mxu1 %v17218_v31  ;;  %14210 = vmatmul.mubr.f32.gmra.mrb[4].mxu0 %v213_v20  ;;  %v241_v10 = vand.u32 4294901760, %v17536_v6  ;;  %v251_v52 = vand.u32 4294901760, %v17539_v49 }
  0x2d   :  { %v17552_v36 = vpack.c.bf16 %v20289_v26, %v20288_v32  ;;  %v261_v0 = vand.u32 4294901760, %v17542_v48  ;;  %v17565_v22 = vsub.f32 %v83_v47, %v17544_v40  ;;  %14212 = vmatprep.mubr.f32.mxu0 %v223_v55  ;;  %16182 = vmatprep.subr.bf16.mxu1 %v17493_v30  ;;  %v20296_v26 = vld [vmem:[#allocation8_spill] sm:$0xff] }
  0x2e   :  { %v17558_v21 = vpack.c.bf16 %v20291_v35, %v20290_v50  ;;  %14403 = vmatmul.mubr.f32.gmra.mrb[2].mxu1 %v17223_v33  ;;  %v242_v24 = vsub.f32 %v17536_v6, %v241_v10  ;;  %v252_v20 = vsub.f32 %v17539_v49, %v251_v52  ;;  %14230 = vmatpush3.msra.mxu0 %v17382_v15  ;;  %v20297_v50 = vand.u32 4294901760, %v17215_v29 }
  0x2f   :  { %v262_v56 = vsub.f32 %v17542_v48, %v261_v0  ;;  %v271_v1 = vand.u32 4294901760, %v17565_v22  ;;  %14405 = vmatprep.mubr.f32.mxu1 %v17225_v34  ;;  %16184 = vmatpush3.bf16.msra.mxu1 %v17493_v30  ;;  %v20298_v35 = vand.u32 4294901760, %v17235_v39 }
  0x30   :  { %14213 = vmatmul.mubr.f32.gmra.mrb[6].mxu0 %v233_v62  ;;  %v243_v32 = vand.u32 4294901760, %v242_v24  ;;  %v253_v47 = vand.u32 4294901760, %v252_v20  ;;  %14425 = vmatprep.subr.mxu1 %v17332_v38  ;;  %v20295_v62 = vand.u32 4294901760, %v17212_v28  ;;  %v20299_v24 = vld [vmem:[#allocation9_spill] sm:$0xff]  ;;  %v20303_v20 = vld [vmem:[#allocation4_spill] sm:$0xff] }
  0x31   :  { %v272_v57 = vsub.f32 %v17565_v22, %v271_v1  ;;  %v263_v55 = vand.u32 4294901760, %v262_v56  ;;  %16130 = vmatprep.subr.bf16.mxu0 %v17427_v27  ;;  %v20304_v56 = vand.u32 4294901760, %v17261_v51 }
  0x32   :  { %14406 = vmatmul.mubr.f32.gmra.mrb[4].mxu1 %v17246_v43  ;;  %14215 = vmatprep.mubr.f32.mxu0 %v243_v32  ;;  %v20305_v32 = vand.u32 4294901760, %v17313_v16 }
  0x33   :  { %14408 = vmatprep.mubr.f32.mxu1 %v17300_v7  ;;  %14426 = vmatpush3.msra.mxu1 %v17332_v38  ;;  %v273_v15 = vand.u32 4294901760, %v272_v57 }
  0x34   :  { %14216 = vmatmul.mubr.f32.gmra.mrb[8].mxu0 %v253_v47  ;;  %16186 = vmatprep.subr.bf16.mxu1 %v17177_v13  ;;  %v20310_v47 = vand.u32 4294901760, %v17388_v25 }
  0x35   :  { %14218 = vmatprep.mubr.f32.mxu0 %v263_v55  ;;  %v20317_v55 = vld [vmem:[#allocation3_spill] sm:$0xff] }
  0x36   :  { %14409 = vmatmul.mubr.f32.gmra.mrb[6].mxu1 %v17315_v17 }
  0x37   :  { %14411 = vmatprep.mubr.f32.mxu1 %v17317_v18 }
  0x38   :  { %14219 = vmatmul.mubr.f32.gmra.mrb[10].mxu0 %v273_v15 }
  0x39   :  { %14231 = vmatprep.mubr.f32.mxu0 %v17364_v2 }
  0x3a   :  { %14412 = vmatmul.mubr.f32.gmra.mrb[8].mxu1 %v17342_v46 }
  0x3b   :  { %14414 = vmatprep.mubr.f32.mxu1 %v17366_v3 }
  0x3c   :  { %14232 = vmatmul.mubr.f32.vlgmr.msra.gmra.mrb[0].mxu0 %v17395_v54 }
  0x3d   :  { %14234 = vmatprep.mubr.f32.mxu0 %v17410_v58  ;;  %16132 = vmatpush3.bf16.msra.mxu0 %v17427_v27  ;;  %v20294_v27 = vld [vmem:[#allocation6_spill] sm:$0xff] }
  0x3e   :  { %14415 = vmatmul.mubr.f32.gmra.mrb[10].mxu1 %v17408_v5  ;;  %16134 = vmatprep.subr.bf16.mxu0 %v17493_v30 }
  0x3f   :  { %14427 = vmatprep.mubr.f32.mxu1 %v17212_v28  ;;  %v20300_v28 = vand.u32 4294901760, %v17241_v41 }
  0x40   :  { %14235 = vmatmul.mubr.f32.gmra.mrb[2].mxu0 %v17437_v53 }
  0x41   :  { %14237 = vmatprep.mubr.f32.mxu0 %v17456_v11  ;;  %16136 = vmatpush3.bf16.msra.mxu0 %v17493_v30  ;;  %v20292_v30 = vld [vmem:[#allocation5_spill] sm:$0xff] }
  0x42   :  { %14428 = vmatmul.mubr.f32.vlgmr.msra.gmra.mrb[0].mxu1 %v17215_v29  ;;  %14257 = vmatprep.subr.mxu0 %v17332_v38  ;;  %v20301_v29 = vand.u32 4294901760, %v17244_v42  ;;  %v20311_v57 = vand.u32 4294901760, %v20292_v30 }
  0x43   :  { %16188 = vmatpush3.bf16.msra.mxu1 %v17177_v13  ;;  %14430 = vmatprep.mubr.f32.mxu1 %v17235_v39  ;;  %v20302_v39 = vld [vmem:[#allocation10_spill] sm:$0xff] }
  0x44   :  { %14238 = vmatmul.mubr.f32.gmra.mrb[4].mxu0 %v17458_v12  ;;  %16190 = vmatprep.subr.bf16.mxu1 %v17192_v19 }
  0x45   :  { %14240 = vmatprep.mubr.f32.mxu0 %v17475_v9  ;;  %14258 = vmatpush3.msra.mxu0 %v17332_v38  ;;  %v20293_v38 = vld [vmem:[#allocation7_spill] sm:$0xff] }
  0x46   :  { %14431 = vmatmul.mubr.f32.gmra.mrb[2].mxu1 %v17241_v41  ;;  %16138 = vmatprep.subr.bf16.mxu0 %v17177_v13  ;;  %v20306_v41 = vand.u32 4294901760, %v17337_v44 }
  0x47   :  { %14433 = vmatprep.mubr.f32.mxu1 %v17244_v42  ;;  %16192 = vmatpush3.bf16.msra.mxu1 %v17192_v19  ;;  %v20307_v42 = vand.u32 4294901760, %v17340_v45 }
  0x48   :  { %14241 = vmatmul.mubr.f32.gmra.mrb[6].mxu0 %v17477_v61  ;;  %14453 = vmatprep.subr.mxu1 %v17180_v14 }
  0x49   :  { %14243 = vmatprep.mubr.f32.mxu0 %v17520_v37 }
  0x4a   :  { %14434 = vmatmul.mubr.f32.gmra.mrb[4].mxu1 %v17261_v51  ;;  %v20308_v51 = vand.u32 4294901760, %v17385_v23 }
  0x4b   :  { %14436 = vmatprep.mubr.f32.mxu1 %v17313_v16  ;;  %14454 = vmatpush3.msra.mxu1 %v17180_v14  ;;  %v20309_v16 = vand.u32 4294901760, %v17355_v59 }
  0x4c   :  { %14244 = vmatmul.mubr.f32.gmra.mrb[8].mxu0 %v17522_v4  ;;  %16194 = vmatprep.subr.bf16.mxu1 %v17552_v36 }
  0x4d   :  { %14246 = vmatprep.mubr.f32.mxu0 %v17524_v63 }
  0x4e   :  { %14437 = vmatmul.mubr.f32.gmra.mrb[6].mxu1 %v17337_v44  ;;  %v20312_v44 = vand.u32 4294901760, %v20293_v38 }
  0x4f   :  { %14439 = vmatprep.mubr.f32.mxu1 %v17340_v45  ;;  %v20313_v45 = vand.u32 4294901760, %v20294_v27 }
  0x50   :  { %14247 = vmatmul.mubr.f32.gmra.mrb[10].mxu0 %v17544_v40 }
  0x51   :  { %14259 = vmatprep.mubr.f32.mxu0 %v17385_v23  ;;  %v20314_v23 = vld [vmem:[#allocation2_spill] sm:$0xff] }
  0x52   :  { %14440 = vmatmul.mubr.f32.gmra.mrb[8].mxu1 %v17355_v59  ;;  %v20315_v59 = vand.u32 4294901760, %v17454_v8 }
  0x53   :  { %14442 = vmatprep.mubr.f32.mxu1 %v17388_v25  ;;  %v20316_v25 = vand.u32 4294901760, %v20296_v26 }
  0x54   :  { %14260 = vmatmul.mubr.f32.vlgmr.msra.gmra.mrb[0].mxu0 %v20292_v30 }
  0x55   :  { %14262 = vmatprep.mubr.f32.mxu0 %v20293_v38  ;;  %16140 = vmatpush3.bf16.msra.mxu0 %v17177_v13  ;;  %v4244_v38 = vld [vmem:[%s20199_s5 + $0x10] sm:$0x7f] }
  0x56   :  { %14443 = vmatmul.mubr.f32.gmra.mrb[10].mxu1 %v20294_v27  ;;  %16142 = vmatprep.subr.bf16.mxu0 %v17192_v19 }
  0x57   :  { %14455 = vmatprep.mubr.f32.mxu1 %v20295_v62 }
  0x58   :  { %14263 = vmatmul.mubr.f32.gmra.mrb[2].mxu0 %v17454_v8  ;;  %v20319_v8 = vand.u32 4294901760, %v17498_v60 }
  0x59   :  { %14265 = vmatprep.mubr.f32.mxu0 %v20296_v26  ;;  %16144 = vmatpush3.bf16.msra.mxu0 %v17192_v19 }
  0x5a   :  { %14456 = vmatmul.mubr.f32.vlgmr.msra.gmra.mrb[0].mxu1 %v20297_v50  ;;  %14285 = vmatprep.subr.mxu0 %v17180_v14 }
  0x5b   :  { %16196 = vmatpush3.bf16.msra.mxu1 %v17552_v36  ;;  %14458 = vmatprep.mubr.f32.mxu1 %v20298_v35 }
  0x5c   :  { %14266 = vmatmul.mubr.f32.gmra.mrb[4].mxu0 %v20299_v24  ;;  %16198 = vmatprep.subr.bf16.mxu1 %v17558_v21 }
  0x5d   :  { %14268 = vmatprep.mubr.f32.mxu0 %v17498_v60  ;;  %14286 = vmatpush3.msra.mxu0 %v17180_v14  ;;  %v20260_v60 = vmov 0.0|0.0  }
  0x5e   :  { %14459 = vmatmul.mubr.f32.gmra.mrb[2].mxu1 %v20300_v28  ;;  %16146 = vmatprep.subr.bf16.mxu0 %v17552_v36 }
  0x5f   :  { %14461 = vmatprep.mubr.f32.mxu1 %v20301_v29  ;;  %16200 = vmatpush3.bf16.msra.mxu1 %v17558_v21 }
  0x60   :  { %14269 = vmatmul.mubr.f32.gmra.mrb[6].mxu0 %v20302_v39  ;;  %14481 = vmatprep.subr.mxu1 %v20303_v20 }
  0x61   :  { %14271 = vmatprep.mubr.f32.mxu0 %v17536_v6  ;;  %v4241_v6 = vld [vmem:[%s20198_s1 + $0x8] sm:$0xf] }
  0x62   :  { %14462 = vmatmul.mubr.f32.gmra.mrb[4].mxu1 %v20304_v56 }
  0x63   :  { %14464 = vmatprep.mubr.f32.mxu1 %v20305_v32  ;;  %14482 = vmatpush3.msra.mxu1 %v20303_v20 }
  0x64   :  { %14272 = vmatmul.mubr.f32.gmra.mrb[8].mxu0 %v17539_v49  ;;  %16202 = vmatprep.subr.bf16.mxu1 %v17177_v13  ;;  %v4257_v49 = vsel %vm4255_vm2, %v4241_v6, 0 }
  0x65   :  { %14274 = vmatprep.mubr.f32.mxu0 %v17542_v48 }
  0x66   :  { %14465 = vmatmul.mubr.f32.gmra.mrb[6].mxu1 %v20306_v41 }
  0x67   :  { %14467 = vmatprep.mubr.f32.mxu1 %v20307_v42  ;;  %v13270_v42 = vld [vmem:[%s20199_s5 + $0x18] sm:$0xff] }
  0x68   :  { %14275 = vmatmul.mubr.f32.gmra.mrb[10].mxu0 %v17565_v22  ;;  %v4242_v22 = vld [vmem:[%s20199_s5] sm:$0xff] }
  0x69   :  { %14287 = vmatprep.mubr.f32.mxu0 %v20308_v51  ;;  %v4811_v51 = vsel %vm4245_vm3, %v13270_v42, 0 }
  0x6a   :  { %14468 = vmatmul.mubr.f32.gmra.mrb[8].mxu1 %v20309_v16  ;;  %v13271_v16 = vld [vmem:[%s20199_s5 + $0x20] sm:$0xff] }
  0x6b   :  { %14470 = vmatprep.mubr.f32.mxu1 %v20310_v47  ;;  %v17942_v47 = vand.u32 4294901760, %v4811_v51 }
  0x6c   :  { %14288 = vmatmul.mubr.f32.vlgmr.msra.gmra.mrb[0].mxu0 %v20311_v57  ;;  %v4814_v57 = vsel %vm4245_vm3, %v13271_v16, 0 }
  0x6d   :  { %14290 = vmatprep.mubr.f32.mxu0 %v20312_v44  ;;  %16148 = vmatpush3.bf16.msra.mxu0 %v17552_v36  ;;  %v20318_v36 = vand.u32 4294901760, %v20299_v24  ;;  %v13272_v44 = vld [vmem:[%s20199_s5 + $0x28] sm:$0x7f] }
  0x6e   :  { %14471 = vmatmul.mubr.f32.gmra.mrb[10].mxu1 %v20313_v45  ;;  %16150 = vmatprep.subr.bf16.mxu0 %v17558_v21  ;;  %v17952_v45 = vsub.f32 %v4811_v51, %v17942_v47 }
  0x6f   :  { %14483 = vmatprep.mubr.f32.mxu1 %v20314_v23 }
  0x70   :  { %14291 = vmatmul.mubr.f32.gmra.mrb[2].mxu0 %v20315_v59  ;;  %v4817_v59 = vsel %vm4245_vm3, %v13272_v44, 0 }
  0x71   :  { %14293 = vmatprep.mubr.f32.mxu0 %v20316_v25  ;;  %16152 = vmatpush3.bf16.msra.mxu0 %v17558_v21  ;;  %v20320_v21 = vand.u32 4294901760, %v20302_v39  ;;  %v4888_v25 = vand.u32 4294901760, %v17952_v45 }
  0x72   :  { %14484 = vmatmul.mubr.f32.vlgmr.msra.gmra.mrb[0].mxu1 %v20317_v55  ;;  %14313 = vmatprep.subr.mxu0 %v20303_v20 }
  0x73   :  { %16204 = vmatpush3.bf16.msra.mxu1 %v17177_v13  ;;  %14486 = vmatprep.mubr.f32.mxu1 %v17218_v31 }
  0x74   :  { %14294 = vmatmul.mubr.f32.gmra.mrb[4].mxu0 %v20318_v36  ;;  %16206 = vmatprep.subr.bf16.mxu1 %v17192_v19  ;;  %v17964_v36 = vand.u32 4294901760, %v4817_v59 }
  0x75   :  { %14296 = vmatprep.mubr.f32.mxu0 %v20319_v8  ;;  %14314 = vmatpush3.msra.mxu0 %v20303_v20  ;;  %v20247_v20 = vmov 0.0   ;;  %v4889_v8 = vsub.f32 %v17952_v45, %v4888_v25 }
  0x76   :  { %14487 = vmatmul.mubr.f32.gmra.mrb[2].mxu1 %v17223_v33  ;;  %16154 = vmatprep.subr.bf16.mxu0 %v17177_v13  ;;  %v17976_v6 = vsub.f32 %v4817_v59, %v17964_v36 }
  0x77   :  { %14489 = vmatprep.mubr.f32.mxu1 %v17225_v34  ;;  %16208 = vmatpush3.bf16.msra.mxu1 %v17192_v19 }
  0x78   :  { %14297 = vmatmul.mubr.f32.gmra.mrb[6].mxu0 %v20320_v21  ;;  %14509 = vmatprep.subr.mxu1 %v17180_v14 }
  0x79   :  { %14299 = vmatprep.mubr.f32.mxu0 %v241_v10  ;;  %v4240_v10 = vld [vmem:[%s20198_s1] sm:$0xff] }
  0x7a   :  { %14490 = vmatmul.mubr.f32.gmra.mrb[4].mxu1 %v17246_v43  ;;  %v4260_v48 = vand.u32 4294901760, %v4240_v10 }
  0x7b   :  { %14492 = vmatprep.mubr.f32.mxu1 %v17300_v7  ;;  %14510 = vmatpush3.msra.mxu1 %v17180_v14 }
  0x7c   :  { %14300 = vmatmul.mubr.f32.gmra.mrb[8].mxu0 %v251_v52  ;;  %16305 = vmatprep.subr.bf16.mxu1 %v20260_v60  ;;  %v4263_v52 = vand.u32 4294901760, %v4257_v49  ;;  %v17766_v15 = vsub.f32 %v4240_v10, %v4260_v48  ;;  %v4890_v10 = vand.u32 4294901760, %v4889_v8 }
  0x7d   :  { %14302 = vmatprep.mubr.f32.mxu0 %v261_v0 }
  0x7e   :  { %14493 = vmatmul.mubr.f32.gmra.mrb[6].mxu1 %v17315_v17  ;;  %v17741_v0 = vpack.c.bf16 %v4263_v52, %v4260_v48  ;;  %v17768_v30 = vsub.f32 %v4257_v49, %v4263_v52  ;;  %v4359_v27 = vand.u32 4294901760, %v17766_v15  ;;  %v4908_v48 = vand.u32 4294901760, %v17976_v6  ;;  %v17988_v52 = vld [vmem:[%s20200_s3 + $0x48] sm:$0xff] }
  0x7f   :  { %14495 = vmatprep.mubr.f32.mxu1 %v17317_v18 }
  0x80   :  { %14303 = vmatmul.mubr.f32.gmra.mrb[10].mxu0 %v271_v1  ;;  %v4243_v1 = vld [vmem:[%s20199_s5 + $0x8] sm:$0xff]  ;;  %v4366_v62 = vand.u32 4294901760, %v17768_v30 }
  0x81   :  { %14315 = vmatprep.mubr.f32.mxu0 %v17364_v2 }
  0x82   :  { %14496 = vmatmul.mubr.f32.gmra.mrb[8].mxu1 %v17342_v46  ;;  %v4367_v35 = vsub.f32 %v17768_v30, %v4366_v62  ;;  %v17913_v41 = vpack.c.bf16 %v4366_v62, %v4359_v27 }
  0x83   :  { %14498 = vmatprep.mubr.f32.mxu1 %v17366_v3 }
  0x84   :  { %14316 = vmatmul.mubr.f32.vlgmr.msra.gmra.mrb[0].mxu0 %v17395_v54  ;;  %v4368_v29 = vand.u32 4294901760, %v4367_v35  ;;  %20323 = vst [vmem:[#allocation6_spill] sm:$0xff] %v17913_v41 }
  0x85   :  { %14318 = vmatprep.mubr.f32.mxu0 %v17410_v58  ;;  %16156 = vmatpush3.bf16.msra.mxu0 %v17177_v13  ;;  %v4247_v13 = vsel %vm4245_vm3, %v4242_v22, 0  ;;  %v17993_v22 = vand.u32 4294901760, %v17988_v52 }
  0x86   :  { %14499 = vmatmul.mubr.f32.gmra.mrb[10].mxu1 %v17408_v5  ;;  %16158 = vmatprep.subr.bf16.mxu0 %v17192_v19 }
  0x87   :  { %14511 = vmatprep.mubr.f32.mxu1 %v20314_v23  ;;  %v17954_v23 = vand.u32 4294901760, %v4814_v57 }
  0x88   :  { %14319 = vmatmul.mubr.f32.gmra.mrb[2].mxu0 %v17437_v53 }
  0x89   :  { %14321 = vmatprep.mubr.f32.mxu0 %v17456_v11  ;;  %16160 = vmatpush3.bf16.msra.mxu0 %v17192_v19  ;;  %v17762_v19 = vand.u32 4294901760, %v4247_v13 }
  0x8a   :  { %14512 = vmatmul.mubr.f32.vlgmr.msra.gmra.mrb[0].mxu1 %v20317_v55  ;;  %14341 = vmatprep.subr.mxu0 %v17180_v14  ;;  %v17962_v55 = vsub.f32 %v4814_v57, %v17954_v23 }
  0x8b   :  { %14514 = vmatprep.mubr.f32.mxu1 %v17218_v31  ;;  %16307 = vmatpush3.bf16.msra.mxu1 %v17741_v0  ;;  %v4250_v31 = vsel %vm4245_vm3, %v4243_v1, 0  ;;  %v4909_v1 = vsub.f32 %v17976_v6, %v4908_v48 }
  0x8c   :  { %14322 = vmatmul.mubr.f32.gmra.mrb[4].mxu0 %v17458_v12  ;;  %16308 = vmatprep.subr.bf16.mxu1 %v20260_v60  ;;  %v4898_v21 = vand.u32 4294901760, %v17962_v55 }
  0x8d   :  { %14324 = vmatprep.mubr.f32.mxu0 %v17475_v9  ;;  %14342 = vmatpush3.msra.mxu0 %v17180_v14  ;;  %v17777_v14 = vsub.f32 %v4247_v13, %v17762_v19 }
  0x8e   :  { %14515 = vmatmul.mubr.f32.gmra.mrb[2].mxu1 %v17223_v33  ;;  %v17779_v33 = vand.u32 4294901760, %v4250_v31  ;;  %v4899_v49 = vsub.f32 %v17962_v55, %v4898_v21 }
  0x8f   :  { %14517 = vmatprep.mubr.f32.mxu1 %v17225_v34  ;;  %v4253_v34 = vsel %vm4245_vm3, %v4244_v38, 0 }
  0x90   :  { %14325 = vmatmul.mubr.f32.gmra.mrb[6].mxu0 %v17477_v61  ;;  %v17790_v26 = vsub.f32 %v4250_v31, %v17779_v33  ;;  %v17792_v50 = vand.u32 4294901760, %v4253_v34  ;;  %v4900_v13 = vand.u32 4294901760, %v4899_v49 }
  0x91   :  { %14327 = vmatprep.mubr.f32.mxu0 %v17520_v37 }
  0x92   :  { %14518 = vmatmul.mubr.f32.gmra.mrb[4].mxu1 %v17246_v43  ;;  %v4328_v43 = vand.u32 4294901760, %v17777_v14  ;;  %v17809_v24 = vsub.f32 %v4253_v34, %v17792_v50 }
  0x93   :  { %14520 = vmatprep.mubr.f32.mxu1 %v17300_v7  ;;  %v4360_v7 = vsub.f32 %v17766_v15, %v4359_v27 }
  0x94   :  { %14328 = vmatmul.mubr.f32.gmra.mrb[8].mxu0 %v17522_v4  ;;  %v4348_v39 = vand.u32 4294901760, %v17809_v24 }
  0x95   :  { %14330 = vmatprep.mubr.f32.mxu0 %v17524_v63  ;;  %v4361_v28 = vand.u32 4294901760, %v4360_v7 }
  0x96   :  { %14521 = vmatmul.mubr.f32.gmra.mrb[6].mxu1 %v17315_v17  ;;  %v4329_v17 = vsub.f32 %v17777_v14, %v4328_v43 }
  0x97   :  { %14523 = vmatprep.mubr.f32.mxu1 %v17317_v18  ;;  %v4338_v18 = vand.u32 4294901760, %v17790_v26 }
  0x98   :  { %14331 = vmatmul.mubr.f32.gmra.mrb[10].mxu0 %v17544_v40 }
  0x99   :  { %14343 = vmatprep.mubr.f32.mxu0 %v17364_v2  ;;  %v4339_v2 = vsub.f32 %v17790_v26, %v4338_v18 }
  0x9a   :  { %14524 = vmatmul.mubr.f32.gmra.mrb[8].mxu1 %v17342_v46  ;;  %v4330_v46 = vand.u32 4294901760, %v4329_v17 }
  0x9b   :  { %14526 = vmatprep.mubr.f32.mxu1 %v17366_v3  ;;  %v17821_v3 = vpack.c.bf16 %v4368_v29, %v4361_v28 }
  0x9c   :  { %14344 = vmatmul.mubr.f32.vlgmr.msra.gmra.mrb[0].mxu0 %v17395_v54 }
  0x9d   :  { %14346 = vmatprep.mubr.f32.mxu0 %v17410_v58  ;;  %20321 = vst [vmem:[#allocation5_spill] sm:$0xff] %v17821_v3  ;;  %v4340_v58 = vand.u32 4294901760, %v4339_v2 }
  0x9e   :  { %14527 = vmatmul.mubr.f32.gmra.mrb[10].mxu1 %v17408_v5  ;;  %v4349_v5 = vsub.f32 %v17809_v24, %v4348_v39 }
  0x9f   :  { %14869 = vmatprep.mubr.msk.f32.mxu1 %vm17092_vm4, %v20247_v20 }
  0xa0   :  { %14347 = vmatmul.mubr.f32.gmra.mrb[2].mxu0 %v17437_v53  ;;  %v4350_v54 = vand.u32 4294901760, %v4349_v5  ;;  %v17842_v53 = vpack.c.bf16 %v17768_v30, %v17766_v15 }
  0xa1   :  { %14349 = vmatprep.mubr.f32.mxu0 %v17456_v11  ;;  %v17853_v11 = vld [vmem:[%s20200_s3 + $0x28] sm:$0xff] }
  0xa2   :  { %14870 = vmatmul.mubr.f32.vlgmr.msra.gmra.mrb[12].mxu1 %v4330_v46  ;;  %20322 = vst [vmem:[#allocation7_spill] sm:$0xff] %v17842_v53 }
  0xa3   :  { %14872 = vmatprep.mubr.msk.f32.mxu1 %vm17092_vm4, %v20247_v20  ;;  %16310 = vmatpush3.bf16.msra.mxu1 %v17821_v3 }
  0xa4   :  { %14350 = vmatmul.mubr.f32.gmra.mrb[4].mxu0 %v17458_v12  ;;  %16311 = vmatprep.subr.bf16.mxu1 %v20260_v60  ;;  %v17858_v12 = vld [vmem:[%s20200_s3 + $0x30] sm:$0xff] }
  0xa5   :  { %14352 = vmatprep.mubr.f32.mxu0 %v17475_v9  ;;  %v17863_v9 = vld [vmem:[%s20200_s3 + $0x38] sm:$0xff] }
  0xa6   :  { %14873 = vmatmul.mubr.f32.gmra.mrb[14].mxu1 %v4340_v58 }
  0xa7   :  { %14875 = vmatprep.mubr.msk.f32.mxu1 %vm17092_vm4, %v20247_v20 }
  0xa8   :  { %14353 = vmatmul.mubr.f32.gmra.mrb[6].mxu0 %v17477_v61  ;;  %v2129_v61 = vand.u32 4294901760, %v17853_v11 }
  0xa9   :  { %14355 = vmatprep.mubr.f32.mxu0 %v17520_v37  ;;  %v2132_v37 = vand.u32 4294901760, %v17858_v12 }
  0xaa   :  { %14876 = vmatmul.mubr.f32.gmra.mrb[16].mxu1 %v4350_v54  ;;  %v18005_v31 = vsub.f32 %v17853_v11, %v2129_v61 }
  0xab   :  { %14882 = vmatprep.mubr.msk.f32.mxu1 %vm17092_vm4, %v20247_v20  ;;  %v18010_v15 = vsub.f32 %v17858_v12, %v2132_v37 }
  0xac   :  { %14356 = vmatmul.mubr.f32.gmra.mrb[8].mxu0 %v17522_v4  ;;  %v17872_v4 = vld [vmem:[%s20200_s3 + $0x40] sm:$0xff]  ;;  %v2321_v30 = vand.u32 4294901760, %v18005_v31 }
  0xad   :  { %14358 = vmatprep.mubr.f32.mxu0 %v17524_v63  ;;  %v2135_v63 = vand.u32 4294901760, %v17863_v9  ;;  %v2138_v56 = vand.u32 4294901760, %v17872_v4  ;;  %v2328_v38 = vand.u32 4294901760, %v18010_v15  ;;  %v18066_v29 = vpack.c.bf16 %v18010_v15, %v18005_v31 }
  0xae   :  { %14883 = vmatmul.mubr.f32.vlgmr.msra.gmra.mrb[12].mxu1 %v17762_v19 }
  0xaf   :  { %14885 = vmatprep.mubr.msk.f32.mxu1 %vm17092_vm4, %v20247_v20  ;;  %16313 = vmatpush3.bf16.msra.mxu1 %v17842_v53  ;;  %v17889_v32 = vpack.c.bf16 %v2138_v56, %v2135_v63  ;;  %v18027_v34 = vsub.f32 %v17863_v9, %v2135_v63  ;;  %v18032_v27 = vsub.f32 %v17872_v4, %v2138_v56 }
  0xb0   :  { %14359 = vmatmul.mubr.f32.gmra.mrb[10].mxu0 %v17544_v40  ;;  %16314 = vmatprep.subr.bf16.mxu1 %v20260_v60  ;;  %v17881_v40 = vpack.c.bf16 %v2132_v37, %v2129_v61  ;;  %v18120_v61 = vsub.f32 %v17988_v52, %v17993_v22 }
  0xb1   :  { %v18077_v46 = vpack.c.bf16 %v18032_v27, %v18027_v34 }
  0xb2   :  { %14886 = vmatmul.mubr.f32.gmra.mrb[14].mxu1 %v17779_v33  ;;  %16210 = vmatprep.subr.bf16.mxu0 %v17881_v40 }
  0xb3   :  { %14888 = vmatprep.mubr.msk.f32.mxu1 %vm17092_vm4, %v20247_v20  ;;  %16212 = vmatpush3.bf16.msra.mxu0 %v17881_v40 }
  0xb4   :  { %16214 = vmatprep.subr.bf16.mxu0 %v17889_v32 }
  0xb6   :  { %14889 = vmatmul.mubr.f32.gmra.mrb[16].mxu1 %v17792_v50 }
  0xb7   :  { %14895 = vmatprep.mubr.msk.f32.mxu1 %vm17092_vm4, %v20247_v20  ;;  %16216 = vmatpush3.bf16.msra.mxu0 %v17889_v32 }
  0xb8   :  { %14537 = vmatprep.subr.mxu0 %v17993_v22 }
  0xba   :  { %14896 = vmatmul.mubr.f32.vlgmr.msra.gmra.mrb[12].mxu1 %v17777_v14  ;;  %v2322_v14 = vsub.f32 %v18005_v31, %v2321_v30 }
  0xbb   :  { %14898 = vmatprep.mubr.msk.f32.mxu1 %vm17092_vm4, %v20247_v20  ;;  %16316 = vmatpush3.bf16.msra.mxu1 %v17741_v0 }
  0xbc   :  { %16317 = vmatprep.subr.bf16.mxu1 %v20260_v60  ;;  %14538 = vmatpush3.msra.mxu0 %v17993_v22  ;;  %v2323_v62 = vand.u32 4294901760, %v2322_v14 }
  0xbe   :  { %14899 = vmatmul.mubr.f32.gmra.mrb[14].mxu1 %v17790_v26  ;;  %v2335_v26 = vand.u32 4294901760, %v18027_v34 }
  0xbf   :  { %14901 = vmatprep.mubr.msk.f32.mxu1 %vm17092_vm4, %v20247_v20 }
  0xc0   :  { %v2336_v35 = vsub.f32 %v18027_v34, %v2335_v26 }
  0xc2   :  { %14902 = vmatmul.mubr.f32.gmra.mrb[16].mxu1 %v17809_v24 }
  0xc3   :  { %14908 = vmatprep.mubr.msk.f32.mxu1 %vm17092_vm4, %v20247_v20 }
  0xc6   :  { %14909 = vmatmul.mubr.f32.vlgmr.msra.gmra.mrb[12].mxu1 %v4328_v43 }
  0xc7   :  { %14911 = vmatprep.mubr.msk.f32.mxu1 %vm17092_vm4, %v20247_v20  ;;  %16319 = vmatpush3.bf16.msra.mxu1 %v17913_v41 }
  0xc8   :  { %16320 = vmatprep.subr.bf16.mxu1 %v20260_v60 }
  0xca   :  { %14912 = vmatmul.mubr.f32.gmra.mrb[14].mxu1 %v4338_v18  ;;  %v2337_v18 = vand.u32 4294901760, %v2336_v35 }
  0xcb   :  { %14914 = vmatprep.mubr.msk.f32.mxu1 %vm17092_vm4, %v20247_v20 }
  0xce   :  { %14915 = vmatmul.mubr.f32.gmra.mrb[16].mxu1 %v4348_v39 }
  0xcf   :  { %14921 = vmatprep.mubr.msk.f32.mxu1 %vm17092_vm4, %v20247_v20 }
  0xd2   :  { %14922 = vmatmul.mubr.f32.vlgmr.msra.gmra.mrb[12].mxu1 %v17762_v19 }
  0xd3   :  { %14924 = vmatprep.mubr.msk.f32.mxu1 %vm17092_vm4, %v20247_v20  ;;  %16322 = vmatpush3.bf16.msra.mxu1 %v17741_v0 }
  0xd4   :  { %16323 = vmatprep.subr.bf16.mxu1 %v20260_v60 }
  0xd6   :  { %14925 = vmatmul.mubr.f32.gmra.mrb[14].mxu1 %v17779_v33 }
  0xd7   :  { %14927 = vmatprep.mubr.msk.f32.mxu1 %vm17092_vm4, %v20247_v20 }
  0xda   :  { %14928 = vmatmul.mubr.f32.gmra.mrb[16].mxu1 %v17792_v50 }
  0xdb   :  { %14934 = vmatprep.mubr.msk.f32.mxu1 %vm17092_vm4, %v20247_v20 }
  0xde   :  { %14935 = vmatmul.mubr.f32.vlgmr.msra.gmra.mrb[12].mxu1 %v17762_v19  ;;  %v4910_v19 = vand.u32 4294901760, %v4909_v1 }
  0xdf   :  { %14937 = vmatprep.mubr.msk.f32.mxu1 %vm17092_vm4, %v20247_v20  ;;  %16325 = vmatpush3.bf16.msra.mxu1 %v17741_v0 }
  0xe0   :  { %16326 = vmatprep.subr.bf16.mxu1 %v20260_v60 }
  0xe2   :  { %14938 = vmatmul.mubr.f32.gmra.mrb[14].mxu1 %v17779_v33  ;;  %v2329_v33 = vsub.f32 %v18010_v15, %v2328_v38  ;;  %v20324_v15 = vand.u32 4294901760, %v18032_v27 }
  0xe3   :  { %14940 = vmatprep.mubr.msk.f32.mxu1 %vm17092_vm4, %v20247_v20 }
  0xe4   :  { %v2330_v43 = vand.u32 4294901760, %v2329_v33 }
  0xe6   :  { %14941 = vmatmul.mubr.f32.gmra.mrb[16].mxu1 %v17792_v50  ;;  %v20258_v50 = vand.u32 4294901760, %v18032_v27  ;;  %v18037_v7 = vpack.c.bf16 %v2330_v43, %v2323_v62 }
  0xe7   :  { %14947 = vmatprep.mubr.msk.f32.mxu1 %vm17092_vm4, %v20247_v20 }
  0xe8   :  { %v2343_v17 = vsub.f32 %v18032_v27, %v20258_v50  ;;  %16218 = vmatprep.subr.bf16.mxu0 %v18037_v7 }
  0xea   :  { %14948 = vmatmul.mubr.f32.vlgmr.msra.gmra.mrb[18].mxu1 %v4890_v10  ;;  %v2344_v24 = vand.u32 4294901760, %v2343_v17 }
  0xeb   :  { %14950 = vmatprep.mubr.msk.f32.mxu1 %vm17092_vm4, %v20247_v20  ;;  %16328 = vmatpush3.bf16.msra.mxu1 %v17821_v3 }
  0xec   :  { %16329 = vmatprep.subr.bf16.mxu1 %v20260_v60  ;;  %v18053_v28 = vpack.c.bf16 %v2344_v24, %v2337_v18 }
  0xee   :  { %14951 = vmatmul.mubr.f32.gmra.mrb[20].mxu1 %v4900_v13 }
  0xef   :  { %14953 = vmatprep.mubr.msk.f32.mxu1 %vm17092_vm4, %v20247_v20 }
  0xf2   :  { %14954 = vmatmul.mubr.f32.gmra.mrb[22].mxu1 %v4910_v19 }
  0xf3   :  { %14960 = vmatprep.mubr.msk.f32.mxu1 %vm17092_vm4, %v20247_v20 }
  0xf6   :  { %14961 = vmatmul.mubr.f32.vlgmr.msra.gmra.mrb[18].mxu1 %v17942_v47 }
  0xf7   :  { %14963 = vmatprep.mubr.msk.f32.mxu1 %vm17092_vm4, %v20247_v20  ;;  %16331 = vmatpush3.bf16.msra.mxu1 %v17842_v53 }
  0xf8   :  { %16332 = vmatprep.subr.bf16.mxu1 %v20260_v60 }
  0xfa   :  { %14964 = vmatmul.mubr.f32.gmra.mrb[20].mxu1 %v17954_v23 }
  0xfb   :  { %14966 = vmatprep.mubr.msk.f32.mxu1 %vm17092_vm4, %v20247_v20 }
  0xfe   :  { %14967 = vmatmul.mubr.f32.gmra.mrb[22].mxu1 %v17964_v36 }
  0xff   :  { %14973 = vmatprep.mubr.msk.f32.mxu1 %vm17092_vm4, %v20247_v20 }
 0x102   :  { %14974 = vmatmul.mubr.f32.vlgmr.msra.gmra.mrb[18].mxu1 %v17952_v45 }
 0x103   :  { %14976 = vmatprep.mubr.msk.f32.mxu1 %vm17092_vm4, %v20247_v20  ;;  %16334 = vmatpush3.bf16.msra.mxu1 %v17741_v0 }
 0x104   :  { %16335 = vmatprep.subr.bf16.mxu1 %v20260_v60 }
 0x106   :  { %14977 = vmatmul.mubr.f32.gmra.mrb[20].mxu1 %v17962_v55 }
 0x107   :  { %14979 = vmatprep.mubr.msk.f32.mxu1 %vm17092_vm4, %v20247_v20 }
 0x10a   :  { %14980 = vmatmul.mubr.f32.gmra.mrb[22].mxu1 %v17976_v6 }
 0x10b   :  { %14986 = vmatprep.mubr.msk.f32.mxu1 %vm17092_vm4, %v20247_v20 }
 0x10e   :  { %14987 = vmatmul.mubr.f32.vlgmr.msra.gmra.mrb[18].mxu1 %v4888_v25 }
 0x10f   :  { %14989 = vmatprep.mubr.msk.f32.mxu1 %vm17092_vm4, %v20247_v20  ;;  %16337 = vmatpush3.bf16.msra.mxu1 %v17913_v41 }
 0x110   :  { %16338 = vmatprep.subr.bf16.mxu1 %v20260_v60 }
 0x112   :  { %14990 = vmatmul.mubr.f32.gmra.mrb[20].mxu1 %v4898_v21 }
 0x113   :  { %14992 = vmatprep.mubr.msk.f32.mxu1 %vm17092_vm4, %v20247_v20 }
 0x116   :  { %14993 = vmatmul.mubr.f32.gmra.mrb[22].mxu1 %v4908_v48 }
 0x117   :  { %14999 = vmatprep.mubr.msk.f32.mxu1 %vm17092_vm4, %v20247_v20 }
 0x11a   :  { %15000 = vmatmul.mubr.f32.vlgmr.msra.gmra.mrb[18].mxu1 %v17942_v47 }
 0x11b   :  { %15002 = vmatprep.mubr.msk.f32.mxu1 %vm17092_vm4, %v20247_v20  ;;  %16340 = vmatpush3.bf16.msra.mxu1 %v17741_v0 }
 0x11c   :  { %16341 = vmatprep.subr.bf16.mxu1 %v20260_v60 }
 0x11e   :  { %15003 = vmatmul.mubr.f32.gmra.mrb[20].mxu1 %v17954_v23 }
 0x11f   :  { %15005 = vmatprep.mubr.msk.f32.mxu1 %vm17092_vm4, %v20247_v20 }
 0x122   :  { %15006 = vmatmul.mubr.f32.gmra.mrb[22].mxu1 %v17964_v36 }
 0x123   :  { %15012 = vmatprep.mubr.msk.f32.mxu1 %vm17092_vm4, %v20247_v20 }
 0x126   :  { %15013 = vmatmul.mubr.f32.vlgmr.msra.gmra.mrb[18].mxu1 %v17942_v47 }
 0x127   :  { %15015 = vmatprep.mubr.msk.f32.mxu1 %vm17092_vm4, %v20247_v20 }
 0x12a   :  { %15016 = vmatmul.mubr.f32.gmra.mrb[20].mxu1 %v17954_v23  ;;  %v18140_v23 = vand.u32 4294901760, %v18120_v61 }
 0x12b   :  { %15018 = vmatprep.mubr.msk.f32.mxu1 %vm17092_vm4, %v20247_v20 }
 0x12c   :  { %v2350_v14 = vsub.f32 %v18120_v61, %v18140_v23 }
 0x12e   :  { %15019 = vmatmul.mubr.f32.gmra.mrb[22].mxu1 %v17964_v36 }
 0x12f   :  { %15025 = vmatprep.mubr.msk.f32.mxu1 %vm17092_vm4, %v20247_v20 }
 0x15d   :  { %v14513_v2 = vpop.f32.mrb[0].mxu1 }
 0x15e   :  { %v2096_v39 = vsel %vm2091_vm5, %v14513_v2, 0  ;;  %v2015_v58 = vpop.f32.mrb[1].mxu1 }
 0x15f   :  { %v18110_v5 = vand.u32 4294901760, %v2096_v39  ;;  %v2093_v54 = vsel %vm2091_vm5, %v2015_v58, 0 }
 0x160   :  { %v18113_v11 = vand.u32 4294901760, %v2093_v54 }
 0x161   :  { %v18116_v12 = vsub.f32 %v2096_v39, %v18110_v5  ;;  %v14516_v9 = vpop.f32.mrb[2].mxu1 }
 0x162   :  { %v18123_v37 = vsub.f32 %v2093_v54, %v18113_v11  ;;  %v2102_v4 = vsel %vm2091_vm5, %v14516_v9, 0  ;;  %v2027_v63 = vpop.f32.mrb[3].mxu1 }
 0x163   :  { %v20256_v56 = vand.u32 4294901760, %v18116_v12  ;;  %v18127_v42 = vand.u32 4294901760, %v2102_v4  ;;  %v2099_v51 = vsel %vm2091_vm5, %v2027_v63, 0 }
 0x164   :  { %v18130_v16 = vand.u32 4294901760, %v2099_v51  ;;  %v2200_v47 = vand.u32 4294901760, %v18123_v37 }
 0x165   :  { %v2211_v57 = vsub.f32 %v18116_v12, %v20256_v56  ;;  %v18137_v44 = vsub.f32 %v2102_v4, %v18127_v42  ;;  %v14519_v45 = vpop.f32.mrb[4].mxu1 }
 0x166   :  { %v18143_v59 = vsub.f32 %v2099_v51, %v18130_v16  ;;  %v2108_v25 = vsel %vm2091_vm5, %v14519_v45, 0  ;;  %v2039_v55 = vpop.f32.mrb[5].mxu1  ;;  %v2201_v36 = vsub.f32 %v18123_v37, %v2200_v47  ;;  %v2351_v51 = vand.u32 4294901760, %v2350_v14 }
 0x167   :  { %v18149_v8 = vand.u32 4294901760, %v2108_v25  ;;  %v2105_v21 = vsel %vm2091_vm5, %v2039_v55, 0  ;;  %v20253_v6 = vand.u32 4294901760, %v18137_v44  ;;  %v2212_v52 = vand.u32 4294901760, %v2211_v57 }
 0x168   :  { %v18153_v10 = vand.u32 4294901760, %v2105_v21  ;;  %v2202_v49 = vand.u32 4294901760, %v2201_v36  ;;  %v20255_v48 = vand.u32 4294901760, %v18143_v59  ;;  %v20327_v34 = vand.u32 4294901760, %v18137_v44 }
 0x169   :  { %v18157_v13 = vsub.f32 %v2108_v25, %v18149_v8  ;;  %v14522_v1 = vpop.f32.mrb[6].mxu1  ;;  %v2231_v19 = vsub.f32 %v18137_v44, %v20253_v6 }
 0x16a   :  { %v18165_v33 = vsub.f32 %v2105_v21, %v18153_v10  ;;  %v2114_v62 = vsel %vm2091_vm5, %v14522_v1, 0  ;;  %v2051_v43 = vpop.f32.mrb[7].mxu1  ;;  %14539 = vmatprep.mubr.f32.mxu0 %v2202_v49  ;;  %v2221_v35 = vsub.f32 %v18143_v59, %v20255_v48 }
 0x16b   :  { %v18171_v17 = vand.u32 4294901760, %v2114_v62  ;;  %v2111_v18 = vsel %vm2091_vm5, %v2051_v43, 0  ;;  %14540 = vmatmul.mubr.f32.vlgmr.msra.gmra.mrb[12].mxu0 %v2212_v52  ;;  %v20251_v24 = vand.u32 4294901760, %v18157_v13  ;;  %v2232_v4 = vand.u32 4294901760, %v2231_v19 }
 0x16c   :  { %v18175_v2 = vand.u32 4294901760, %v2111_v18  ;;  %16220 = vmatpush3.bf16.msra.mxu0 %v18037_v7  ;;  %v2222_v39 = vand.u32 4294901760, %v2221_v35  ;;  %v20252_v58 = vand.u32 4294901760, %v18165_v33 }
 0x16d   :  { %v18180_v54 = vsub.f32 %v2114_v62, %v18171_v17  ;;  %v14525_v9 = vpop.f32.mrb[8].mxu1  ;;  %v2251_v63 = vsub.f32 %v18157_v13, %v20251_v24  ;;  %16222 = vmatprep.subr.bf16.mxu0 %v18053_v28 }
 0x16e   :  { %v18187_v57 = vsub.f32 %v2111_v18, %v18175_v2  ;;  %v2120_v7 = vsel %vm2091_vm5, %v14525_v9, 0  ;;  %v2063_v45 = vpop.f32.mrb[9].mxu1  ;;  %14542 = vmatprep.mubr.f32.mxu0 %v2222_v39  ;;  %v2241_v25 = vsub.f32 %v18165_v33, %v20252_v58 }
 0x16f   :  { %v18193_v55 = vand.u32 4294901760, %v2120_v7  ;;  %v2117_v36 = vsel %vm2091_vm5, %v2063_v45, 0  ;;  %14543 = vmatmul.mubr.f32.gmra.mrb[14].mxu0 %v2232_v4  ;;  %v14345_v21 = vpop.f32.mrb[0].mxu0  ;;  %v20249_v49 = vand.u32 4294901760, %v18180_v54  ;;  %v2252_v18 = vand.u32 4294901760, %v2251_v63 }
 0x170   :  { %v18197_v52 = vand.u32 4294901760, %v2117_v36  ;;  %v18200_v1 = vsel %vm2091_vm5, %v14345_v21, 0  ;;  %v990_v19 = vpop.f32.mrb[1].mxu0  ;;  %v2242_v14 = vand.u32 4294901760, %v2241_v25  ;;  %16224 = vmatpush3.bf16.msra.mxu0 %v18053_v28  ;;  %v20250_v62 = vand.u32 4294901760, %v18187_v57 }
 0x171   :  { %v14528_v43 = vpop.f32.mrb[10].mxu1  ;;  %v18205_v35 = vsel %vm2091_vm5, %v990_v19, 0  ;;  %v2271_v39 = vsub.f32 %v18180_v54, %v20249_v49  ;;  %14565 = vmatprep.subr.mxu0 %v2351_v51  ;;  %v18218_v25 = vsub.f32 %v2120_v7, %v18193_v55 }
 0x172   :  { %v18211_v9 = vsub.f32 %v2117_v36, %v18197_v52  ;;  %v2126_v4 = vsel %vm2091_vm5, %v14528_v43, 0  ;;  %v2075_v45 = vpop.f32.mrb[11].mxu1  ;;  %14545 = vmatprep.mubr.f32.mxu0 %v2242_v14  ;;  %v2261_v28 = vsub.f32 %v18187_v57, %v20250_v62 }
 0x173   :  { %v18220_v63 = vand.u32 4294901760, %v2126_v4  ;;  %v2123_v21 = vsel %vm2091_vm5, %v2075_v45, 0  ;;  %14546 = vmatmul.mubr.f32.gmra.mrb[16].mxu0 %v2252_v18  ;;  %v14348_v19 = vpop.f32.mrb[2].mxu0  ;;  %v2272_v62 = vand.u32 4294901760, %v2271_v39 }
 0x174   :  { %v18223_v20 = vand.u32 4294901760, %v2123_v21  ;;  %v18226_v36 = vsel %vm2091_vm5, %v14348_v19, 0  ;;  %v1002_v43 = vpop.f32.mrb[3].mxu0  ;;  %v2262_v14 = vand.u32 4294901760, %v2261_v28  ;;  %14566 = vmatpush3.msra.mxu0 %v2351_v51  ;;  %v20254_v45 = vand.u32 4294901760, %v18211_v9 }
 0x175   :  { %v18229_v49 = vsub.f32 %v2126_v4, %v18220_v63  ;;  %v18232_v7 = vsel %vm2091_vm5, %v1002_v43, 0  ;;  %16226 = vmatprep.subr.bf16.mxu0 %v18066_v29  ;;  %v20257_v28 = vand.u32 4294901760, %v18218_v25 }
 0x176   :  { %v18236_v18 = vsub.f32 %v2123_v21, %v18223_v20  ;;  %14548 = vmatprep.mubr.f32.mxu0 %v2262_v14  ;;  %v2281_v39 = vsub.f32 %v18211_v9, %v20254_v45 }
 0x177   :  { %14549 = vmatmul.mubr.f32.gmra.mrb[18].mxu0 %v2272_v62  ;;  %v14351_v19 = vpop.f32.mrb[4].mxu0  ;;  %v20262_v21 = vand.u32 4294901760, %v18229_v49  ;;  %v2291_v62 = vsub.f32 %v18218_v25, %v20257_v28 }
 0x178   :  { %v18241_v51 = vsel %vm2091_vm5, %v14351_v19, 0  ;;  %v1014_v4 = vpop.f32.mrb[5].mxu0  ;;  %v20259_v43 = vand.u32 4294901760, %v18236_v18  ;;  %v2282_v24 = vand.u32 4294901760, %v2281_v39 }
 0x179   :  { %v18249_v14 = vsel %vm2091_vm5, %v1014_v4, 0  ;;  %v2292_v6 = vand.u32 4294901760, %v2291_v62  ;;  %v2311_v4 = vsub.f32 %v18229_v49, %v20262_v21  ;;  %v20326_v21 = vand.u32 4294901760, %v18143_v59 }
 0x17a   :  { %v2301_v19 = vsub.f32 %v18236_v18, %v20259_v43  ;;  %14551 = vmatprep.mubr.f32.mxu0 %v2282_v24 }
 0x17b   :  { %v14354_v58 = vpop.f32.mrb[6].mxu0  ;;  %14552 = vmatmul.mubr.f32.gmra.mrb[20].mxu0 %v2292_v6  ;;  %v2312_v50 = vand.u32 4294901760, %v2311_v4 }
 0x17c   :  { %v18258_v45 = vsel %vm2091_vm5, %v14354_v58, 0  ;;  %v1026_v48 = vpop.f32.mrb[7].mxu0  ;;  %v2302_v56 = vand.u32 4294901760, %v2301_v19 }
 0x17d   :  { %v18264_v39 = vsel %vm2091_vm5, %v1026_v48, 0  ;;  %v13273_v48 = vld [vmem:[%s20201_s6 + $0x10] sm:$0xff] }
 0x17e   :  { %14554 = vmatprep.mubr.f32.mxu0 %v2302_v56 }
 0x17f   :  { %v14357_v28 = vpop.f32.mrb[8].mxu0  ;;  %14555 = vmatmul.mubr.f32.gmra.mrb[22].mxu0 %v2312_v50  ;;  %v5378_v50 = vand.u32 4294901760, %v13273_v48 }
 0x180   :  { %v18267_v43 = vsel %vm2091_vm5, %v14357_v28, 0  ;;  %v1038_v24 = vpop.f32.mrb[9].mxu0  ;;  %14567 = vmatprep.mubr.f32.mxu0 %v18113_v11  ;;  %v13274_v28 = vld [vmem:[%s20201_s6 + $0x18] sm:$0xff] }
 0x181   :  { %v18270_v58 = vsel %vm2091_vm5, %v1038_v24, 0  ;;  %v5381_v4 = vand.u32 4294901760, %v13274_v28  ;;  %v18289_v24 = vsub.f32 %v13273_v48, %v5378_v50 }
 0x183   :  { %v14360_v62 = vpop.f32.mrb[10].mxu0  ;;  %14568 = vmatmul.mubr.f32.vlgmr.msra.gmra.mrb[12].mxu0 %v18110_v5 }
 0x184   :  { %v18277_v6 = vsel %vm2091_vm5, %v14360_v62, 0  ;;  %v1050_v56 = vpop.f32.mrb[11].mxu0  ;;  %14570 = vmatprep.mubr.f32.mxu0 %v18130_v16  ;;  %16228 = vmatpush3.bf16.msra.mxu0 %v18066_v29  ;;  %v18292_v62 = vpack.c.bf16 %v5381_v4, %v5378_v50  ;;  %v5477_v29 = vand.u32 4294901760, %v18289_v24 }
 0x185   :  { %v18280_v19 = vsel %vm2091_vm5, %v1050_v56, 0  ;;  %16230 = vmatprep.subr.bf16.mxu0 %v18077_v46  ;;  %v18296_v56 = vsub.f32 %v13274_v28, %v5381_v4 }
 0x186   :  { %16343 = vmatpush3.bf16.msra.mxu1 %v18292_v62  ;;  %v5478_v48 = vsub.f32 %v18289_v24, %v5477_v29 }
 0x187   :  { %14571 = vmatmul.mubr.f32.gmra.mrb[14].mxu0 %v18127_v42  ;;  %16344 = vmatprep.subr.bf16.mxu1 %v20260_v60 }
 0x188   :  { %14573 = vmatprep.mubr.f32.mxu0 %v18153_v10  ;;  %16232 = vmatpush3.bf16.msra.mxu0 %v18077_v46  ;;  %v5484_v46 = vand.u32 4294901760, %v18296_v56  ;;  %v5479_v50 = vand.u32 4294901760, %v5478_v48  ;;  %v16241_v48 = vpack.c.bf16 %v2328_v38, %v2321_v30  ;;  %v16245_v30 = vpack.c.bf16 %v20324_v15, %v2335_v26 }
 0x189   :  { %14593 = vmatprep.subr.mxu0 %v18120_v61  ;;  %v20328_v26 = vand.u32 4294901760, %v18165_v33 }
 0x18a   :  { %v5485_v28 = vsub.f32 %v18296_v56, %v5484_v46 }
 0x18b   :  { %14574 = vmatmul.mubr.f32.gmra.mrb[16].mxu0 %v18149_v8 }
 0x18c   :  { %14576 = vmatprep.mubr.f32.mxu0 %v18175_v2  ;;  %14594 = vmatpush3.msra.mxu0 %v18120_v61  ;;  %v5486_v4 = vand.u32 4294901760, %v5485_v28  ;;  %v18351_v61 = vpack.c.bf16 %v5484_v46, %v5477_v29  ;;  %v20330_v29 = vand.u32 4294901760, %v18187_v57 }
 0x18d   :  { %16234 = vmatprep.subr.bf16.mxu0 %v17881_v40 }
 0x18e   :  { %v18312_v60 = vpack.c.bf16 %v5486_v4, %v5479_v50  ;;  %v20325_v50 = vand.u32 4294901760, %v18116_v12 }
 0x18f   :  { %14577 = vmatmul.mubr.f32.gmra.mrb[18].mxu0 %v18171_v17 }
 0x190   :  { %14579 = vmatprep.mubr.f32.mxu0 %v18197_v52 }
 0x193   :  { %14580 = vmatmul.mubr.f32.gmra.mrb[20].mxu0 %v18193_v55 }
 0x194   :  { %14582 = vmatprep.mubr.f32.mxu0 %v18223_v20 }
 0x197   :  { %14583 = vmatmul.mubr.f32.gmra.mrb[22].mxu0 %v18220_v63 }
 0x198   :  { %14595 = vmatprep.mubr.f32.mxu0 %v18123_v37 }
 0x19b   :  { %14596 = vmatmul.mubr.f32.vlgmr.msra.gmra.mrb[12].mxu0 %v18116_v12  ;;  %v1060_v12 = vld [vmem:[%s20200_s3] sm:$0xff] }
 0x19c   :  { %14598 = vmatprep.mubr.f32.mxu0 %v18143_v59  ;;  %16236 = vmatpush3.bf16.msra.mxu0 %v17881_v40  ;;  %v20329_v59 = vand.u32 4294901760, %v18157_v13 }
 0x19d   :  { %16238 = vmatprep.subr.bf16.mxu0 %v17889_v32 }
 0x19f   :  { %14599 = vmatmul.mubr.f32.gmra.mrb[14].mxu0 %v18137_v44  ;;  %v3136_v44 = vand.u32 4294901760, %v1060_v12 }
 0x1a0   :  { %14601 = vmatprep.mubr.f32.mxu0 %v18165_v33  ;;  %16240 = vmatpush3.bf16.msra.mxu0 %v17889_v32 }
 0x1a1   :  { %14621 = vmatprep.subr.mxu0 %v17993_v22  ;;  %v18374_v33 = vsub.f32 %v1060_v12, %v3136_v44  ;;  %v18437_v12 = vand.u32 4294901760, %v18200_v1 }
 0x1a3   :  { %14602 = vmatmul.mubr.f32.gmra.mrb[16].mxu0 %v18157_v13  ;;  %v3328_v13 = vand.u32 4294901760, %v18374_v33 }
 0x1a4   :  { %14604 = vmatprep.mubr.f32.mxu0 %v18187_v57  ;;  %14622 = vmatpush3.msra.mxu0 %v17993_v22  ;;  %v20333_v57 = vand.u32 4294901760, %v18218_v25 }
 0x1a5   :  { %16242 = vmatprep.subr.bf16.mxu0 %v16241_v48 }
 0x1a7   :  { %14605 = vmatmul.mubr.f32.gmra.mrb[18].mxu0 %v18180_v54 }
 0x1a8   :  { %14607 = vmatprep.mubr.f32.mxu0 %v18211_v9 }
 0x1ab   :  { %14608 = vmatmul.mubr.f32.gmra.mrb[20].mxu0 %v18218_v25  ;;  %v3329_v25 = vsub.f32 %v18374_v33, %v3328_v13 }
 0x1ac   :  { %14610 = vmatprep.mubr.f32.mxu0 %v18236_v18 }
 0x1af   :  { %14611 = vmatmul.mubr.f32.gmra.mrb[22].mxu0 %v18229_v49 }
 0x1b0   :  { %14623 = vmatprep.mubr.f32.mxu0 %v2200_v47  ;;  %v1061_v47 = vld [vmem:[%s20200_s3 + $0x8] sm:$0xff] }
 0x1b1   :  { %v18338_v28 = vpop.f32.mrb[12].mxu1 }
 0x1b2   :  { %v14936_v31 = vpop.f32.mrb[13].mxu1 }
 0x1b3   :  { %14624 = vmatmul.mubr.f32.vlgmr.msra.gmra.mrb[12].mxu0 %v20325_v50  ;;  %v20332_v31 = vand.u32 4294901760, %v18211_v9  ;;  %v20335_v50 = vand.u32 4294901760, %v18229_v49 }
 0x1b4   :  { %14626 = vmatprep.mubr.f32.mxu0 %v20326_v21  ;;  %16244 = vmatpush3.bf16.msra.mxu0 %v16241_v48  ;;  %v3139_v21 = vand.u32 4294901760, %v1061_v47  ;;  %v20331_v48 = vand.u32 4294901760, %v18180_v54 }
 0x1b5   :  { %v18347_v38 = vpop.f32.mrb[14].mxu1  ;;  %16246 = vmatprep.subr.bf16.mxu0 %v16245_v30 }
 0x1b6   :  { %v14939_v4 = vpop.f32.mrb[15].mxu1  ;;  %v18376_v46 = vsub.f32 %v1061_v47, %v3139_v21  ;;  %v18401_v54 = vpack.c.bf16 %v3139_v21, %v3136_v44  ;;  %v18461_v44 = vand.u32 4294901760, %v18226_v36 }
 0x1b7   :  { %14627 = vmatmul.mubr.f32.gmra.mrb[14].mxu0 %v20327_v34  ;;  %v1064_v4 = vld [vmem:[%s20200_s3 + $0x20] sm:$0xff] }
 0x1b8   :  { %14629 = vmatprep.mubr.f32.mxu0 %v20328_v26  ;;  %16248 = vmatpush3.bf16.msra.mxu0 %v16245_v30  ;;  %v3335_v15 = vand.u32 4294901760, %v18376_v46  ;;  %v20334_v30 = vand.u32 4294901760, %v18236_v18  ;;  %v18430_v34 = vand.u32 4294901760, %v1064_v4  ;;  %v18433_v26 = vand.u32 4294901760, %v18205_v35 }
 0x1b9   :  { %v18355_v37 = vpop.f32.mrb[16].mxu1  ;;  %14649 = vmatprep.subr.mxu0 %v18140_v23 }
 0x1ba   :  { %v14942_v27 = vpop.f32.mrb[17].mxu1  ;;  %v3336_v18 = vsub.f32 %v18376_v46, %v3335_v15 }
 0x1bb   :  { %14630 = vmatmul.mubr.f32.gmra.mrb[16].mxu0 %v20329_v59  ;;  %v18450_v59 = vsub.f32 %v18205_v35, %v18433_v26 }
 0x1bc   :  { %14632 = vmatprep.mubr.f32.mxu0 %v20330_v29  ;;  %14650 = vmatpush3.msra.mxu0 %v18140_v23  ;;  %v18386_v23 = vpack.c.bf16 %v3335_v15, %v3328_v13  ;;  %v3337_v27 = vand.u32 4294901760, %v3336_v18 }
 0x1bd   :  { %16250 = vmatprep.subr.bf16.mxu0 %v17881_v40  ;;  %v20268_v29 = vand.u32 4294901760, %v18450_v59 }
 0x1bf   :  { %14633 = vmatmul.mubr.f32.gmra.mrb[18].mxu0 %v20331_v48  ;;  %v18480_v48 = vsub.f32 %v18226_v36, %v18461_v44 }
 0x1c0   :  { %14635 = vmatprep.mubr.f32.mxu0 %v20332_v31  ;;  %v18483_v31 = vand.u32 4294901760, %v18241_v51 }
 0x1c3   :  { %14636 = vmatmul.mubr.f32.gmra.mrb[20].mxu0 %v20333_v57  ;;  %v18501_v57 = vand.u32 4294901760, %v18264_v39 }
 0x1c4   :  { %14638 = vmatprep.mubr.f32.mxu0 %v20334_v30  ;;  %v18507_v30 = vand.u32 4294901760, %v18258_v45 }
 0x1c5   :  { %v18528_v18 = vsub.f32 %v18264_v39, %v18501_v57 }
 0x1c7   :  { %14639 = vmatmul.mubr.f32.gmra.mrb[22].mxu0 %v20335_v50 }
 0x1c8   :  { %14651 = vmatprep.mubr.f32.mxu0 %v18113_v11 }
 0x1cb   :  { %14652 = vmatmul.mubr.f32.vlgmr.msra.gmra.mrb[12].mxu0 %v18110_v5 }
 0x1cc   :  { %14654 = vmatprep.mubr.f32.mxu0 %v18130_v16  ;;  %16252 = vmatpush3.bf16.msra.mxu0 %v17881_v40  ;;  %v1062_v40 = vld [vmem:[%s20200_s3 + $0x10] sm:$0xff] }
 0x1cd   :  { %16254 = vmatprep.subr.bf16.mxu0 %v17889_v32  ;;  %v3142_v49 = vand.u32 4294901760, %v1062_v40 }
 0x1cf   :  { %14655 = vmatmul.mubr.f32.gmra.mrb[14].mxu0 %v18127_v42 }
 0x1d0   :  { %14657 = vmatprep.mubr.f32.mxu0 %v18153_v10  ;;  %16256 = vmatpush3.bf16.msra.mxu0 %v17889_v32  ;;  %v1063_v32 = vld [vmem:[%s20200_s3 + $0x18] sm:$0xff] }
 0x1d1   :  { %14677 = vmatprep.subr.mxu0 %v17993_v22 }
 0x1d3   :  { %14658 = vmatmul.mubr.f32.gmra.mrb[16].mxu0 %v18149_v8 }
 0x1d4   :  { %14660 = vmatprep.mubr.f32.mxu0 %v18175_v2  ;;  %14678 = vmatpush3.msra.mxu0 %v17993_v22  ;;  %v3145_v22 = vand.u32 4294901760, %v1063_v32 }
 0x1d5   :  { %16258 = vmatprep.subr.bf16.mxu0 %v18401_v54 }
 0x1d6   :  { %v18419_v9 = vpack.c.bf16 %v3145_v22, %v3142_v49  ;;  %v18446_v47 = vsub.f32 %v1063_v32, %v3145_v22  ;;  %v18520_v32 = vand.u32 4294901760, %v18270_v58 }
 0x1d7   :  { %14661 = vmatmul.mubr.f32.gmra.mrb[18].mxu0 %v18171_v17 }
 0x1d8   :  { %14663 = vmatprep.mubr.f32.mxu0 %v18197_v52  ;;  %v20265_v21 = vand.u32 4294901760, %v18446_v47 }
 0x1da   :  { %v3350_v13 = vsub.f32 %v18446_v47, %v20265_v21  ;;  %v18553_v21 = vand.u32 4294901760, %v18280_v19 }
 0x1db   :  { %14664 = vmatmul.mubr.f32.gmra.mrb[20].mxu0 %v18193_v55 }
 0x1dc   :  { %14666 = vmatprep.mubr.f32.mxu0 %v18223_v20  ;;  %v3351_v22 = vand.u32 4294901760, %v3350_v13 }
 0x1df   :  { %14667 = vmatmul.mubr.f32.gmra.mrb[22].mxu0 %v18220_v63 }
 0x1e0   :  { %14679 = vmatprep.mubr.f32.mxu0 %v18113_v11  ;;  %v3330_v11 = vand.u32 4294901760, %v3329_v25 }
 0x1e3   :  { %14680 = vmatmul.mubr.f32.vlgmr.msra.gmra.mrb[12].mxu0 %v18110_v5  ;;  %v18442_v5 = vpack.c.bf16 %v3337_v27, %v3330_v11  ;;  %v18535_v11 = vsub.f32 %v18258_v45, %v18507_v30  ;;  %v18538_v27 = vand.u32 4294901760, %v18267_v43  ;;  %v18550_v45 = vsub.f32 %v18270_v58, %v18520_v32 }
 0x1e4   :  { %14682 = vmatprep.mubr.f32.mxu0 %v18130_v16  ;;  %16260 = vmatpush3.bf16.msra.mxu0 %v18401_v54  ;;  %v18444_v16 = vsub.f32 %v1062_v40, %v3142_v49  ;;  %v20267_v40 = vand.u32 4294901760, %v18480_v48  ;;  %v20336_v58 = vand.u32 4294901760, %v18528_v18 }
 0x1e5   :  { %16262 = vmatprep.subr.bf16.mxu0 %v18419_v9  ;;  %v20337_v41 = vand.u32 4294901760, %v18535_v11 }
 0x1e6   :  { %v20266_v35 = vand.u32 4294901760, %v18444_v16 }
 0x1e7   :  { %14683 = vmatmul.mubr.f32.gmra.mrb[14].mxu0 %v18127_v42  ;;  %v18453_v42 = vand.u32 4294901760, %v18232_v7 }
 0x1e8   :  { %14685 = vmatprep.mubr.f32.mxu0 %v18153_v10  ;;  %16264 = vmatpush3.bf16.msra.mxu0 %v18419_v9  ;;  %v18458_v10 = vsub.f32 %v18200_v1, %v18437_v12  ;;  %v18474_v1 = vand.u32 4294901760, %v18249_v14 }
 0x1e9   :  { %14705 = vmatprep.subr.mxu0 %v18430_v34 }
 0x1ea   :  { %v18498_v36 = vsub.f32 %v18249_v14, %v18474_v1  ;;  %v18516_v14 = vsub.f32 %v18241_v51, %v18483_v31 }
 0x1eb   :  { %14686 = vmatmul.mubr.f32.gmra.mrb[16].mxu0 %v18149_v8  ;;  %v18471_v8 = vsub.f32 %v18232_v7, %v18453_v42  ;;  %v3343_v7 = vsub.f32 %v18444_v16, %v20266_v35 }
 0x1ec   :  { %14688 = vmatprep.mubr.f32.mxu0 %v18175_v2  ;;  %14706 = vmatpush3.msra.mxu0 %v18430_v34  ;;  %v20263_v2 = vand.u32 4294901760, %v18458_v10  ;;  %v20269_v25 = vand.u32 4294901760, %v18498_v36 }
 0x1ed   :  { %16266 = vmatprep.subr.bf16.mxu0 %v18442_v5  ;;  %v20264_v15 = vand.u32 4294901760, %v18471_v8  ;;  %v3344_v49 = vand.u32 4294901760, %v3343_v7 }
 0x1ee   :  { %v3218_v50 = vsub.f32 %v18458_v10, %v20263_v2 }
 0x1ef   :  { %14689 = vmatmul.mubr.f32.gmra.mrb[18].mxu0 %v18171_v17  ;;  %v18493_v17 = vsub.f32 %v1064_v4, %v18430_v34 }
 0x1f0   :  { %14691 = vmatprep.mubr.f32.mxu0 %v18197_v52  ;;  %v3208_v52 = vsub.f32 %v18450_v59, %v20268_v29  ;;  %v3219_v39 = vand.u32 4294901760, %v3218_v50  ;;  %v18567_v29 = vsub.f32 %v18267_v43, %v18538_v27  ;;  %v18580_v43 = vsub.f32 %v18280_v19, %v18553_v21 }
 0x1f1   :  { %v3268_v19 = vsub.f32 %v18528_v18, %v20336_v58 }
 0x1f2   :  { %v3209_v4 = vand.u32 4294901760, %v3208_v52  ;;  %v20272_v52 = vand.u32 4294901760, %v18516_v14  ;;  %v3307_v3 = vand.u32 4294901760, %v18580_v43 }
 0x1f3   :  { %14692 = vmatmul.mubr.f32.gmra.mrb[20].mxu0 %v18193_v55  ;;  %v18523_v55 = vand.u32 4294901760, %v18493_v17 }
 0x1f4   :  { %14694 = vmatprep.mubr.f32.mxu0 %v18223_v20  ;;  %v3228_v20 = vsub.f32 %v18471_v8, %v20264_v15  ;;  %v3238_v15 = vsub.f32 %v18480_v48, %v20267_v40  ;;  %v3248_v40 = vsub.f32 %v18498_v36, %v20269_v25 }
 0x1f5   :  { %v3357_v50 = vsub.f32 %v18493_v17, %v18523_v55 }
 0x1f6   :  { %v3239_v25 = vand.u32 4294901760, %v3238_v15  ;;  %v3249_v15 = vand.u32 4294901760, %v3248_v40 }
 0x1f7   :  { %14695 = vmatmul.mubr.f32.gmra.mrb[22].mxu0 %v18220_v63  ;;  %v16269_v63 = vpack.c.bf16 %v3351_v22, %v3344_v49 }
 0x1f8   :  { %14707 = vmatprep.mubr.f32.mxu0 %v3209_v4 }
 0x1f9   :  { %v5348_v51 = vpop.f32.mrb[18].mxu1 }
 0x1fa   :  { %v5369_v7 = vsel %vm5367_vm6, %v5348_v51, 0  ;;  %v15014_v13 = vpop.f32.mrb[19].mxu1  ;;  %v18571_v51 = vand.u32 4294901760, %v18277_v6 }
 0x1fb   :  { %v18543_v2 = vand.u32 4294901760, %v5369_v7  ;;  %v3229_v13 = vand.u32 4294901760, %v3228_v20  ;;  %14708 = vmatmul.mubr.f32.vlgmr.msra.gmra.mrb[12].mxu0 %v3219_v39  ;;  %v3358_v39 = vand.u32 4294901760, %v3357_v50 }
 0x1fc   :  { %16268 = vmatpush3.bf16.msra.mxu0 %v18442_v5  ;;  %v18598_v50 = vsub.f32 %v18277_v6, %v18571_v51 }
 0x1fd   :  { %v18559_v4 = vsub.f32 %v5369_v7, %v18543_v2  ;;  %v5354_v35 = vpop.f32.mrb[20].mxu1  ;;  %14710 = vmatprep.mubr.f32.mxu0 %v3229_v13  ;;  %16270 = vmatprep.subr.bf16.mxu0 %v16269_v63 }
 0x1fe   :  { %v5372_v49 = vsel %vm5367_vm6, %v5354_v35, 0  ;;  %v15017_v22 = vpop.f32.mrb[21].mxu1  ;;  %v3258_v35 = vsub.f32 %v18516_v14, %v20272_v52 }
 0x1ff   :  { %v20275_v20 = vand.u32 4294901760, %v18559_v4  ;;  %v18575_v7 = vand.u32 4294901760, %v5372_v49  ;;  %14711 = vmatmul.mubr.f32.gmra.mrb[14].mxu0 %v3239_v25  ;;  %v3278_v25 = vsub.f32 %v18535_v11, %v20337_v41 }
 0x200   :  { %14713 = vmatprep.mubr.f32.mxu0 %v3249_v15  ;;  %16272 = vmatpush3.bf16.msra.mxu0 %v16269_v63  ;;  %v3259_v58 = vand.u32 4294901760, %v3258_v35  ;;  %v20338_v63 = vand.u32 4294901760, %v18550_v45 }
 0x201   :  { %v5447_v13 = vsub.f32 %v18559_v4, %v20275_v20  ;;  %v18589_v5 = vsub.f32 %v5372_v49, %v18575_v7  ;;  %v5360_v22 = vpop.f32.mrb[22].mxu1  ;;  %14733 = vmatprep.subr.mxu0 %v3358_v39 }
 0x202   :  { %v5375_v52 = vsel %vm5367_vm6, %v5360_v22, 0  ;;  %v15020_v53 = vpop.f32.mrb[23].mxu1  ;;  %v3288_v15 = vsub.f32 %v18550_v45, %v20338_v63  ;;  %v20339_v22 = vmov 0.0  }
 0x203   :  { %v5448_v20 = vand.u32 4294901760, %v5447_v13  ;;  %v18600_v49 = vand.u32 4294901760, %v5375_v52  ;;  %v5456_v40 = vand.u32 4294901760, %v18589_v5  ;;  %v16273_v53 = vpack.c.bf16 %v18376_v46, %v18374_v33  ;;  %14714 = vmatmul.mubr.f32.gmra.mrb[16].mxu0 %v3259_v58 }
 0x204   :  { %v3269_v13 = vand.u32 4294901760, %v3268_v19  ;;  %14734 = vmatpush3.msra.mxu0 %v3358_v39  ;;  %v3317_v46 = vand.u32 4294901760, %v18598_v50  ;;  %v3289_v63 = vand.u32 4294901760, %v3288_v15  ;;  %v3308_v58 = vsub.f32 %v18580_v43, %v3307_v3 }
 0x205   :  { %v18610_v6 = vsub.f32 %v5375_v52, %v18600_v49  ;;  %15026 = vmatmul.mubr.f32.vlgmr.msra.gmra.mrb[24].mxu1 %v5448_v20  ;;  %v5457_v35 = vsub.f32 %v18589_v5, %v5456_v40  ;;  %v3279_v52 = vand.u32 4294901760, %v3278_v25  ;;  %v20340_v20 = vand.u32 4294901760, %v18567_v29  ;;  %16274 = vmatprep.subr.bf16.mxu0 %v16273_v53 }
 0x206   :  { %15028 = vmatprep.mubr.msk.f32.mxu1 %vm17092_vm4, %v20339_v22  ;;  %14716 = vmatprep.mubr.f32.mxu0 %v3269_v13  ;;  %v20341_v13 = vmov 0.0|0.0   ;;  %v3318_v15 = vsub.f32 %v18598_v50, %v3317_v46 }
 0x207   :  { %v5458_v41 = vand.u32 4294901760, %v5457_v35  ;;  %v5466_v33 = vand.u32 4294901760, %v18610_v6  ;;  %v3298_v19 = vsub.f32 %v18567_v29, %v20340_v20  ;;  %16346 = vmatpush3.bf16.msra.mxu1 %v18312_v60  ;;  %14717 = vmatmul.mubr.f32.gmra.mrb[18].mxu0 %v3279_v52  ;;  %v3309_v35 = vand.u32 4294901760, %v3308_v58 }
 0x208   :  { %16347 = vmatprep.subr.bf16.mxu1 %v20341_v13  ;;  %14719 = vmatprep.mubr.f32.mxu0 %v3289_v63  ;;  %v20342_v52 = vpack.c.bf16 %v18296_v56, %v18289_v24  ;;  %v16277_v20 = vpack.c.bf16 %v18446_v47, %v18444_v16  ;;  %v20343_v24 = vand.u32 4294901760, %v18559_v4  ;;  %v5923_v56 = vsel %vm5367_vm6, %v18338_v28, 0 }
 0x209   :  { %15029 = vmatmul.mubr.f32.gmra.mrb[26].mxu1 %v5458_v41  ;;  %v5467_v39 = vsub.f32 %v18610_v6, %v5466_v33  ;;  %v3299_v60 = vand.u32 4294901760, %v3298_v19  ;;  %v3319_v41 = vand.u32 4294901760, %v3318_v15  ;;  %v18720_v28 = vand.u32 4294901760, %v5923_v56 }
 0x20a   :  { %15031 = vmatprep.mubr.msk.f32.mxu1 %vm17092_vm4, %v20339_v22  ;;  %v20345_v15 = vand.u32 4294901760, %v18444_v16 }
 0x20b   :  { %v5468_v25 = vand.u32 4294901760, %v5467_v39  ;;  %14720 = vmatmul.mubr.f32.gmra.mrb[20].mxu0 %v3299_v60 }
 0x20c   :  { %14722 = vmatprep.mubr.f32.mxu0 %v3309_v35  ;;  %v20346_v35 = vand.u32 4294901760, %v18446_v47 }
 0x20d   :  { %15032 = vmatmul.mubr.f32.gmra.mrb[28].mxu1 %v5468_v25 }
 0x20e   :  { %15038 = vmatprep.mubr.msk.f32.mxu1 %vm17092_vm4, %v20339_v22 }
 0x20f   :  { %14723 = vmatmul.mubr.f32.gmra.mrb[22].mxu0 %v3319_v41  ;;  %v16293_v41 = vpack.c.bf16 %v20346_v35, %v20345_v15  ;;  %v20351_v35 = vand.u32 4294901760, %v18516_v14 }
 0x210   :  { %14735 = vmatprep.mubr.f32.mxu0 %v18433_v26 }
 0x211   :  { %15039 = vmatmul.mubr.f32.vlgmr.msra.gmra.mrb[30].mxu1 %v18543_v2 }
 0x212   :  { %15041 = vmatprep.mubr.msk.f32.mxu1 %vm17092_vm4, %v20339_v22  ;;  %16349 = vmatpush3.bf16.msra.mxu1 %v20342_v52 }
 0x213   :  { %16350 = vmatprep.subr.bf16.mxu1 %v20341_v13  ;;  %14736 = vmatmul.mubr.f32.vlgmr.msra.gmra.mrb[12].mxu0 %v18437_v12 }
 0x214   :  { %14738 = vmatprep.mubr.f32.mxu0 %v18453_v42  ;;  %16276 = vmatpush3.bf16.msra.mxu0 %v16273_v53 }
 0x215   :  { %15042 = vmatmul.mubr.f32.gmra.mrb[32].mxu1 %v18575_v7  ;;  %16278 = vmatprep.subr.bf16.mxu0 %v16277_v20 }
 0x216   :  { %15044 = vmatprep.mubr.msk.f32.mxu1 %vm17092_vm4, %v20339_v22 }
 0x217   :  { %14739 = vmatmul.mubr.f32.gmra.mrb[14].mxu0 %v18461_v44 }
 0x218   :  { %14741 = vmatprep.mubr.f32.mxu0 %v18474_v1  ;;  %16280 = vmatpush3.bf16.msra.mxu0 %v16277_v20  ;;  %v17094_v20 = vmov 0  }
 0x219   :  { %15045 = vmatmul.mubr.f32.gmra.mrb[34].mxu1 %v18600_v49  ;;  %14761 = vmatprep.subr.mxu0 %v18493_v17 }
 0x21a   :  { %15051 = vmatprep.mubr.msk.f32.mxu1 %vm17092_vm4, %v20339_v22  ;;  %17089 = vset.pattern.permute.xlu0 %v17094_v20 }
 0x21b   :  { %14742 = vmatmul.mubr.f32.gmra.mrb[16].mxu0 %v18483_v31  ;;  %17090 = vset.pattern.permute.xlu1 %v17094_v20  ;;  %v4112_v20 = vld [vmem:[%s20202_s4 + $0x30] sm:$0xff] }
 0x21c   :  { %14744 = vmatprep.mubr.f32.mxu0 %v18501_v57  ;;  %14762 = vmatpush3.msra.mxu0 %v18493_v17  ;;  %v4805_v17 = vld [vmem:[%s20201_s6 + $0x8] sm:$0xff] }
 0x21d   :  { %15052 = vmatmul.mubr.f32.vlgmr.msra.gmra.mrb[36].mxu1 %v18559_v4  ;;  %16282 = vmatprep.subr.bf16.mxu0 %v18401_v54  ;;  %v5926_v4 = vsel %vm5367_vm6, %v18347_v38, 0  ;;  %v5929_v38 = vsel %vm5367_vm6, %v18355_v37, 0  ;;  %v20344_v37 = vand.u32 4294901760, %v18450_v59 }
 0x21e   :  { %15054 = vmatprep.mubr.msk.f32.mxu1 %vm17092_vm4, %v20339_v22  ;;  %16352 = vmatpush3.bf16.msra.mxu1 %v18292_v62  ;;  %v18754_v60 = vand.u32 4294901760, %v5929_v38 }
 0x21f   :  { %16353 = vmatprep.subr.bf16.mxu1 %v20341_v13  ;;  %14745 = vmatmul.mubr.f32.gmra.mrb[18].mxu0 %v18507_v30 }
 0x220   :  { %14747 = vmatprep.mubr.f32.mxu0 %v18520_v32  ;;  %v18781_v47 = vsub.f32 %v5929_v38, %v18754_v60  ;;  %v20350_v38 = vand.u32 4294901760, %v18498_v36 }
 0x221   :  { %15055 = vmatmul.mubr.f32.gmra.mrb[38].mxu1 %v18589_v5 }
 0x222   :  { %15057 = vmatprep.mubr.msk.f32.mxu1 %vm17092_vm4, %v20339_v22 }
 0x223   :  { %14748 = vmatmul.mubr.f32.gmra.mrb[20].mxu0 %v18538_v27 }
 0x224   :  { %14750 = vmatprep.mubr.f32.mxu0 %v18553_v21 }
 0x225   :  { %15058 = vmatmul.mubr.f32.gmra.mrb[40].mxu1 %v18610_v6  ;;  %v18735_v6 = vsub.f32 %v5923_v56, %v18720_v28  ;;  %v20347_v56 = vand.u32 4294901760, %v18458_v10 }
 0x226   :  { %15064 = vmatprep.mubr.msk.f32.mxu1 %vm17092_vm4, %v20339_v22 }
 0x227   :  { %14751 = vmatmul.mubr.f32.gmra.mrb[22].mxu0 %v18571_v51  ;;  %v6000_v39 = vand.u32 4294901760, %v18735_v6 }
 0x228   :  { %14763 = vmatprep.mubr.f32.mxu0 %v18450_v59  ;;  %v4106_v59 = vld [vmem:[%s20202_s4] sm:$0xff] }
 0x229   :  { %15065 = vmatmul.mubr.f32.vlgmr.msra.gmra.mrb[42].mxu1 %v20343_v24  ;;  %v6001_v16 = vsub.f32 %v18735_v6, %v6000_v39  ;;  %4120 = vperm.xlu0 %17089, %v4106_v59   ;;  %v13281_v59 = vld [vmem:[%s20199_s5 + $0x50] sm:$0xff] }
 0x22a   :  { %15067 = vmatprep.mubr.msk.f32.mxu1 %vm17092_vm4, %v20339_v22  ;;  %16355 = vmatpush3.bf16.msra.mxu1 %v18351_v61  ;;  %v4804_v61 = vld [vmem:[%s20201_s6] sm:$0xff] }
 0x22b   :  { %16356 = vmatprep.subr.bf16.mxu1 %v20341_v13  ;;  %14764 = vmatmul.mubr.f32.vlgmr.msra.gmra.mrb[12].mxu0 %v18458_v10  ;;  %v5932_v5 = vand.u32 4294901760, %v4804_v61 }
 0x22c   :  { %14766 = vmatprep.mubr.f32.mxu0 %v18471_v8  ;;  %16284 = vmatpush3.bf16.msra.mxu0 %v18401_v54 }
 0x22d   :  { %15068 = vmatmul.mubr.f32.gmra.mrb[44].mxu1 %v5456_v40  ;;  %16286 = vmatprep.subr.bf16.mxu0 %v18419_v9  ;;  %v5935_v40 = vand.u32 4294901760, %v4805_v17 }
 0x22e   :  { %15070 = vmatprep.mubr.msk.f32.mxu1 %vm17092_vm4, %v20339_v22 }
 0x22f   :  { %14767 = vmatmul.mubr.f32.gmra.mrb[14].mxu0 %v18480_v48  ;;  %v18732_v53 = vsub.f32 %v4805_v17, %v5935_v40  ;;  %v18746_v19 = vpack.c.bf16 %v5935_v40, %v5932_v5  ;;  %v4108_v17 = vld [vmem:[%s20202_s4 + $0x10] sm:$0xff]  ;;  %v20349_v40 = vand.u32 4294901760, %v18480_v48 }
 0x230   :  { %14769 = vmatprep.mubr.f32.mxu0 %v18498_v36  ;;  %16288 = vmatpush3.bf16.msra.mxu0 %v18419_v9  ;;  %v20352_v36 = vand.u32 4294901760, %v18528_v18 }
 0x231   :  { %15071 = vmatmul.mubr.f32.gmra.mrb[46].mxu1 %v5466_v33  ;;  %14789 = vmatprep.subr.mxu0 %v18430_v34  ;;  %v18737_v33 = vand.u32 4294901760, %v5926_v4  ;;  %v6038_v58 = vand.u32 4294901760, %v18732_v53 }
 0x232   :  { %15077 = vmatprep.mubr.msk.f32.mxu1 %vm17092_vm4, %v20339_v22  ;;  %4130 = vperm.xlu1 %17090, %v4108_v17  }
 0x233   :  { %14770 = vmatmul.mubr.f32.gmra.mrb[16].mxu0 %v18516_v14  ;;  %v18752_v25 = vsub.f32 %v5926_v4, %v18737_v33  ;;  %v6039_v52 = vsub.f32 %v18732_v53, %v6038_v58  ;;  %v20353_v14 = vand.u32 4294901760, %v18535_v11 }
 0x234   :  { %14772 = vmatprep.mubr.f32.mxu0 %v18528_v18  ;;  %14790 = vmatpush3.msra.mxu0 %v18430_v34  ;;  %v20354_v18 = vand.u32 4294901760, %v18550_v45 }
 0x235   :  { %15078 = vmatmul.mubr.f32.vlgmr.msra.gmra.mrb[48].mxu1 %v18543_v2  ;;  %16290 = vmatprep.subr.bf16.mxu0 %v18386_v23  ;;  %v6010_v24 = vand.u32 4294901760, %v18752_v25  ;;  %v6040_v4 = vand.u32 4294901760, %v6039_v52  ;;  %v4113_v52 = vld [vmem:[%s20202_s4 + $0x38] sm:$0xff] }
 0x236   :  { %15080 = vmatprep.mubr.msk.f32.mxu1 %vm17092_vm4, %v20339_v22  ;;  %16358 = vmatpush3.bf16.msra.mxu1 %v18292_v62  ;;  %v18730_v62 = vsub.f32 %v4804_v61, %v5932_v5  ;;  %v20348_v61 = vand.u32 4294901760, %v18471_v8  ;;  %v6002_v5 = vand.u32 4294901760, %v6001_v16  ;;  %v6020_v8 = vand.u32 4294901760, %v18781_v47 }
 0x237   :  { %16359 = vmatprep.subr.bf16.mxu1 %v20341_v13  ;;  %14773 = vmatmul.mubr.f32.gmra.mrb[18].mxu0 %v18535_v11  ;;  %v6011_v10 = vsub.f32 %v18752_v25, %v6010_v24  ;;  %v20355_v11 = vand.u32 4294901760, %v18567_v29 }
 0x238   :  { %14775 = vmatprep.mubr.f32.mxu0 %v18550_v45  ;;  %v6031_v63 = vand.u32 4294901760, %v18730_v62  ;;  %v6021_v48 = vsub.f32 %v18781_v47, %v6020_v8  ;;  %v16366_v45 = vpack.c.bf16 %v18732_v53, %v18730_v62 }
 0x239   :  { %15081 = vmatmul.mubr.f32.gmra.mrb[50].mxu1 %v18575_v7  ;;  %v6012_v15 = vand.u32 4294901760, %v6011_v10 }
 0x23a   :  { %15083 = vmatprep.mubr.msk.f32.mxu1 %vm17092_vm4, %v20339_v22 }
 0x23b   :  { %14776 = vmatmul.mubr.f32.gmra.mrb[20].mxu0 %v18567_v29  ;;  %v4115_v29 = vld [vmem:[%s20202_s4 + $0x48] sm:$0xff] }
 0x23c   :  { %14778 = vmatprep.mubr.f32.mxu0 %v18580_v43  ;;  %v4117_v43 = vld [vmem:[%s20202_s4 + $0x58] sm:$0x7] }
 0x23d   :  { %15084 = vmatmul.mubr.f32.gmra.mrb[52].mxu1 %v18600_v49 }
 0x23e   :  { %15090 = vmatprep.mubr.msk.f32.mxu1 %vm17092_vm4, %v20339_v22 }
 0x23f   :  { %14779 = vmatmul.mubr.f32.gmra.mrb[22].mxu0 %v18598_v50  ;;  %v4116_v50 = vld [vmem:[%s20202_s4 + $0x50] sm:$0xff] }
 0x240   :  { %14791 = vmatprep.mubr.f32.mxu0 %v20344_v37 }
 0x241   :  { %15091 = vmatmul.mubr.f32.vlgmr.msra.gmra.mrb[54].mxu1 %v18543_v2  ;;  %v6032_v2 = vsub.f32 %v18730_v62, %v6031_v63 }
 0x242   :  { %15093 = vmatprep.mubr.msk.f32.mxu1 %vm17092_vm4, %v20339_v22  ;;  %16361 = vmatpush3.bf16.msra.mxu1 %v18746_v19 }
 0x243   :  { %16362 = vmatprep.subr.bf16.mxu1 %v20341_v13  ;;  %14792 = vmatmul.mubr.f32.vlgmr.msra.gmra.mrb[12].mxu0 %v20347_v56 }
 0x244   :  { %14794 = vmatprep.mubr.f32.mxu0 %v20348_v61  ;;  %16292 = vmatpush3.bf16.msra.mxu0 %v18386_v23  ;;  %v4107_v23 = vld [vmem:[%s20202_s4 + $0x8] sm:$0xff] }
 0x245   :  { %15094 = vmatmul.mubr.f32.gmra.mrb[56].mxu1 %v18575_v7  ;;  %16294 = vmatprep.subr.bf16.mxu0 %v16293_v41  ;;  %v6033_v7 = vand.u32 4294901760, %v6032_v2  ;;  %v6022_v2 = vand.u32 4294901760, %v6021_v48 }
 0x246   :  { %15096 = vmatprep.mubr.msk.f32.mxu1 %vm17092_vm4, %v20339_v22  ;;  %4125 = vperm.xlu0 %17089, %v4107_v23  }
 0x247   :  { %14795 = vmatmul.mubr.f32.gmra.mrb[14].mxu0 %v20349_v40  ;;  %v16363_v37 = vpack.c.bf16 %v6040_v4, %v6033_v7 }
 0x248   :  { %14797 = vmatprep.mubr.f32.mxu0 %v20350_v38  ;;  %16296 = vmatpush3.bf16.msra.mxu0 %v16293_v41  ;;  %v4111_v41 = vld [vmem:[%s20202_s4 + $0x28] sm:$0xff] }
 0x249   :  { %15097 = vmatmul.mubr.f32.gmra.mrb[58].mxu1 %v18600_v49  ;;  %v4109_v49 = vld [vmem:[%s20202_s4 + $0x18] sm:$0xff]  ;;  %14817 = vmatprep.subr.mxu0 %v18523_v55 }
 0x24a   :  { %15103 = vmatprep.mubr.msk.f32.mxu1 %vm17092_vm4, %v20339_v22  ;;  %4135 = vperm.xlu1 %17090, %v4109_v49  }
 0x24b   :  { %14798 = vmatmul.mubr.f32.gmra.mrb[16].mxu0 %v20351_v35 }
 0x24c   :  { %14800 = vmatprep.mubr.f32.mxu0 %v20352_v36  ;;  %14818 = vmatpush3.msra.mxu0 %v18523_v55  ;;  %v4110_v55 = vld [vmem:[%s20202_s4 + $0x20] sm:$0xff] }
 0x24d   :  { %15104 = vmatmul.mubr.f32.vlgmr.msra.gmra.mrb[60].mxu1 %v6002_v5  ;;  %16298 = vmatprep.subr.bf16.mxu0 %v18401_v54 }
 0x24e   :  { %15106 = vmatprep.mubr.msk.f32.mxu1 %vm17092_vm4, %v20339_v22  ;;  %16364 = vmatpush3.bf16.msra.mxu1 %v16363_v37 }
 0x24f   :  { %16365 = vmatprep.subr.bf16.mxu1 %v20341_v13  ;;  %14801 = vmatmul.mubr.f32.gmra.mrb[18].mxu0 %v20353_v14 }
 0x250   :  { %14803 = vmatprep.mubr.f32.mxu0 %v20354_v18  ;;  %4145 = vperm.xlu1 %17090, %v4111_v41  }
 0x251   :  { %15107 = vmatmul.mubr.f32.gmra.mrb[62].mxu1 %v6012_v15  ;;  %4140 = vperm.xlu0 %17089, %v4110_v55  }
 0x252   :  { %15109 = vmatprep.mubr.msk.f32.mxu1 %vm17092_vm4, %v20339_v22 }
 0x253   :  { %14804 = vmatmul.mubr.f32.gmra.mrb[20].mxu0 %v20355_v11 }
 0x254   :  { %14806 = vmatprep.mubr.f32.mxu0 %v3307_v3  ;;  %4155 = vperm.xlu1 %17090, %v4113_v52   ;;  %v4114_v3 = vld [vmem:[%s20202_s4 + $0x40] sm:$0xff] }
 0x255   :  { %15110 = vmatmul.mubr.f32.gmra.mrb[64].mxu1 %v6022_v2  ;;  %4150 = vperm.xlu0 %17089, %v4112_v20  }
 0x256   :  { %15116 = vmatprep.mubr.msk.f32.mxu1 %vm17092_vm4, %v20339_v22 }
 0x257   :  { %14807 = vmatmul.mubr.f32.gmra.mrb[22].mxu0 %v3317_v46  ;;  %v13277_v46 = vld [vmem:[%s20199_s5 + $0x40] sm:$0x7f] }
 0x258   :  { %14819 = vmatprep.mubr.f32.mxu0 %v18433_v26  ;;  %4165 = vperm.xlu1 %17090, %v4115_v29  }
 0x259   :  { %15117 = vmatmul.mubr.f32.vlgmr.msra.gmra.mrb[66].mxu1 %v18720_v28  ;;  %4160 = vperm.xlu0 %17089, %v4114_v3  }
 0x25a   :  { %15119 = vmatprep.mubr.msk.f32.mxu1 %vm17092_vm4, %v20339_v22  ;;  %16367 = vmatpush3.bf16.msra.mxu1 %v16366_v45 }
 0x25b   :  { %16368 = vmatprep.subr.bf16.mxu1 %v20341_v13  ;;  %14820 = vmatmul.mubr.f32.vlgmr.msra.gmra.mrb[12].mxu0 %v18437_v12 }
 0x25c   :  { %14822 = vmatprep.mubr.f32.mxu0 %v18453_v42  ;;  %16300 = vmatpush3.bf16.msra.mxu0 %v18401_v54  ;;  %v16372_v54 = vpack.c.bf16 %v6038_v58, %v6031_v63 }
 0x25d   :  { %15120 = vmatmul.mubr.f32.gmra.mrb[68].mxu1 %v18737_v33  ;;  %16302 = vmatprep.subr.bf16.mxu0 %v18419_v9 }
 0x25e   :  { %15122 = vmatprep.mubr.msk.f32.mxu1 %vm17092_vm4, %v20339_v22  ;;  %4175 = vperm.xlu1 %17090, %v4117_v43  }
 0x25f   :  { %4170 = vperm.xlu0 %17089, %v4116_v50   ;;  %14823 = vmatmul.mubr.f32.gmra.mrb[14].mxu0 %v18461_v44 }
 0x260   :  { %14825 = vmatprep.mubr.f32.mxu0 %v18474_v1  ;;  %16304 = vmatpush3.bf16.msra.mxu0 %v18419_v9  ;;  %v13275_v9 = vld [vmem:[%s20199_s5 + $0x30] sm:$0xff] }
 0x261   :  { %15123 = vmatmul.mubr.f32.gmra.mrb[70].mxu1 %v18754_v60  ;;  %14845 = vmatprep.subr.mxu0 %v18430_v34 }
 0x262   :  { %15129 = vmatprep.mubr.msk.f32.mxu1 %vm17092_vm4, %v20339_v22 }
 0x263   :  { %14826 = vmatmul.mubr.f32.gmra.mrb[16].mxu0 %v18483_v31 }
 0x264   :  { %14828 = vmatprep.mubr.f32.mxu0 %v18501_v57  ;;  %14846 = vmatpush3.msra.mxu0 %v18430_v34  ;;  %v6481_v34 = vsel %vm4245_vm3, %v13275_v9, 0 }
 0x265   :  { %15130 = vmatmul.mubr.f32.vlgmr.msra.gmra.mrb[72].mxu1 %v18735_v6  ;;  %16377 = vmatprep.subr.bf16.mxu0 %v20341_v13 }
 0x266   :  { %15132 = vmatprep.mubr.msk.f32.mxu1 %vm17092_vm4, %v20339_v22  ;;  %16370 = vmatpush3.bf16.msra.mxu1 %v18746_v19 }
 0x267   :  { %16371 = vmatprep.subr.bf16.mxu1 %v20341_v13  ;;  %14829 = vmatmul.mubr.f32.gmra.mrb[18].mxu0 %v18507_v30 }
 0x268   :  { %14831 = vmatprep.mubr.f32.mxu0 %v18520_v32 }
 0x269   :  { %15133 = vmatmul.mubr.f32.gmra.mrb[74].mxu1 %v18752_v25  ;;  %v13280_v25 = vld [vmem:[%s20199_s5 + $0x48] sm:$0xff] }
 0x26a   :  { %15135 = vmatprep.mubr.msk.f32.mxu1 %vm17092_vm4, %v20339_v22 }
 0x26b   :  { %14832 = vmatmul.mubr.f32.gmra.mrb[20].mxu0 %v18538_v27 }
 0x26c   :  { %14834 = vmatprep.mubr.f32.mxu0 %v18553_v21 }
 0x26d   :  { %15136 = vmatmul.mubr.f32.gmra.mrb[76].mxu1 %v18781_v47  ;;  %v7602_v47 = vsel %vm4245_vm3, %v13281_v59, 0 }
 0x26e   :  { %15142 = vmatprep.mubr.msk.f32.mxu1 %vm17092_vm4, %v20339_v22  ;;  %v19038_v61 = vand.u32 4294901760, %v7602_v47 }
 0x26f   :  { %14835 = vmatmul.mubr.f32.gmra.mrb[22].mxu0 %v18571_v51 }
 0x270   :  { %14847 = vmatprep.mubr.f32.mxu0 %v18433_v26  ;;  %v13276_v26 = vld [vmem:[%s20199_s5 + $0x38] sm:$0xff]  ;;  %v19046_v4 = vsub.f32 %v7602_v47, %v19038_v61 }
 0x271   :  { %15143 = vmatmul.mubr.f32.vlgmr.msra.gmra.mrb[78].mxu1 %v6000_v39  ;;  %v20358_v39 = vld [vmem:[#allocation6_spill] sm:$0xff] }
 0x272   :  { %15145 = vmatprep.mubr.msk.f32.mxu1 %vm17092_vm4, %v20339_v22  ;;  %16373 = vmatpush3.bf16.msra.mxu1 %v16372_v54 }
 0x273   :  { %16374 = vmatprep.subr.bf16.mxu1 %v20341_v13  ;;  %14848 = vmatmul.mubr.f32.vlgmr.msra.gmra.mrb[12].mxu0 %v18437_v12  ;;  %v18934_v12 = vand.u32 4294901760, %v6481_v34 }
 0x274   :  { %14850 = vmatprep.mubr.f32.mxu0 %v18453_v42  ;;  %16379 = vmatpush3.bf16.msra.mxu0 %v17741_v0  ;;  %v6484_v42 = vsel %vm4245_vm3, %v13276_v26, 0 }
 0x275   :  { %15146 = vmatmul.mubr.f32.gmra.mrb[80].mxu1 %v6010_v24  ;;  %16380 = vmatprep.subr.bf16.mxu0 %v20341_v13  ;;  %v18946_v62 = vand.u32 4294901760, %v6484_v42  ;;  %v13282_v24 = vld [vmem:[%s20199_s5 + $0x58] sm:$0x7f] }
 0x276   :  { %15148 = vmatprep.mubr.msk.f32.mxu1 %vm17092_vm4, %v20339_v22  ;;  %v7605_v17 = vsel %vm4245_vm3, %v13282_v24, 0 }
 0x277   :  { %14851 = vmatmul.mubr.f32.gmra.mrb[14].mxu0 %v18461_v44  ;;  %v6557_v44 = vsub.f32 %v6481_v34, %v18934_v12  ;;  %v6567_v53 = vsub.f32 %v6484_v42, %v18946_v62  ;;  %v19048_v5 = vand.u32 4294901760, %v7605_v17 }
 0x278   :  { %14853 = vmatprep.mubr.f32.mxu0 %v18474_v1  ;;  %v6487_v1 = vsel %vm4245_vm3, %v13277_v46, 0 }
 0x279   :  { %15149 = vmatmul.mubr.f32.gmra.mrb[82].mxu1 %v6020_v8  ;;  %v18957_v6 = vand.u32 4294901760, %v6487_v1  ;;  %v7686_v8 = vand.u32 4294901760, %v19046_v4  ;;  %v19060_v23 = vsub.f32 %v7605_v17, %v19048_v5 }
 0x27a   :  { %15155 = vmatprep.mubr.msk.f32.mxu1 %vm17092_vm4, %v20339_v22 }
 0x27b   :  { %14854 = vmatmul.mubr.f32.gmra.mrb[16].mxu0 %v18483_v31  ;;  %v6558_v31 = vand.u32 4294901760, %v6557_v44  ;;  %v7687_v38 = vsub.f32 %v19046_v4, %v7686_v8  ;;  %v7696_v49 = vand.u32 4294901760, %v19060_v23 }
 0x27c   :  { %14856 = vmatprep.mubr.f32.mxu0 %v18501_v57 }
 0x27d   :  { %15156 = vmatmul.mubr.f32.vlgmr.msra.gmra.mrb[84].mxu1 %v18720_v28  ;;  %v6559_v57 = vsub.f32 %v6557_v44, %v6558_v31  ;;  %v7688_v37 = vand.u32 4294901760, %v7687_v38  ;;  %v7697_v15 = vsub.f32 %v19060_v23, %v7696_v49 }
 0x27e   :  { %15158 = vmatprep.mubr.msk.f32.mxu1 %vm17092_vm4, %v20339_v22  ;;  %16376 = vmatpush3.bf16.msra.mxu1 %v18746_v19  ;;  %v6568_v19 = vand.u32 4294901760, %v6567_v53 }
 0x27f   :  { %16395 = vmatprep.subr.bf16.mxu1 %v20341_v13  ;;  %14857 = vmatmul.mubr.f32.gmra.mrb[18].mxu0 %v18507_v30  ;;  %v6577_v30 = vsub.f32 %v6487_v1, %v18957_v6  ;;  %v6560_v63 = vand.u32 4294901760, %v6559_v57  ;;  %v7698_v36 = vand.u32 4294901760, %v7697_v15 }
 0x280   :  { %14859 = vmatprep.mubr.f32.mxu0 %v18520_v32  ;;  %v6569_v32 = vsub.f32 %v6567_v53, %v6568_v19 }
 0x281   :  { %15159 = vmatmul.mubr.f32.gmra.mrb[86].mxu1 %v18737_v33  ;;  %v6578_v58 = vand.u32 4294901760, %v6577_v30 }
 0x282   :  { %15161 = vmatprep.mubr.msk.f32.mxu1 %vm17092_vm4, %v20339_v22 }
 0x283   :  { %14860 = vmatmul.mubr.f32.gmra.mrb[20].mxu0 %v18538_v27  ;;  %v6570_v27 = vand.u32 4294901760, %v6569_v32 }
 0x284   :  { %14862 = vmatprep.mubr.f32.mxu0 %v18553_v21  ;;  %v6579_v21 = vsub.f32 %v6577_v30, %v6578_v58 }
 0x285   :  { %15162 = vmatmul.mubr.f32.gmra.mrb[88].mxu1 %v18754_v60 }
 0x286   :  { %15168 = vmatprep.mubr.msk.f32.mxu1 %vm17092_vm4, %v20339_v22 }
 0x287   :  { %14863 = vmatmul.mubr.f32.gmra.mrb[22].mxu0 %v18571_v51  ;;  %v6580_v51 = vand.u32 4294901760, %v6579_v21 }
 0x288   :  { %15181 = vmatprep.mubr.msk.f32.mxu0 %vm17092_vm4, %v20339_v22 }
 0x289   :  { %15169 = vmatmul.mubr.f32.vlgmr.msra.gmra.mrb[90].mxu1 %v18720_v28  ;;  %v20356_v28 = vld [vmem:[#allocation5_spill] sm:$0xff] }
 0x28a   :  { %15171 = vmatprep.mubr.msk.f32.mxu1 %vm17092_vm4, %v20339_v22 }
 0x28b   :  { %15182 = vmatmul.mubr.f32.vlgmr.msra.gmra.mrb[24].mxu0 %v6560_v63 }
 0x28c   :  { %16382 = vmatpush3.bf16.msra.mxu0 %v20356_v28  ;;  %15184 = vmatprep.mubr.msk.f32.mxu0 %vm17092_vm4, %v20339_v22 }
 0x28d   :  { %15172 = vmatmul.mubr.f32.gmra.mrb[92].mxu1 %v18737_v33  ;;  %16383 = vmatprep.subr.bf16.mxu0 %v20341_v13  ;;  %v20357_v33 = vld [vmem:[#allocation7_spill] sm:$0xff] }
 0x28e   :  { %15174 = vmatprep.mubr.msk.f32.mxu1 %vm17092_vm4, %v20339_v22 }
 0x28f   :  { %15185 = vmatmul.mubr.f32.gmra.mrb[26].mxu0 %v6570_v27 }
 0x290   :  { %15187 = vmatprep.mubr.msk.f32.mxu0 %vm17092_vm4, %v20339_v22 }
 0x291   :  { %15175 = vmatmul.mubr.f32.gmra.mrb[94].mxu1 %v18754_v60  ;;  %v7599_v60 = vsel %vm4245_vm3, %v13280_v25, 0 }
 0x292   :  { %15259 = vmatprep.mubr.msk.f32.mxu1 %vm17092_vm4, %v20339_v22  ;;  %v19026_v16 = vand.u32 4294901760, %v7599_v60 }
 0x293   :  { %15188 = vmatmul.mubr.f32.gmra.mrb[28].mxu0 %v6580_v51 }
 0x294   :  { %15194 = vmatprep.mubr.msk.f32.mxu0 %vm17092_vm4, %v20339_v22  ;;  %v19036_v56 = vsub.f32 %v7599_v60, %v19026_v16 }
 0x296   :  { %v7676_v7 = vand.u32 4294901760, %v19036_v56 }
 0x297   :  { %15195 = vmatmul.mubr.f32.vlgmr.msra.gmra.mrb[24].mxu0 %v18934_v12 }
 0x298   :  { %16385 = vmatpush3.bf16.msra.mxu0 %v20357_v33  ;;  %15197 = vmatprep.mubr.msk.f32.mxu0 %vm17092_vm4, %v20339_v22  ;;  %v7677_v10 = vsub.f32 %v19036_v56, %v7676_v7 }
 0x299   :  { %16386 = vmatprep.subr.bf16.mxu0 %v20341_v13 }
 0x29a   :  { %v7678_v40 = vand.u32 4294901760, %v7677_v10 }
 0x29b   :  { %15198 = vmatmul.mubr.f32.gmra.mrb[26].mxu0 %v18946_v62 }
 0x29c   :  { %15200 = vmatprep.mubr.msk.f32.mxu0 %vm17092_vm4, %v20339_v22 }
 0x29f   :  { %15201 = vmatmul.mubr.f32.gmra.mrb[28].mxu0 %v18957_v6 }
 0x2a0   :  { %15207 = vmatprep.mubr.msk.f32.mxu0 %vm17092_vm4, %v20339_v22 }
 0x2a3   :  { %15208 = vmatmul.mubr.f32.vlgmr.msra.gmra.mrb[24].mxu0 %v6557_v44 }
 0x2a4   :  { %16388 = vmatpush3.bf16.msra.mxu0 %v17741_v0  ;;  %15210 = vmatprep.mubr.msk.f32.mxu0 %vm17092_vm4, %v20339_v22 }
 0x2a5   :  { %16389 = vmatprep.subr.bf16.mxu0 %v20341_v13 }
 0x2a7   :  { %15211 = vmatmul.mubr.f32.gmra.mrb[26].mxu0 %v6567_v53 }
 0x2a8   :  { %15213 = vmatprep.mubr.msk.f32.mxu0 %vm17092_vm4, %v20339_v22 }
 0x2ab   :  { %15214 = vmatmul.mubr.f32.gmra.mrb[28].mxu0 %v6577_v30 }
 0x2ac   :  { %15220 = vmatprep.mubr.msk.f32.mxu0 %vm17092_vm4, %v20339_v22 }
 0x2af   :  { %15221 = vmatmul.mubr.f32.vlgmr.msra.gmra.mrb[24].mxu0 %v6558_v31 }
 0x2b0   :  { %16391 = vmatpush3.bf16.msra.mxu0 %v20358_v39  ;;  %15223 = vmatprep.mubr.msk.f32.mxu0 %vm17092_vm4, %v20339_v22 }
 0x2b1   :  { %16392 = vmatprep.subr.bf16.mxu0 %v20341_v13 }
 0x2b3   :  { %15224 = vmatmul.mubr.f32.gmra.mrb[26].mxu0 %v6568_v19 }
 0x2b4   :  { %15226 = vmatprep.mubr.msk.f32.mxu0 %vm17092_vm4, %v20339_v22 }
 0x2b7   :  { %15227 = vmatmul.mubr.f32.gmra.mrb[28].mxu0 %v6578_v58 }
 0x2b8   :  { %15233 = vmatprep.mubr.msk.f32.mxu0 %vm17092_vm4, %v20339_v22 }
 0x2bb   :  { %15234 = vmatmul.mubr.f32.vlgmr.msra.gmra.mrb[24].mxu0 %v18934_v12 }
 0x2bc   :  { %16394 = vmatpush3.bf16.msra.mxu0 %v17741_v0  ;;  %15236 = vmatprep.mubr.msk.f32.mxu0 %vm17092_vm4, %v20339_v22 }
 0x2bd   :  { %16413 = vmatprep.subr.bf16.mxu0 %v20341_v13 }
 0x2bf   :  { %15237 = vmatmul.mubr.f32.gmra.mrb[26].mxu0 %v18946_v62 }
 0x2c0   :  { %15239 = vmatprep.mubr.msk.f32.mxu0 %vm17092_vm4, %v20339_v22 }
 0x2c3   :  { %15240 = vmatmul.mubr.f32.gmra.mrb[28].mxu0 %v18957_v6 }
 0x2c4   :  { %15246 = vmatprep.mubr.msk.f32.mxu0 %vm17092_vm4, %v20339_v22 }
 0x2c7   :  { %15247 = vmatmul.mubr.f32.vlgmr.msra.gmra.mrb[24].mxu0 %v18934_v12 }
 0x2c8   :  { %16415 = vmatpush3.bf16.msra.mxu0 %v17741_v0  ;;  %15249 = vmatprep.mubr.msk.f32.mxu0 %vm17092_vm4, %v20339_v22 }
 0x2c9   :  { %16416 = vmatprep.subr.bf16.mxu0 %v20341_v13 }
 0x2cb   :  { %15250 = vmatmul.mubr.f32.gmra.mrb[26].mxu0 %v18946_v62 }
 0x2cc   :  { %15252 = vmatprep.mubr.msk.f32.mxu0 %vm17092_vm4, %v20339_v22 }
 0x2cf   :  { %15253 = vmatmul.mubr.f32.gmra.mrb[28].mxu0 %v18957_v6 }
 0x2d0   :  { %15337 = vmatprep.mubr.msk.f32.mxu0 %vm17092_vm4, %v20339_v22 }
 0x2d3   :  { %15338 = vmatmul.mubr.f32.vlgmr.msra.gmra.mrb[30].mxu0 %v7678_v40 }
 0x2d4   :  { %16418 = vmatpush3.bf16.msra.mxu0 %v20356_v28  ;;  %15340 = vmatprep.mubr.msk.f32.mxu0 %vm17092_vm4, %v20339_v22 }
 0x2d5   :  { %16419 = vmatprep.subr.bf16.mxu0 %v20341_v13 }
 0x2d7   :  { %15341 = vmatmul.mubr.f32.gmra.mrb[32].mxu0 %v7688_v37 }
 0x2d8   :  { %v5450_v48 = vpop.f32.mrb[24].mxu1  ;;  %15343 = vmatprep.mubr.msk.f32.mxu0 %vm17092_vm4, %v20339_v22 }
 0x2d9   :  { %v15027_v35 = vpop.f32.mrb[25].mxu1 }
 0x2db   :  { %15344 = vmatmul.mubr.f32.gmra.mrb[34].mxu0 %v7698_v36 }
 0x2dc   :  { %v5460_v41 = vpop.f32.mrb[26].mxu1  ;;  %15350 = vmatprep.mubr.msk.f32.mxu0 %vm17092_vm4, %v20339_v22 }
 0x2dd   :  { %v15030_v2 = vpop.f32.mrb[27].mxu1 }
 0x2df   :  { %15351 = vmatmul.mubr.f32.vlgmr.msra.gmra.mrb[30].mxu0 %v19026_v16 }
 0x2e0   :  { %v5470_v14 = vpop.f32.mrb[28].mxu1  ;;  %16421 = vmatpush3.bf16.msra.mxu0 %v20357_v33  ;;  %15353 = vmatprep.mubr.msk.f32.mxu0 %vm17092_vm4, %v20339_v22 }
 0x2e1   :  { %v15033_v55 = vpop.f32.mrb[29].mxu1  ;;  %16422 = vmatprep.subr.bf16.mxu0 %v20341_v13 }
 0x2e3   :  { %15354 = vmatmul.mubr.f32.gmra.mrb[32].mxu0 %v19038_v61 }
 0x2e4   :  { %v5551_v18 = vpop.f32.mrb[30].mxu1  ;;  %15356 = vmatprep.mubr.msk.f32.mxu0 %vm17092_vm4, %v20339_v22 }
 0x2e5   :  { %v5552_v52 = vadd.f32 %v5551_v18, %v5450_v48  ;;  %v15040_v11 = vpop.f32.mrb[31].mxu1 }
 0x2e7   :  { %15357 = vmatmul.mubr.f32.gmra.mrb[34].mxu0 %v19048_v5 }
 0x2e8   :  { %v5557_v20 = vpop.f32.mrb[32].mxu1  ;;  %15363 = vmatprep.mubr.msk.f32.mxu0 %vm17092_vm4, %v20339_v22 }
 0x2e9   :  { %v5558_v45 = vadd.f32 %v5557_v20, %v5460_v41  ;;  %v15043_v29 = vpop.f32.mrb[33].mxu1 }
 0x2eb   :  { %15364 = vmatmul.mubr.f32.vlgmr.msra.gmra.mrb[30].mxu0 %v19036_v56 }
 0x2ec   :  { %v5563_v3 = vpop.f32.mrb[34].mxu1  ;;  %16424 = vmatpush3.bf16.msra.mxu0 %v17741_v0  ;;  %15366 = vmatprep.mubr.msk.f32.mxu0 %vm17092_vm4, %v20339_v22 }
 0x2ed   :  { %v5564_v43 = vadd.f32 %v5563_v3, %v5470_v14  ;;  %v15046_v50 = vpop.f32.mrb[35].mxu1  ;;  %16425 = vmatprep.subr.bf16.mxu0 %v20341_v13 }
 0x2ef   :  { %15367 = vmatmul.mubr.f32.gmra.mrb[32].mxu0 %v19046_v4 }
 0x2f0   :  { %v5639_v54 = vpop.f32.mrb[36].mxu1  ;;  %15369 = vmatprep.mubr.msk.f32.mxu0 %vm17092_vm4, %v20339_v22 }
 0x2f1   :  { %v5640_v9 = vadd.f32 %v5639_v54, %v5552_v52  ;;  %v15053_v34 = vpop.f32.mrb[37].mxu1 }
 0x2f3   :  { %15370 = vmatmul.mubr.f32.gmra.mrb[34].mxu0 %v19060_v23 }
 0x2f4   :  { %v5646_v26 = vpop.f32.mrb[38].mxu1  ;;  %15376 = vmatprep.mubr.msk.f32.mxu0 %vm17092_vm4, %v20339_v22 }
 0x2f5   :  { %v5647_v12 = vadd.f32 %v5646_v26, %v5558_v45  ;;  %v15056_v42 = vpop.f32.mrb[39].mxu1 }
 0x2f7   :  { %15377 = vmatmul.mubr.f32.vlgmr.msra.gmra.mrb[30].mxu0 %v7676_v7 }
 0x2f8   :  { %v5653_v46 = vpop.f32.mrb[40].mxu1  ;;  %16427 = vmatpush3.bf16.msra.mxu0 %v20358_v39  ;;  %15379 = vmatprep.mubr.msk.f32.mxu0 %vm17092_vm4, %v20339_v22 }
 0x2f9   :  { %v5654_v44 = vadd.f32 %v5653_v46, %v5564_v43  ;;  %v15059_v62 = vpop.f32.mrb[41].mxu1  ;;  %16428 = vmatprep.subr.bf16.mxu0 %v20341_v13 }
 0x2fb   :  { %15380 = vmatmul.mubr.f32.gmra.mrb[32].mxu0 %v7686_v8 }
 0x2fc   :  { %v5728_v1 = vpop.f32.mrb[42].mxu1  ;;  %15382 = vmatprep.mubr.msk.f32.mxu0 %vm17092_vm4, %v20339_v22 }
 0x2fd   :  { %v5729_v31 = vadd.f32 %v5728_v1, %v5640_v9  ;;  %v15066_v53 = vpop.f32.mrb[43].mxu1 }
 0x2ff   :  { %15383 = vmatmul.mubr.f32.gmra.mrb[34].mxu0 %v7696_v49  ;;  %v13278_v49 = vld [vmem:[%s20201_s6 + $0x20] sm:$0xff] }
 0x300   :  { %v5736_v6 = vpop.f32.mrb[44].mxu1  ;;  %15389 = vmatprep.mubr.msk.f32.mxu0 %vm17092_vm4, %v20339_v22  ;;  %v7047_v37 = vand.u32 4294901760, %v13278_v49 }
 0x301   :  { %v5737_v57 = vadd.f32 %v5736_v6, %v5647_v12  ;;  %v15069_v19 = vpop.f32.mrb[45].mxu1 }
 0x302   :  { %v19146_v36 = vsub.f32 %v13278_v49, %v7047_v37  ;;  %v4121_v19 = vpop.permute.xlu0 %4120 }
 0x303   :  { %15390 = vmatmul.mubr.f32.vlgmr.msra.gmra.mrb[30].mxu0 %v19026_v16 }
 0x304   :  { %v5744_v30 = vpop.f32.mrb[46].mxu1  ;;  %16430 = vmatpush3.bf16.msra.mxu0 %v17741_v0  ;;  %15392 = vmatprep.mubr.msk.f32.mxu0 %vm17092_vm4, %v20339_v22  ;;  %v7146_v55 = vand.u32 4294901760, %v19146_v36 }
 0x305   :  { %v5745_v63 = vadd.f32 %v5744_v30, %v5654_v44  ;;  %v15072_v32 = vpop.f32.mrb[47].mxu1  ;;  %16449 = vmatprep.subr.bf16.mxu0 %v20341_v13 }
 0x306   :  { %v7147_v45 = vsub.f32 %v19146_v36, %v7146_v55 }
 0x307   :  { %15393 = vmatmul.mubr.f32.gmra.mrb[32].mxu0 %v19038_v61 }
 0x308   :  { %v5821_v58 = vpop.f32.mrb[48].mxu1  ;;  %15395 = vmatprep.mubr.msk.f32.mxu0 %vm17092_vm4, %v20339_v22  ;;  %v7148_v3 = vand.u32 4294901760, %v7147_v45 }
 0x309   :  { %v5822_v27 = vadd.f32 %v5821_v58, %v5729_v31  ;;  %v15079_v21 = vpop.f32.mrb[49].mxu1  ;;  %v4131_v31 = vpop.permute.xlu1 %4130 }
 0x30b   :  { %15396 = vmatmul.mubr.f32.gmra.mrb[34].mxu0 %v19048_v5 }
 0x30c   :  { %v5827_v28 = vpop.f32.mrb[50].mxu1  ;;  %15402 = vmatprep.mubr.msk.f32.mxu0 %vm17092_vm4, %v20339_v22 }
 0x30d   :  { %v5828_v51 = vadd.f32 %v5827_v28, %v5737_v57  ;;  %v15082_v33 = vpop.f32.mrb[51].mxu1  ;;  %v4136_v58 = vpop.permute.xlu1 %4135 }
 0x30f   :  { %15403 = vmatmul.mubr.f32.vlgmr.msra.gmra.mrb[30].mxu0 %v19026_v16 }
 0x310   :  { %v5833_v0 = vpop.f32.mrb[52].mxu1  ;;  %15405 = vmatprep.mubr.msk.f32.mxu0 %vm17092_vm4, %v20339_v22 }
 0x311   :  { %v5834_v39 = vadd.f32 %v5833_v0, %v5745_v63  ;;  %v15085_v25 = vpop.f32.mrb[53].mxu1  ;;  %v4146_v33 = vpop.permute.xlu1 %4145 }
 0x313   :  { %15406 = vmatmul.mubr.f32.gmra.mrb[32].mxu0 %v19038_v61 }
 0x314   :  { %v5906_v60 = vpop.f32.mrb[54].mxu1  ;;  %15408 = vmatprep.mubr.msk.f32.mxu0 %vm17092_vm4, %v20339_v22 }
 0x315   :  { %v5907_v59 = vadd.f32 %v5906_v60, %v5822_v27  ;;  %v15092_v47 = vpop.f32.mrb[55].mxu1  ;;  %v4156_v49 = vpop.permute.xlu1 %4155 }
 0x317   :  { %15409 = vmatmul.mubr.f32.gmra.mrb[34].mxu0 %v19048_v5  ;;  %v13279_v5 = vld [vmem:[%s20201_s6 + $0x28] sm:$0xff] }
 0x318   :  { %v5912_v24 = vpop.f32.mrb[56].mxu1  ;;  %15493 = vmatprep.mubr.msk.f32.mxu0 %vm17092_vm4, %v20339_v22  ;;  %v7050_v15 = vand.u32 4294901760, %v13279_v5 }
 0x319   :  { %v5913_v56 = vadd.f32 %v5912_v24, %v5828_v51  ;;  %v15095_v17 = vpop.f32.mrb[57].mxu1  ;;  %v4126_v51 = vpop.permute.xlu0 %4125 }
 0x31a   :  { %v19144_v35 = vpack.c.bf16 %v7050_v15, %v7047_v37  ;;  %v19148_v41 = vsub.f32 %v13279_v5, %v7050_v15 }
 0x31c   :  { %v5918_v16 = vpop.f32.mrb[58].mxu1  ;;  %16397 = vmatpush3.bf16.msra.mxu1 %v19144_v35  ;;  %v7153_v18 = vand.u32 4294901760, %v19148_v41  ;;  %v16402_v46 = vpack.c.bf16 %v19148_v41, %v19146_v36 }
 0x31d   :  { %v5919_v7 = vadd.f32 %v5918_v16, %v5834_v39  ;;  %v15098_v4 = vpop.f32.mrb[59].mxu1  ;;  %16398 = vmatprep.subr.bf16.mxu1 %v20341_v13  ;;  %v4141_v24 = vpop.permute.xlu0 %4140 }
 0x31e   :  { %v7154_v29 = vsub.f32 %v19148_v41, %v7153_v18  ;;  %v13283_v41 = vld [vmem:[%s20201_s6 + $0x30] sm:$0xff] }
 0x320   :  { %v6004_v10 = vpop.f32.mrb[60].mxu1  ;;  %v7155_v43 = vand.u32 4294901760, %v7154_v29 }
 0x321   :  { %v6005_v8 = vadd.f32 %v6004_v10, %v5907_v59  ;;  %v15105_v23 = vpop.f32.mrb[61].mxu1 }
 0x322   :  { %v19156_v34 = vpack.c.bf16 %v7155_v43, %v7148_v3  ;;  %v19160_v23 = vpack.c.bf16 %v7153_v18, %v7146_v55 }
 0x324   :  { %v6014_v40 = vpop.f32.mrb[62].mxu1 }
 0x325   :  { %v6015_v38 = vadd.f32 %v6014_v40, %v5913_v56  ;;  %v15108_v61 = vpop.f32.mrb[63].mxu1 }
 0x328   :  { %v6024_v48 = vpop.f32.mrb[64].mxu1 }
 0x329   :  { %v6025_v2 = vadd.f32 %v6024_v48, %v5919_v7  ;;  %v15111_v14 = vpop.f32.mrb[65].mxu1  ;;  %v4151_v48 = vpop.permute.xlu0 %4150 }
 0x32c   :  { %v6105_v52 = vpop.f32.mrb[66].mxu1 }
 0x32d   :  { %v6106_v11 = vadd.f32 %v6105_v52, %v6005_v8  ;;  %v15118_v20 = vpop.f32.mrb[67].mxu1 }
 0x330   :  { %v6111_v50 = vpop.f32.mrb[68].mxu1 }
 0x331   :  { %v6112_v54 = vadd.f32 %v6111_v50, %v6015_v38  ;;  %v15121_v9 = vpop.f32.mrb[69].mxu1  ;;  %v4166_v50 = vpop.permute.xlu1 %4165 }
 0x334   :  { %v6117_v26 = vpop.f32.mrb[70].mxu1 }
 0x335   :  { %v6118_v12 = vadd.f32 %v6117_v26, %v6025_v2  ;;  %v15124_v42 = vpop.f32.mrb[71].mxu1 }
 0x338   :  { %v6193_v44 = vpop.f32.mrb[72].mxu1 }
 0x339   :  { %v6194_v62 = vadd.f32 %v6193_v44, %v6106_v11  ;;  %v15131_v1 = vpop.f32.mrb[73].mxu1 }
 0x33c   :  { %v6200_v53 = vpop.f32.mrb[74].mxu1 }
 0x33d   :  { %v6201_v6 = vadd.f32 %v6200_v53, %v6112_v54  ;;  %v15134_v57 = vpop.f32.mrb[75].mxu1 }
 0x340   :  { %v6207_v30 = vpop.f32.mrb[76].mxu1 }
 0x341   :  { %v6208_v63 = vadd.f32 %v6207_v30, %v6118_v12  ;;  %v15137_v32 = vpop.f32.mrb[77].mxu1 }
 0x344   :  { %v6282_v27 = vpop.f32.mrb[78].mxu1 }
 0x345   :  { %v6283_v21 = vadd.f32 %v6282_v27, %v6194_v62  ;;  %v15144_v28 = vpop.f32.mrb[79].mxu1 }
 0x346   :  { %v14849_v39 = vpop.f32.mrb[12].mxu0 }
 0x347   :  { %v4179_v59 = vadd.f32 %v14849_v39, %v4126_v51  ;;  %v4036_v47 = vpop.f32.mrb[13].mxu0 }
 0x348   :  { %v6290_v0 = vpop.f32.mrb[80].mxu1  ;;  %v4178_v56 = vadd.f32 %v4121_v19, %v4036_v47 }
 0x349   :  { %v6291_v25 = vadd.f32 %v6290_v0, %v6201_v6  ;;  %v15147_v60 = vpop.f32.mrb[81].mxu1  ;;  %vm4191_vm7 = vcmp.gt.f32.partialorder %v4179_v59, -1.958  ;;  %v4203_v17 = vmul.f32 0.24, %v4179_v59  ;;  %v4176_v0 = vpop.permute.xlu1 %4175 }
 0x34a   :  { %vm4190_vm9 = vcmp.gt.f32.partialorder %v4178_v56, -1.958  ;;  %v4202_v7 = vmul.f32 0.24, %v4178_v56  ;;  %v14852_v4 = vpop.f32.mrb[14].mxu0 }
 0x34b   :  { %v4215_v40 = vsel %vm4191_vm7, %v4179_v59, %v4203_v17  ;;  %v4181_v38 = vadd.f32 %v14852_v4, %v4136_v58  ;;  %v4048_v61 = vpop.f32.mrb[15].mxu0  ;;  %vm4238_vm7 = vcmask 632832  }
 0x34c   :  { %v6298_v16 = vpop.f32.mrb[82].mxu1  ;;  %4228 = vst.msk [vmem:[%s20203_s8 + $0x8] sm:$0xff] %vm4226_vm8, %v4215_v40  ;;  %v4214_v5 = vsel %vm4190_vm9, %v4178_v56, %v4202_v7  ;;  %v4180_v37 = vadd.f32 %v4131_v31, %v4048_v61  ;;  %v4161_v31 = vpop.permute.xlu0 %4160 }
 0x34d   :  { %v6299_v10 = vadd.f32 %v6298_v16, %v6208_v63  ;;  %v15150_v8 = vpop.f32.mrb[83].mxu1  ;;  %4227 = vst.msk [vmem:[%s20203_s8] sm:$0xff] %vm4226_vm8, %v4214_v5  ;;  %vm4193_vm10 = vcmp.gt.f32.partialorder %v4181_v38, -1.958  ;;  %v4205_v15 = vmul.f32 0.24, %v4181_v38 }
 0x34e   :  { %vm4192_vm11 = vcmp.gt.f32.partialorder %v4180_v37, -1.958  ;;  %v4204_v14 = vmul.f32 0.24, %v4180_v37  ;;  %v14855_v55 = vpop.f32.mrb[16].mxu0 }
 0x34f   :  { %v4217_v11 = vsel %vm4193_vm10, %v4181_v38, %v4205_v15  ;;  %v4183_v20 = vadd.f32 %v14855_v55, %v4146_v33  ;;  %v4060_v45 = vpop.f32.mrb[17].mxu0 }
 0x350   :  { %v6375_v2 = vpop.f32.mrb[84].mxu1  ;;  %4230 = vst.msk [vmem:[%s20203_s8 + $0x18] sm:$0xff] %vm4226_vm8, %v4217_v11  ;;  %v4216_v29 = vsel %vm4192_vm11, %v4180_v37, %v4204_v14  ;;  %v4182_v3 = vadd.f32 %v4141_v24, %v4060_v45  ;;  %v8750_v14 = vld [vmem:[%s20199_s5] sm:$0xff]  ;;  %v13285_v11 = vld [vmem:[%s20198_s1 + $0x10] sm:$0xff]  ;;  %vm8745_vm11 = vcmask 514048  }
 0x351   :  { %v6376_v18 = vadd.f32 %v6375_v2, %v6283_v21  ;;  %v15157_v52 = vpop.f32.mrb[85].mxu1  ;;  %4229 = vst.msk [vmem:[%s20203_s8 + $0x10] sm:$0xff] %vm4226_vm8, %v4216_v29  ;;  %vm4195_vm12 = vcmp.gt.f32.partialorder %v4183_v20, -1.958  ;;  %v8754_v55 = vsel %vm4245_vm3, %v8750_v14, 0  ;;  %v8751_v29 = vld [vmem:[%s20199_s5 + $0x8] sm:$0xff] }
 0x352   :  { %v4207_v43 = vmul.f32 0.24, %v4183_v20  ;;  %vm4194_vm13 = vcmp.gt.f32.partialorder %v4182_v3, -1.958  ;;  %v4206_v9 = vmul.f32 0.24, %v4182_v3 }
 0x353   :  { %v14858_v26 = vpop.f32.mrb[18].mxu0  ;;  %v13286_v52 = vld [vmem:[%s20198_s1 + $0x18] sm:$0xf] }
 0x354   :  { %v6381_v54 = vpop.f32.mrb[86].mxu1  ;;  %v4219_v44 = vsel %vm4195_vm12, %v4183_v20, %v4207_v43  ;;  %v4185_v62 = vadd.f32 %v14858_v26, %v4156_v49  ;;  %v4072_v1 = vpop.f32.mrb[19].mxu0  ;;  %v4218_v53 = vsel %vm4194_vm13, %v4182_v3, %v4206_v9  ;;  %v8763_v20 = vsel %vm4255_vm2, %v13286_v52, 0 }
 0x355   :  { %v6382_v12 = vadd.f32 %v6381_v54, %v6291_v25  ;;  %v15160_v42 = vpop.f32.mrb[87].mxu1  ;;  %4232 = vst.msk [vmem:[%s20203_s8 + $0x28] sm:$0xff] %vm4226_vm8, %v4219_v44  ;;  %v4184_v6 = vadd.f32 %v4151_v48, %v4072_v1  ;;  %4231 = vst.msk [vmem:[%s20203_s8 + $0x20] sm:$0xff] %vm4226_vm8, %v4218_v53  ;;  %v4171_v25 = vpop.permute.xlu0 %4170  ;;  %v8766_v3 = vand.u32 4294901760, %v13285_v11  ;;  %v8769_v43 = vand.u32 4294901760, %v8763_v20 }
 0x356   :  { %vm4197_vm14 = vcmp.gt.f32.partialorder %v4185_v62, -1.958  ;;  %v4209_v57 = vmul.f32 0.24, %v4185_v62  ;;  %v14861_v63 = vpop.f32.mrb[20].mxu0  ;;  %vm8742_vm2 = vcmask 515072  }
 0x357   :  { %vm4196_vm15 = vcmp.gt.f32.partialorder %v4184_v6, -1.958  ;;  %v4208_v30 = vmul.f32 0.24, %v4184_v6  ;;  %v4187_v21 = vadd.f32 %v14861_v63, %v4166_v50  ;;  %v4084_v28 = vpop.f32.mrb[21].mxu0  ;;  %v8757_v50 = vsel %vm4245_vm3, %v8751_v29, 0 }
 0x358   :  { %v6387_v19 = vpop.f32.mrb[88].mxu1  ;;  %v4221_v27 = vsel %vm4197_vm14, %v4185_v62, %v4209_v57  ;;  %v4186_v33 = vadd.f32 %v4161_v31, %v4084_v28  ;;  %v19236_v9 = vand.u32 4294901760, %v8757_v50  ;;  %v19238_v26 = vpack.c.bf16 %v8769_v43, %v8766_v3  ;;  %v8752_v62 = vld [vmem:[%s20199_s5 + $0x10] sm:$0x7f] }
 0x359   :  { %v6388_v32 = vadd.f32 %v6387_v19, %v6299_v10  ;;  %v15163_v58 = vpop.f32.mrb[89].mxu1  ;;  %4234 = vst.msk [vmem:[%s20203_s8 + $0x38] sm:$0xff] %vm4226_vm8, %v4221_v27  ;;  %v4220_v51 = vsel %vm4196_vm15, %v4184_v6, %v4208_v30  ;;  %vm4199_vm0 = vcmp.gt.f32.partialorder %v4187_v21, -1.958  ;;  %v8760_v53 = vsel %vm4245_vm3, %v8752_v62, 0 }
 0x35a   :  { %4233 = vst.msk [vmem:[%s20203_s8 + $0x30] sm:$0xff] %vm4226_vm8, %v4220_v51  ;;  %v4211_v39 = vmul.f32 0.24, %v4187_v21  ;;  %vm4198_vm1 = vcmp.gt.f32.partialorder %v4186_v33, -1.958  ;;  %v19244_v44 = vsub.f32 %v8757_v50, %v19236_v9  ;;  %16451 = vmatpush3.bf16.msra.mxu0 %v19238_v26  ;;  %v19255_v30 = vand.u32 4294901760, %v8760_v53 }
 0x35b   :  { %v4210_v59 = vmul.f32 0.24, %v4186_v33  ;;  %v14864_v47 = vpop.f32.mrb[22].mxu0  ;;  %16452 = vmatprep.subr.bf16.mxu0 %v20341_v13  ;;  %v19258_v63 = vsub.f32 %v13285_v11, %v8766_v3 }
 0x35c   :  { %v6460_v60 = vpop.f32.mrb[90].mxu1  ;;  %v4223_v17 = vsel %vm4199_vm0, %v4187_v21, %v4211_v39  ;;  %v4189_v16 = vadd.f32 %v14864_v47, %v4176_v0  ;;  %v4096_v7 = vpop.f32.mrb[23].mxu0  ;;  %v8844_v19 = vand.u32 4294901760, %v19244_v44  ;;  %v19269_v28 = vsub.f32 %v8760_v53, %v19255_v30 }
 0x35d   :  { %v19194_v24 = vadd.f32 %v6460_v60, %v6376_v18  ;;  %v15170_v56 = vpop.f32.mrb[91].mxu1  ;;  %4236 = vst.msk [vmem:[%s20203_s8 + $0x48] sm:$0xff] %vm4226_vm8, %v4223_v17  ;;  %v4222_v4 = vsel %vm4198_vm1, %v4186_v33, %v4210_v59  ;;  %v4188_v10 = vadd.f32 %v4171_v25, %v4096_v7  ;;  %v19219_v18 = vand.u32 4294901760, %v8754_v55 }
 0x35e   :  { %4235 = vst.msk [vmem:[%s20203_s8 + $0x40] sm:$0xff] %vm4226_vm8, %v4222_v4  ;;  %vm4201_vm5 = vcmp.gt.f32.partialorder %v4189_v16, -1.958  ;;  %v4213_v8 = vmul.f32 0.24, %v4189_v16  ;;  %v8845_v21 = vsub.f32 %v19244_v44, %v8844_v19  ;;  %v8865_v0 = vand.u32 4294901760, %v19258_v63 }
 0x35f   :  { %vm4200_vm9 = vcmp.gt.f32.partialorder %v4188_v10, -1.958  ;;  %v4212_v38 = vmul.f32 0.24, %v4188_v10  ;;  %v19229_v45 = vsub.f32 %v8754_v55, %v19219_v18  ;;  %v8854_v47 = vand.u32 4294901760, %v19269_v28 }
 0x360   :  { %v6466_v40 = vpop.f32.mrb[92].mxu1  ;;  %v4225_v5 = vsel %vm4201_vm5, %v4189_v16, %v4213_v8  ;;  %v8846_v59 = vand.u32 4294901760, %v8845_v21  ;;  %v8866_v56 = vsub.f32 %v19258_v63, %v8865_v0 }
 0x361   :  { %v19204_v61 = vadd.f32 %v6466_v40, %v6382_v12  ;;  %v15173_v49 = vpop.f32.mrb[93].mxu1  ;;  %4239 = vst.msk [vmem:[%s20203_s8 + $0x58] sm:$0x7] %vm4238_vm7, %v4225_v5  ;;  %v4224_v37 = vsel %vm4200_vm9, %v4188_v10, %v4212_v38  ;;  %v8834_v54 = vand.u32 4294901760, %v19229_v45  ;;  %v8855_v10 = vsub.f32 %v19269_v28, %v8854_v47 }
 0x362   :  { %4237 = vst.msk [vmem:[%s20203_s8 + $0x50] sm:$0xff] %vm4226_vm8, %v4224_v37  ;;  %v8867_v38 = vand.u32 4294901760, %v8866_v56 }
 0x363   :  { %v8835_v42 = vsub.f32 %v19229_v45, %v8834_v54 }
 0x364   :  { %v6472_v15 = vpop.f32.mrb[94].mxu1 }
 0x365   :  { %v19213_v48 = vadd.f32 %v6472_v15, %v6388_v32  ;;  %v15176_v2 = vpop.f32.mrb[95].mxu1  ;;  %v8836_v57 = vand.u32 4294901760, %v8835_v42  ;;  %v19260_v32 = vsub.f32 %v8763_v20, %v8769_v43 }
 0x366   :  { %v8856_v2 = vand.u32 4294901760, %v8855_v10  ;;  %v8713_v10 = vld [vmem:[%s20204_s7 + $0x8] sm:$0xff] }
 0x367   :  { %15494 = vmatmul.mubr.f32.vlgmr.msra.gmra.mrb[36].mxu0 %v8836_v57  ;;  %v8872_v39 = vand.u32 4294901760, %v19260_v32  ;;  %v19326_v3 = vpack.c.bf16 %v19260_v32, %v19258_v63  ;;  %8722 = vperm.xlu1 %17090, %v8713_v10  }
 0x368   :  { %15496 = vmatprep.mubr.msk.f32.mxu0 %vm17092_vm4, %v20339_v22 }
 0x369   :  { %v8873_v17 = vsub.f32 %v19260_v32, %v8872_v39  ;;  %v19379_v36 = vpack.c.bf16 %v8872_v39, %v8865_v0 }
 0x36b   :  { %15497 = vmatmul.mubr.f32.gmra.mrb[38].mxu0 %v8846_v59  ;;  %v8874_v49 = vand.u32 4294901760, %v8873_v17 }
 0x36c   :  { %15499 = vmatprep.mubr.msk.f32.mxu0 %vm17092_vm4, %v20339_v22 }
 0x36d   :  { %v19301_v14 = vpack.c.bf16 %v8874_v49, %v8867_v38  ;;  %v13287_v38 = vld [vmem:[%s20199_s5 + $0x18] sm:$0xff] }
 0x36e   :  { %v9316_v49 = vsel %vm4245_vm3, %v13287_v38, 0 }
 0x36f   :  { %15500 = vmatmul.mubr.f32.gmra.mrb[40].mxu0 %v8856_v2  ;;  %v13289_v2 = vld [vmem:[%s20199_s5 + $0x28] sm:$0x7f] }
 0x370   :  { %16454 = vmatpush3.bf16.msra.mxu0 %v19301_v14  ;;  %15506 = vmatprep.mubr.msk.f32.mxu0 %vm17092_vm4, %v20339_v22 }
 0x371   :  { %16455 = vmatprep.subr.bf16.mxu0 %v20341_v13 }
 0x373   :  { %15507 = vmatmul.mubr.f32.vlgmr.msra.gmra.mrb[36].mxu0 %v19219_v18 }
 0x374   :  { %15509 = vmatprep.mubr.msk.f32.mxu0 %vm17092_vm4, %v20339_v22  ;;  %16457 = vmatpush3.bf16.msra.mxu0 %v19326_v3 }
 0x375   :  { %16458 = vmatprep.subr.bf16.mxu0 %v20341_v13 }
 0x377   :  { %15510 = vmatmul.mubr.f32.gmra.mrb[38].mxu0 %v19236_v9 }
 0x378   :  { %15512 = vmatprep.mubr.msk.f32.mxu0 %vm17092_vm4, %v20339_v22 }
 0x37b   :  { %15513 = vmatmul.mubr.f32.gmra.mrb[40].mxu0 %v19255_v30 }
 0x37c   :  { %15519 = vmatprep.mubr.msk.f32.mxu0 %vm17092_vm4, %v20339_v22 }
 0x37f   :  { %15520 = vmatmul.mubr.f32.vlgmr.msra.gmra.mrb[36].mxu0 %v19229_v45 }
 0x380   :  { %15522 = vmatprep.mubr.msk.f32.mxu0 %vm17092_vm4, %v20339_v22  ;;  %16460 = vmatpush3.bf16.msra.mxu0 %v19238_v26 }
 0x381   :  { %16461 = vmatprep.subr.bf16.mxu0 %v20341_v13 }
 0x383   :  { %15523 = vmatmul.mubr.f32.gmra.mrb[38].mxu0 %v19244_v44 }
 0x384   :  { %15525 = vmatprep.mubr.msk.f32.mxu0 %vm17092_vm4, %v20339_v22 }
 0x387   :  { %15526 = vmatmul.mubr.f32.gmra.mrb[40].mxu0 %v19269_v28 }
 0x388   :  { %15532 = vmatprep.mubr.msk.f32.mxu0 %vm17092_vm4, %v20339_v22 }
 0x38b   :  { %15533 = vmatmul.mubr.f32.vlgmr.msra.gmra.mrb[36].mxu0 %v8834_v54 }
 0x38c   :  { %15535 = vmatprep.mubr.msk.f32.mxu0 %vm17092_vm4, %v20339_v22  ;;  %16463 = vmatpush3.bf16.msra.mxu0 %v19379_v36 }
 0x38d   :  { %16464 = vmatprep.subr.bf16.mxu0 %v20341_v13 }
 0x38f   :  { %15536 = vmatmul.mubr.f32.gmra.mrb[38].mxu0 %v8844_v19 }
 0x390   :  { %15538 = vmatprep.mubr.msk.f32.mxu0 %vm17092_vm4, %v20339_v22 }
 0x393   :  { %15539 = vmatmul.mubr.f32.gmra.mrb[40].mxu0 %v8854_v47 }
 0x394   :  { %15545 = vmatprep.mubr.msk.f32.mxu0 %vm17092_vm4, %v20339_v22 }
 0x397   :  { %15546 = vmatmul.mubr.f32.vlgmr.msra.gmra.mrb[36].mxu0 %v19219_v18 }
 0x398   :  { %15548 = vmatprep.mubr.msk.f32.mxu0 %vm17092_vm4, %v20339_v22  ;;  %16466 = vmatpush3.bf16.msra.mxu0 %v19238_v26 }
 0x399   :  { %16485 = vmatprep.subr.bf16.mxu0 %v20341_v13 }
 0x39a   :  { %v7018_v12 = vpop.f32.mrb[24].mxu0 }
 0x39b   :  { %v7038_v1 = vsel %vm5367_vm6, %v7018_v12, 0  ;;  %v15248_v31 = vpop.f32.mrb[25].mxu0  ;;  %15549 = vmatmul.mubr.f32.gmra.mrb[38].mxu0 %v19236_v9 }
 0x39c   :  { %v19252_v6 = vand.u32 4294901760, %v7038_v1  ;;  %15551 = vmatprep.mubr.msk.f32.mxu0 %vm17092_vm4, %v20339_v22 }
 0x39e   :  { %v19263_v58 = vsub.f32 %v7038_v1, %v19252_v6  ;;  %v7024_v27 = vpop.f32.mrb[26].mxu0 }
 0x39f   :  { %v7041_v51 = vsel %vm5367_vm6, %v7024_v27, 0  ;;  %v15251_v33 = vpop.f32.mrb[27].mxu0  ;;  %15552 = vmatmul.mubr.f32.gmra.mrb[40].mxu0 %v19255_v30 }
 0x3a0   :  { %v7115_v25 = vand.u32 4294901760, %v19263_v58  ;;  %v19277_v60 = vand.u32 4294901760, %v7041_v51  ;;  %15558 = vmatprep.mubr.msk.f32.mxu0 %vm17092_vm4, %v20339_v22 }
 0x3a2   :  { %v7116_v16 = vsub.f32 %v19263_v58, %v7115_v25  ;;  %v19290_v7 = vsub.f32 %v7041_v51, %v19277_v60  ;;  %v7030_v4 = vpop.f32.mrb[28].mxu0 }
 0x3a3   :  { %v7044_v8 = vsel %vm5367_vm6, %v7030_v4, 0  ;;  %v15254_v40 = vpop.f32.mrb[29].mxu0  ;;  %15559 = vmatmul.mubr.f32.vlgmr.msra.gmra.mrb[36].mxu0 %v19219_v18  ;;  %v8712_v4 = vld [vmem:[%s20204_s7] sm:$0xff] }
 0x3a4   :  { %v7117_v5 = vand.u32 4294901760, %v7116_v16  ;;  %v7125_v37 = vand.u32 4294901760, %v19290_v7  ;;  %v19299_v15 = vand.u32 4294901760, %v7044_v8  ;;  %15561 = vmatprep.mubr.msk.f32.mxu0 %vm17092_vm4, %v20339_v22  ;;  %8717 = vperm.xlu0 %17089, %v8712_v4  }
 0x3a6   :  { %v19304_v55 = vsub.f32 %v7044_v8, %v19299_v15  ;;  %15260 = vmatmul.mubr.f32.vlgmr.msra.gmra.mrb[96].mxu1 %v7117_v5  ;;  %v7126_v52 = vsub.f32 %v19290_v7, %v7125_v37  ;;  %v8714_v8 = vld [vmem:[%s20204_s7 + $0x10] sm:$0x7f]  ;;  %v13288_v5 = vld [vmem:[%s20199_s5 + $0x20] sm:$0xff] }
 0x3a7   :  { %16400 = vmatpush3.bf16.msra.mxu1 %v19156_v34  ;;  %15262 = vmatprep.mubr.msk.f32.mxu1 %vm17092_vm4, %v20339_v22 }
 0x3a8   :  { %v7135_v11 = vand.u32 4294901760, %v19304_v55  ;;  %v7127_v20 = vand.u32 4294901760, %v7126_v52  ;;  %16401 = vmatprep.subr.bf16.mxu1 %v20341_v13  ;;  %15562 = vmatmul.mubr.f32.gmra.mrb[38].mxu0 %v19236_v9 }
 0x3a9   :  { %15564 = vmatprep.mubr.msk.f32.mxu0 %vm17092_vm4, %v20339_v22  ;;  %8727 = vperm.xlu0 %17089, %v8714_v8  }
 0x3aa   :  { %15263 = vmatmul.mubr.f32.gmra.mrb[98].mxu1 %v7127_v20  ;;  %v7136_v29 = vsub.f32 %v19304_v55, %v7135_v11 }
 0x3ab   :  { %15265 = vmatprep.mubr.msk.f32.mxu1 %vm17092_vm4, %v20339_v22 }
 0x3ac   :  { %v7137_v34 = vand.u32 4294901760, %v7136_v29  ;;  %15565 = vmatmul.mubr.f32.gmra.mrb[40].mxu0 %v19255_v30 }
 0x3ad   :  { %15649 = vmatprep.mubr.msk.f32.mxu0 %vm17092_vm4, %v20339_v22 }
 0x3ae   :  { %15266 = vmatmul.mubr.f32.gmra.mrb[100].mxu1 %v7137_v34 }
 0x3af   :  { %15272 = vmatprep.mubr.msk.f32.mxu1 %vm17092_vm4, %v20339_v22 }
 0x3b2   :  { %15273 = vmatmul.mubr.f32.vlgmr.msra.gmra.mrb[102].mxu1 %v19252_v6 }
 0x3b3   :  { %16403 = vmatpush3.bf16.msra.mxu1 %v16402_v46  ;;  %15275 = vmatprep.mubr.msk.f32.mxu1 %vm17092_vm4, %v20339_v22  ;;  %v13284_v46 = vld [vmem:[%s20201_s6 + $0x38] sm:$0xff] }
 0x3b4   :  { %16404 = vmatprep.subr.bf16.mxu1 %v20341_v13  ;;  %v8168_v45 = vand.u32 4294901760, %v13284_v46 }
 0x3b6   :  { %15276 = vmatmul.mubr.f32.gmra.mrb[104].mxu1 %v19277_v60 }
 0x3b7   :  { %15278 = vmatprep.mubr.msk.f32.mxu1 %vm17092_vm4, %v20339_v22 }
 0x3ba   :  { %15279 = vmatmul.mubr.f32.gmra.mrb[106].mxu1 %v19299_v15 }
 0x3bb   :  { %15285 = vmatprep.mubr.msk.f32.mxu1 %vm17092_vm4, %v20339_v22 }
 0x3be   :  { %15286 = vmatmul.mubr.f32.vlgmr.msra.gmra.mrb[108].mxu1 %v19263_v58 }
 0x3bf   :  { %16406 = vmatpush3.bf16.msra.mxu1 %v19144_v35  ;;  %15288 = vmatprep.mubr.msk.f32.mxu1 %vm17092_vm4, %v20339_v22 }
 0x3c0   :  { %16407 = vmatprep.subr.bf16.mxu1 %v20341_v13 }
 0x3c2   :  { %15289 = vmatmul.mubr.f32.gmra.mrb[110].mxu1 %v19290_v7 }
 0x3c3   :  { %15291 = vmatprep.mubr.msk.f32.mxu1 %vm17092_vm4, %v20339_v22 }
 0x3c6   :  { %15292 = vmatmul.mubr.f32.gmra.mrb[112].mxu1 %v19304_v55 }
 0x3c7   :  { %15298 = vmatprep.mubr.msk.f32.mxu1 %vm17092_vm4, %v20339_v22 }
 0x3ca   :  { %15299 = vmatmul.mubr.f32.vlgmr.msra.gmra.mrb[114].mxu1 %v7115_v25 }
 0x3cb   :  { %16409 = vmatpush3.bf16.msra.mxu1 %v19160_v23  ;;  %15301 = vmatprep.mubr.msk.f32.mxu1 %vm17092_vm4, %v20339_v22  ;;  %v8165_v23 = vand.u32 4294901760, %v13283_v41 }
 0x3cc   :  { %16410 = vmatprep.subr.bf16.mxu1 %v20341_v13 }
 0x3cd   :  { %v19430_v43 = vsub.f32 %v13283_v41, %v8165_v23  ;;  %v19440_v50 = vpack.c.bf16 %v8168_v45, %v8165_v23 }
 0x3ce   :  { %15302 = vmatmul.mubr.f32.gmra.mrb[116].mxu1 %v7125_v37  ;;  %v19539_v37 = vand.u32 4294901760, %v9316_v49 }
 0x3cf   :  { %15304 = vmatprep.mubr.msk.f32.mxu1 %vm17092_vm4, %v20339_v22  ;;  %v8264_v54 = vand.u32 4294901760, %v19430_v43 }
 0x3d0   :  { %v9392_v55 = vsub.f32 %v9316_v49, %v19539_v37 }
 0x3d1   :  { %v8265_v62 = vsub.f32 %v19430_v43, %v8264_v54 }
 0x3d2   :  { %15305 = vmatmul.mubr.f32.gmra.mrb[118].mxu1 %v7135_v11  ;;  %v9322_v11 = vsel %vm4245_vm3, %v13289_v2, 0  ;;  %v9393_v20 = vand.u32 4294901760, %v9392_v55 }
 0x3d3   :  { %15311 = vmatprep.mubr.msk.f32.mxu1 %vm17092_vm4, %v20339_v22  ;;  %v8266_v19 = vand.u32 4294901760, %v8265_v62  ;;  %v9411_v34 = vand.u32 4294901760, %v9322_v11 }
 0x3d4   :  { %v9394_v41 = vsub.f32 %v9392_v55, %v9393_v20 }
 0x3d5   :  { %v9412_v23 = vsub.f32 %v9322_v11, %v9411_v34 }
 0x3d6   :  { %15312 = vmatmul.mubr.f32.vlgmr.msra.gmra.mrb[120].mxu1 %v19252_v6 }
 0x3d7   :  { %16412 = vmatpush3.bf16.msra.mxu1 %v19144_v35  ;;  %15314 = vmatprep.mubr.msk.f32.mxu1 %vm17092_vm4, %v20339_v22  ;;  %v19432_v35 = vsub.f32 %v13284_v46, %v8168_v45  ;;  %v9395_v45 = vand.u32 4294901760, %v9394_v41 }
 0x3d8   :  { %16431 = vmatprep.subr.bf16.mxu1 %v20341_v13 }
 0x3d9   :  { %v8271_v12 = vand.u32 4294901760, %v19432_v35  ;;  %v16438_v7 = vpack.c.bf16 %v19432_v35, %v19430_v43 }
 0x3da   :  { %15315 = vmatmul.mubr.f32.gmra.mrb[122].mxu1 %v19277_v60 }
 0x3db   :  { %15317 = vmatprep.mubr.msk.f32.mxu1 %vm17092_vm4, %v20339_v22  ;;  %v8272_v9 = vsub.f32 %v19432_v35, %v8271_v12  ;;  %v16444_v40 = vpack.c.bf16 %v8271_v12, %v8264_v54  ;;  %v9413_v35 = vand.u32 4294901760, %v9412_v23 }
 0x3dd   :  { %v8273_v63 = vand.u32 4294901760, %v8272_v9  ;;  %v9414_v54 = vsub.f32 %v9412_v23, %v9413_v35 }
 0x3de   :  { %15318 = vmatmul.mubr.f32.gmra.mrb[124].mxu1 %v19299_v15 }
 0x3df   :  { %15324 = vmatprep.mubr.msk.f32.mxu1 %vm17092_vm4, %v20339_v22  ;;  %v16435_v33 = vpack.c.bf16 %v8273_v63, %v8266_v19  ;;  %v9415_v12 = vand.u32 4294901760, %v9414_v54 }
 0x3e2   :  { %15325 = vmatmul.mubr.f32.vlgmr.msra.gmra.mrb[126].mxu1 %v19252_v6  ;;  %v8136_v18 = vpop.f32.mrb[30].mxu0 }
 0x3e3   :  { %v8156_v42 = vsel %vm5367_vm6, %v8136_v18, 0  ;;  %v15404_v44 = vpop.f32.mrb[31].mxu0  ;;  %16433 = vmatpush3.bf16.msra.mxu1 %v19440_v50  ;;  %15327 = vmatprep.mubr.msk.f32.mxu1 %vm17092_vm4, %v20339_v22 }
 0x3e4   :  { %v19458_v1 = vand.u32 4294901760, %v8156_v42  ;;  %16434 = vmatprep.subr.bf16.mxu1 %v20341_v13 }
 0x3e6   :  { %v8232_v31 = vsub.f32 %v8156_v42, %v19458_v1  ;;  %15328 = vmatmul.mubr.f32.gmra.mrb[128].mxu1 %v19277_v60  ;;  %v8142_v53 = vpop.f32.mrb[32].mxu0 }
 0x3e7   :  { %v8159_v6 = vsel %vm5367_vm6, %v8142_v53, 0  ;;  %v15407_v57 = vpop.f32.mrb[33].mxu0  ;;  %15330 = vmatprep.mubr.msk.f32.mxu1 %vm17092_vm4, %v20339_v22 }
 0x3e8   :  { %v8233_v32 = vand.u32 4294901760, %v8232_v31  ;;  %v19469_v58 = vand.u32 4294901760, %v8159_v6 }
 0x3ea   :  { %v8234_v30 = vsub.f32 %v8232_v31, %v8233_v32  ;;  %v8242_v27 = vsub.f32 %v8159_v6, %v19469_v58  ;;  %15331 = vmatmul.mubr.f32.gmra.mrb[130].mxu1 %v19299_v15  ;;  %v8148_v21 = vpop.f32.mrb[34].mxu0  ;;  %v9319_v15 = vsel %vm4245_vm3, %v13288_v5, 0 }
 0x3eb   :  { %v8162_v28 = vsel %vm5367_vm6, %v8148_v21, 0  ;;  %v15410_v51 = vpop.f32.mrb[35].mxu0  ;;  %15415 = vmatprep.mubr.msk.f32.mxu1 %vm17092_vm4, %v20339_v22  ;;  %v19549_v52 = vand.u32 4294901760, %v9319_v15 }
 0x3ec   :  { %v8235_v0 = vand.u32 4294901760, %v8234_v30  ;;  %v8243_v39 = vand.u32 4294901760, %v8242_v27  ;;  %v19476_v25 = vand.u32 4294901760, %v8162_v28 }
 0x3ed   :  { %v9402_v29 = vsub.f32 %v9319_v15, %v19549_v52 }
 0x3ee   :  { %v8252_v60 = vsub.f32 %v8162_v28, %v19476_v25  ;;  %15416 = vmatmul.mubr.f32.vlgmr.msra.gmra.mrb[132].mxu1 %v8235_v0  ;;  %v8244_v59 = vsub.f32 %v8242_v27, %v8243_v39 }
 0x3ef   :  { %16436 = vmatpush3.bf16.msra.mxu1 %v16435_v33  ;;  %15418 = vmatprep.mubr.msk.f32.mxu1 %vm17092_vm4, %v20339_v22  ;;  %v9403_v46 = vand.u32 4294901760, %v9402_v29 }
 0x3f0   :  { %v8253_v47 = vand.u32 4294901760, %v8252_v60  ;;  %v8245_v56 = vand.u32 4294901760, %v8244_v59  ;;  %16437 = vmatprep.subr.bf16.mxu1 %v20341_v13 }
 0x3f1   :  { %v9404_v43 = vsub.f32 %v9402_v29, %v9403_v46 }
 0x3f2   :  { %15419 = vmatmul.mubr.f32.gmra.mrb[134].mxu1 %v8245_v56  ;;  %v8254_v17 = vsub.f32 %v8252_v60, %v8253_v47 }
 0x3f3   :  { %15421 = vmatprep.mubr.msk.f32.mxu1 %vm17092_vm4, %v20339_v22 }
 0x3f4   :  { %v8255_v16 = vand.u32 4294901760, %v8254_v17 }
 0x3f6   :  { %15422 = vmatmul.mubr.f32.gmra.mrb[136].mxu1 %v8255_v16 }
 0x3f7   :  { %15428 = vmatprep.mubr.msk.f32.mxu1 %vm17092_vm4, %v20339_v22 }
 0x3fa   :  { %15429 = vmatmul.mubr.f32.vlgmr.msra.gmra.mrb[138].mxu1 %v19458_v1 }
 0x3fb   :  { %16439 = vmatpush3.bf16.msra.mxu1 %v16438_v7  ;;  %15431 = vmatprep.mubr.msk.f32.mxu1 %vm17092_vm4, %v20339_v22 }
 0x3fc   :  { %16440 = vmatprep.subr.bf16.mxu1 %v20341_v13 }
 0x3fe   :  { %15432 = vmatmul.mubr.f32.gmra.mrb[140].mxu1 %v19469_v58 }
 0x3ff   :  { %15434 = vmatprep.mubr.msk.f32.mxu1 %vm17092_vm4, %v20339_v22 }
 0x402   :  { %15435 = vmatmul.mubr.f32.gmra.mrb[142].mxu1 %v19476_v25 }
 0x403   :  { %15441 = vmatprep.mubr.msk.f32.mxu1 %vm17092_vm4, %v20339_v22 }
 0x406   :  { %15442 = vmatmul.mubr.f32.vlgmr.msra.gmra.mrb[144].mxu1 %v8232_v31 }
 0x407   :  { %16442 = vmatpush3.bf16.msra.mxu1 %v19440_v50  ;;  %15444 = vmatprep.mubr.msk.f32.mxu1 %vm17092_vm4, %v20339_v22 }
 0x408   :  { %16443 = vmatprep.subr.bf16.mxu1 %v20341_v13 }
 0x40a   :  { %15445 = vmatmul.mubr.f32.gmra.mrb[146].mxu1 %v8242_v27 }
 0x40b   :  { %15447 = vmatprep.mubr.msk.f32.mxu1 %vm17092_vm4, %v20339_v22 }
 0x40e   :  { %15448 = vmatmul.mubr.f32.gmra.mrb[148].mxu1 %v8252_v60 }
 0x40f   :  { %15454 = vmatprep.mubr.msk.f32.mxu1 %vm17092_vm4, %v20339_v22 }
 0x412   :  { %15455 = vmatmul.mubr.f32.vlgmr.msra.gmra.mrb[150].mxu1 %v8233_v32 }
 0x413   :  { %16445 = vmatpush3.bf16.msra.mxu1 %v16444_v40  ;;  %15457 = vmatprep.mubr.msk.f32.mxu1 %vm17092_vm4, %v20339_v22 }
 0x414   :  { %16446 = vmatprep.subr.bf16.mxu1 %v20341_v13 }
 0x416   :  { %15458 = vmatmul.mubr.f32.gmra.mrb[152].mxu1 %v8243_v39 }
 0x417   :  { %15460 = vmatprep.mubr.msk.f32.mxu1 %vm17092_vm4, %v20339_v22 }
 0x41a   :  { %15461 = vmatmul.mubr.f32.gmra.mrb[154].mxu1 %v8253_v47 }
 0x41b   :  { %15467 = vmatprep.mubr.msk.f32.mxu1 %vm17092_vm4, %v20339_v22 }
 0x41e   :  { %15468 = vmatmul.mubr.f32.vlgmr.msra.gmra.mrb[156].mxu1 %v19458_v1 }
 0x41f   :  { %16448 = vmatpush3.bf16.msra.mxu1 %v19440_v50  ;;  %15470 = vmatprep.mubr.msk.f32.mxu1 %vm17092_vm4, %v20339_v22  ;;  %v9405_v50 = vand.u32 4294901760, %v9404_v43 }
 0x420   :  { %16467 = vmatprep.subr.bf16.mxu1 %v20341_v13 }
 0x422   :  { %15471 = vmatmul.mubr.f32.gmra.mrb[158].mxu1 %v19469_v58 }
 0x423   :  { %15473 = vmatprep.mubr.msk.f32.mxu1 %vm17092_vm4, %v20339_v22 }
 0x426   :  { %15474 = vmatmul.mubr.f32.gmra.mrb[160].mxu1 %v19476_v25 }
 0x427   :  { %15480 = vmatprep.mubr.msk.f32.mxu1 %vm17092_vm4, %v20339_v22 }
 0x42a   :  { %15481 = vmatmul.mubr.f32.vlgmr.msra.gmra.mrb[162].mxu1 %v19458_v1 }
 0x42b   :  { %16469 = vmatpush3.bf16.msra.mxu1 %v19238_v26  ;;  %15483 = vmatprep.mubr.msk.f32.mxu1 %vm17092_vm4, %v20339_v22 }
 0x42c   :  { %16470 = vmatprep.subr.bf16.mxu1 %v20341_v13 }
 0x42e   :  { %15484 = vmatmul.mubr.f32.gmra.mrb[164].mxu1 %v19469_v58 }
 0x42f   :  { %15486 = vmatprep.mubr.msk.f32.mxu1 %vm17092_vm4, %v20339_v22 }
 0x432   :  { %15487 = vmatmul.mubr.f32.gmra.mrb[166].mxu1 %v19476_v25 }
 0x433   :  { %15571 = vmatprep.mubr.msk.f32.mxu1 %vm17092_vm4, %v20339_v22 }
 0x436   :  { %15572 = vmatmul.mubr.f32.vlgmr.msra.gmra.mrb[168].mxu1 %v9395_v45 }
 0x437   :  { %16472 = vmatpush3.bf16.msra.mxu1 %v19301_v14  ;;  %15574 = vmatprep.mubr.msk.f32.mxu1 %vm17092_vm4, %v20339_v22 }
 0x438   :  { %16473 = vmatprep.subr.bf16.mxu1 %v20341_v13 }
 0x43a   :  { %15575 = vmatmul.mubr.f32.gmra.mrb[170].mxu1 %v9405_v50 }
 0x43b   :  { %15577 = vmatprep.mubr.msk.f32.mxu1 %vm17092_vm4, %v20339_v22 }
 0x43e   :  { %15578 = vmatmul.mubr.f32.gmra.mrb[172].mxu1 %v9415_v12 }
 0x43f   :  { %15584 = vmatprep.mubr.msk.f32.mxu1 %vm17092_vm4, %v20339_v22 }
 0x442   :  { %15585 = vmatmul.mubr.f32.vlgmr.msra.gmra.mrb[168].mxu1 %v19539_v37 }
 0x443   :  { %16475 = vmatpush3.bf16.msra.mxu1 %v19326_v3  ;;  %15587 = vmatprep.mubr.msk.f32.mxu1 %vm17092_vm4, %v20339_v22 }
 0x444   :  { %16476 = vmatprep.subr.bf16.mxu1 %v20341_v13 }
 0x446   :  { %15588 = vmatmul.mubr.f32.gmra.mrb[170].mxu1 %v19549_v52 }
 0x447   :  { %15590 = vmatprep.mubr.msk.f32.mxu1 %vm17092_vm4, %v20339_v22 }
 0x44a   :  { %15591 = vmatmul.mubr.f32.gmra.mrb[172].mxu1 %v9411_v34 }
 0x44b   :  { %15597 = vmatprep.mubr.msk.f32.mxu1 %vm17092_vm4, %v20339_v22 }
 0x44e   :  { %15598 = vmatmul.mubr.f32.vlgmr.msra.gmra.mrb[168].mxu1 %v9392_v55 }
 0x44f   :  { %16478 = vmatpush3.bf16.msra.mxu1 %v19238_v26  ;;  %15600 = vmatprep.mubr.msk.f32.mxu1 %vm17092_vm4, %v20339_v22 }
 0x450   :  { %16479 = vmatprep.subr.bf16.mxu1 %v20341_v13 }
 0x452   :  { %15601 = vmatmul.mubr.f32.gmra.mrb[170].mxu1 %v9402_v29 }
 0x453   :  { %15603 = vmatprep.mubr.msk.f32.mxu1 %vm17092_vm4, %v20339_v22 }
 0x456   :  { %15604 = vmatmul.mubr.f32.gmra.mrb[172].mxu1 %v9412_v23 }
 0x457   :  { %15610 = vmatprep.mubr.msk.f32.mxu1 %vm17092_vm4, %v20339_v22 }
 0x45a   :  { %15611 = vmatmul.mubr.f32.vlgmr.msra.gmra.mrb[168].mxu1 %v9393_v20 }
 0x45b   :  { %16481 = vmatpush3.bf16.msra.mxu1 %v19379_v36  ;;  %15613 = vmatprep.mubr.msk.f32.mxu1 %vm17092_vm4, %v20339_v22 }
 0x45c   :  { %16482 = vmatprep.subr.bf16.mxu1 %v20341_v13 }
 0x45e   :  { %15614 = vmatmul.mubr.f32.gmra.mrb[170].mxu1 %v9403_v46 }
 0x45f   :  { %15616 = vmatprep.mubr.msk.f32.mxu1 %vm17092_vm4, %v20339_v22 }
 0x462   :  { %15617 = vmatmul.mubr.f32.gmra.mrb[172].mxu1 %v9413_v35 }
 0x463   :  { %15623 = vmatprep.mubr.msk.f32.mxu1 %vm17092_vm4, %v20339_v22 }
 0x466   :  { %15624 = vmatmul.mubr.f32.vlgmr.msra.gmra.mrb[168].mxu1 %v19539_v37 }
 0x467   :  { %16484 = vmatpush3.bf16.msra.mxu1 %v19238_v26  ;;  %15626 = vmatprep.mubr.msk.f32.mxu1 %vm17092_vm4, %v20339_v22 }
 0x468   :  { %16488 = vmatprep.subr.bf16.mxu1 %v20341_v13 }
 0x46a   :  { %15627 = vmatmul.mubr.f32.gmra.mrb[170].mxu1 %v19549_v52 }
 0x46b   :  { %15629 = vmatprep.mubr.msk.f32.mxu1 %vm17092_vm4, %v20339_v22 }
 0x46e   :  { %15630 = vmatmul.mubr.f32.gmra.mrb[172].mxu1 %v9411_v34 }
 0x46f   :  { %15636 = vmatprep.mubr.msk.f32.mxu1 %vm17092_vm4, %v20339_v22 }
 0x472   :  { %15637 = vmatmul.mubr.f32.vlgmr.msra.gmra.mrb[168].mxu1 %v19539_v37 }
 0x473   :  { %15639 = vmatprep.mubr.msk.f32.mxu1 %vm17092_vm4, %v20339_v22 }
 0x476   :  { %15640 = vmatmul.mubr.f32.gmra.mrb[170].mxu1 %v19549_v52  ;;  %v19618_v2 = vpop.f32.mrb[36].mxu0 }
 0x477   :  { %15642 = vmatprep.mubr.msk.f32.mxu1 %vm17092_vm4, %v20339_v22  ;;  %v15560_v55 = vpop.f32.mrb[37].mxu0 }
 0x479   :  { %v7119_v18 = vpop.f32.mrb[96].mxu1 }
 0x47a   :  { %v15261_v42 = vpop.f32.mrb[97].mxu1  ;;  %15643 = vmatmul.mubr.f32.gmra.mrb[172].mxu1 %v9411_v34 }
 0x47b   :  { %15662 = vmatprep.mubr.msk.f32.mxu1 %vm17092_vm4, %v20339_v22  ;;  %v19620_v29 = vpop.f32.mrb[38].mxu0 }
 0x47c   :  { %v15563_v34 = vpop.f32.mrb[39].mxu0 }
 0x47d   :  { %v7129_v44 = vpop.f32.mrb[98].mxu1 }
 0x47e   :  { %v15264_v62 = vpop.f32.mrb[99].mxu1 }
 0x47f   :  { %v19622_v45 = vpop.f32.mrb[40].mxu0  ;;  %v13291_v62 = vld [vmem:[%s20201_s6 + $0x18] sm:$0xff] }
 0x480   :  { %v15566_v35 = vpop.f32.mrb[41].mxu0 }
 0x481   :  { %v7139_v9 = vpop.f32.mrb[100].mxu1 }
 0x482   :  { %v15267_v1 = vpop.f32.mrb[101].mxu1 }
 0x485   :  { %v7220_v31 = vpop.f32.mrb[102].mxu1 }
 0x486   :  { %v7221_v53 = vadd.f32 %v7220_v31, %v7119_v18  ;;  %v15274_v6 = vpop.f32.mrb[103].mxu1  ;;  %v9884_v31 = vand.u32 4294901760, %v13291_v62 }
 0x489   :  { %v7226_v57 = vpop.f32.mrb[104].mxu1 }
 0x48a   :  { %v7227_v19 = vadd.f32 %v7226_v57, %v7129_v44  ;;  %v15277_v63 = vpop.f32.mrb[105].mxu1  ;;  %v13290_v44 = vld [vmem:[%s20201_s6 + $0x10] sm:$0xff] }
 0x48d   :  { %v7232_v32 = vpop.f32.mrb[106].mxu1 }
 0x48e   :  { %v7233_v58 = vadd.f32 %v7232_v32, %v7139_v9  ;;  %v15280_v30 = vpop.f32.mrb[107].mxu1 }
 0x491   :  { %v7308_v27 = vpop.f32.mrb[108].mxu1 }
 0x492   :  { %v7309_v21 = vadd.f32 %v7308_v27, %v7221_v53  ;;  %v15287_v28 = vpop.f32.mrb[109].mxu1 }
 0x495   :  { %v7315_v51 = vpop.f32.mrb[110].mxu1 }
 0x496   :  { %v7316_v33 = vadd.f32 %v7315_v51, %v7227_v19  ;;  %v15290_v0 = vpop.f32.mrb[111].mxu1 }
 0x499   :  { %v7322_v39 = vpop.f32.mrb[112].mxu1 }
 0x49a   :  { %v7323_v25 = vadd.f32 %v7322_v39, %v7233_v58  ;;  %v15293_v60 = vpop.f32.mrb[113].mxu1 }
 0x49d   :  { %v7397_v59 = vpop.f32.mrb[114].mxu1 }
 0x49e   :  { %v7398_v47 = vadd.f32 %v7397_v59, %v7309_v21  ;;  %v15300_v56 = vpop.f32.mrb[115].mxu1 }
 0x4a1   :  { %v7405_v17 = vpop.f32.mrb[116].mxu1 }
 0x4a2   :  { %v7406_v16 = vadd.f32 %v7405_v17, %v7316_v33  ;;  %v15303_v7 = vpop.f32.mrb[117].mxu1 }
 0x4a5   :  { %v7413_v4 = vpop.f32.mrb[118].mxu1 }
 0x4a6   :  { %v7414_v10 = vadd.f32 %v7413_v4, %v7323_v25  ;;  %v15306_v8 = vpop.f32.mrb[119].mxu1 }
 0x4a9   :  { %v7490_v40 = vpop.f32.mrb[120].mxu1 }
 0x4aa   :  { %v7491_v38 = vadd.f32 %v7490_v40, %v7398_v47  ;;  %v15313_v49 = vpop.f32.mrb[121].mxu1 }
 0x4ad   :  { %v7496_v5 = vpop.f32.mrb[122].mxu1 }
 0x4ae   :  { %v7497_v37 = vadd.f32 %v7496_v5, %v7406_v16  ;;  %v15316_v15 = vpop.f32.mrb[123].mxu1 }
 0x4b1   :  { %v7502_v52 = vpop.f32.mrb[124].mxu1 }
 0x4b2   :  { %v7503_v11 = vadd.f32 %v7502_v52, %v7414_v10  ;;  %v15319_v20 = vpop.f32.mrb[125].mxu1 }
 0x4b5   :  { %v7575_v41 = vpop.f32.mrb[126].mxu1 }
 0x4b6   :  { %v7576_v46 = vadd.f32 %v7575_v41, %v7491_v38  ;;  %v15326_v23 = vpop.f32.mrb[127].mxu1 }
 0x4b8   :  { %v19625_v43 = vadd.f32 %v7576_v46, %v19194_v24  ;;  %v9881_v24 = vand.u32 4294901760, %v13290_v44 }
 0x4b9   :  { %v7581_v50 = vpop.f32.mrb[128].mxu1 }
 0x4ba   :  { %v7582_v54 = vadd.f32 %v7581_v50, %v7497_v37  ;;  %v15329_v12 = vpop.f32.mrb[129].mxu1  ;;  %v19639_v6 = vsub.f32 %v13290_v44, %v9881_v24  ;;  %v19648_v59 = vpack.c.bf16 %v9884_v31, %v9881_v24 }
 0x4bc   :  { %v19628_v18 = vadd.f32 %v7582_v54, %v19204_v61  ;;  %v19641_v61 = vsub.f32 %v13291_v62, %v9884_v31  ;;  %v9980_v63 = vand.u32 4294901760, %v19639_v6  ;;  %16487 = vmatpush3.bf16.msra.mxu0 %v19648_v59 }
 0x4bd   :  { %v7587_v42 = vpop.f32.mrb[130].mxu1  ;;  %16491 = vmatprep.subr.bf16.mxu0 %v20341_v13 }
 0x4be   :  { %v7588_v9 = vadd.f32 %v7587_v42, %v7503_v11  ;;  %v15332_v1 = vpop.f32.mrb[131].mxu1  ;;  %v9987_v32 = vand.u32 4294901760, %v19641_v61  ;;  %v9981_v58 = vsub.f32 %v19639_v6, %v9980_v63  ;;  %v16492_v16 = vpack.c.bf16 %v19641_v61, %v19639_v6 }
 0x4c0   :  { %v19637_v53 = vadd.f32 %v7588_v9, %v19213_v48  ;;  %v9988_v30 = vsub.f32 %v19641_v61, %v9987_v32  ;;  %v9982_v28 = vand.u32 4294901760, %v9981_v58  ;;  %v19654_v5 = vpack.c.bf16 %v9987_v32, %v9980_v63 }
 0x4c1   :  { %v8237_v57 = vpop.f32.mrb[132].mxu1 }
 0x4c2   :  { %v15417_v19 = vpop.f32.mrb[133].mxu1  ;;  %v9989_v51 = vand.u32 4294901760, %v9988_v30  ;;  %v8718_v30 = vpop.permute.xlu0 %8717 }
 0x4c4   :  { %v16489_v48 = vpack.c.bf16 %v9989_v51, %v9982_v28 }
 0x4c5   :  { %v8247_v27 = vpop.f32.mrb[134].mxu1 }
 0x4c6   :  { %v15420_v21 = vpop.f32.mrb[135].mxu1  ;;  %16490 = vmatpush3.bf16.msra.mxu1 %v16489_v48 }
 0x4c7   :  { %16494 = vmatprep.subr.bf16.mxu1 %v20341_v13 }
 0x4c9   :  { %v8257_v33 = vpop.f32.mrb[136].mxu1 }
 0x4ca   :  { %v15423_v0 = vpop.f32.mrb[137].mxu1 }
 0x4cd   :  { %v8338_v39 = vpop.f32.mrb[138].mxu1 }
 0x4ce   :  { %v8339_v25 = vadd.f32 %v8338_v39, %v8237_v57  ;;  %v15430_v60 = vpop.f32.mrb[139].mxu1 }
 0x4d1   :  { %v8344_v47 = vpop.f32.mrb[140].mxu1 }
 0x4d2   :  { %v8345_v56 = vadd.f32 %v8344_v47, %v8247_v27  ;;  %v15433_v17 = vpop.f32.mrb[141].mxu1 }
 0x4d5   :  { %v8350_v7 = vpop.f32.mrb[142].mxu1 }
 0x4d6   :  { %v8351_v4 = vadd.f32 %v8350_v7, %v8257_v33  ;;  %v15436_v10 = vpop.f32.mrb[143].mxu1  ;;  %v8723_v33 = vpop.permute.xlu1 %8722 }
 0x4d9   :  { %v8426_v8 = vpop.f32.mrb[144].mxu1 }
 0x4da   :  { %v8427_v40 = vadd.f32 %v8426_v8, %v8339_v25  ;;  %v15443_v38 = vpop.f32.mrb[145].mxu1 }
 0x4dd   :  { %v8433_v49 = vpop.f32.mrb[146].mxu1 }
 0x4de   :  { %v8434_v37 = vadd.f32 %v8433_v49, %v8345_v56  ;;  %v15446_v15 = vpop.f32.mrb[147].mxu1 }
 0x4df   :  { %v19677_v15 = vld [vmem:[%s20201_s6] sm:$0xff] }
 0x4e1   :  { %v8440_v55 = vpop.f32.mrb[148].mxu1 }
 0x4e2   :  { %v8441_v52 = vadd.f32 %v8440_v55, %v8351_v4  ;;  %v15449_v11 = vpop.f32.mrb[149].mxu1  ;;  %v19682_v55 = vld [vmem:[%s20201_s6 + $0x8] sm:$0xff] }
 0x4e5   :  { %v8515_v20 = vpop.f32.mrb[150].mxu1 }
 0x4e6   :  { %v8516_v34 = vadd.f32 %v8515_v20, %v8427_v40  ;;  %v15456_v41 = vpop.f32.mrb[151].mxu1 }
 0x4e7   :  { %v10435_v41 = vand.u32 4294901760, %v19677_v15 }
 0x4e9   :  { %v8523_v46 = vpop.f32.mrb[152].mxu1 }
 0x4ea   :  { %v8524_v23 = vadd.f32 %v8523_v46, %v8434_v37  ;;  %v15459_v35 = vpop.f32.mrb[153].mxu1 }
 0x4eb   :  { %v10438_v35 = vand.u32 4294901760, %v19682_v55 }
 0x4ed   :  { %v8531_v50 = vpop.f32.mrb[154].mxu1 }
 0x4ee   :  { %v8532_v54 = vadd.f32 %v8531_v50, %v8441_v52  ;;  %v15462_v12 = vpop.f32.mrb[155].mxu1 }
 0x4f1   :  { %v8608_v42 = vpop.f32.mrb[156].mxu1 }
 0x4f2   :  { %v8609_v44 = vadd.f32 %v8608_v42, %v8516_v34  ;;  %v15469_v62 = vpop.f32.mrb[157].mxu1 }
 0x4f3   :  { %v19703_v62 = vsub.f32 %v19677_v15, %v10435_v41 }
 0x4f5   :  { %v8614_v9 = vpop.f32.mrb[158].mxu1 }
 0x4f6   :  { %v8615_v1 = vadd.f32 %v8614_v9, %v8524_v23  ;;  %v15472_v24 = vpop.f32.mrb[159].mxu1 }
 0x4f9   :  { %v8620_v31 = vpop.f32.mrb[160].mxu1 }
 0x4fa   :  { %v8621_v57 = vadd.f32 %v8620_v31, %v8532_v54  ;;  %v15475_v19 = vpop.f32.mrb[161].mxu1  ;;  %v19708_v31 = vsub.f32 %v19682_v55, %v10438_v35  ;;  %v13294_v55 = vld [vmem:[%s20199_s5 + $0x40] sm:$0x7f] }
 0x4fd   :  { %v8693_v63 = vpop.f32.mrb[162].mxu1 }
 0x4fe   :  { %v8694_v32 = vadd.f32 %v8693_v63, %v8609_v44  ;;  %v15482_v58 = vpop.f32.mrb[163].mxu1 }
 0x4ff   :  { %v10534_v58 = vand.u32 4294901760, %v19703_v62 }
 0x500   :  { %v8709_v27 = vadd.f32 %v8694_v32, %v19625_v43  ;;  %v8728_v43 = vpop.permute.xlu0 %8727 }
 0x501   :  { %v8699_v21 = vpop.f32.mrb[164].mxu1  ;;  %v10535_v61 = vsub.f32 %v19703_v62, %v10534_v58 }
 0x502   :  { %v8730_v28 = vadd.f32 %v8718_v30, %v8709_v27  ;;  %v8700_v51 = vadd.f32 %v8699_v21, %v8615_v1  ;;  %v15485_v48 = vpop.f32.mrb[165].mxu1  ;;  %v10541_v30 = vand.u32 4294901760, %v19708_v31 }
 0x503   :  { %v10536_v21 = vand.u32 4294901760, %v10535_v61  ;;  %v10429_v48 = vsel %vm5367_vm6, %v19620_v29, 0  ;;  %v10432_v29 = vsel %vm5367_vm6, %v19622_v45, 0 }
 0x504   :  { %vm8733_vm8 = vcmp.gt.f32.partialorder %v8730_v28, 0.763  ;;  %v8736_v0 = vmul.f32 -0.051, %v8730_v28  ;;  %v8710_v39 = vadd.f32 %v8700_v51, %v19628_v18  ;;  %v10426_v51 = vsel %vm5367_vm6, %v19618_v2, 0 }
 0x505   :  { %v8705_v25 = vpop.f32.mrb[166].mxu1  ;;  %v16504_v2 = vpack.c.bf16 %v10438_v35, %v10435_v41 }
 0x506   :  { %v8739_v60 = vsel %vm8733_vm8, %v8730_v28, %v8736_v0  ;;  %v8731_v47 = vadd.f32 %v8723_v33, %v8710_v39  ;;  %v8706_v56 = vadd.f32 %v8705_v25, %v8621_v57  ;;  %v15488_v17 = vpop.f32.mrb[167].mxu1  ;;  %v19764_v0 = vand.u32 4294901760, %v10429_v48 }
 0x507   :  { %8743 = vst.msk [vmem:[%s20205_s9] sm:$0xff] %vm8742_vm2, %v8739_v60  ;;  %v19773_v60 = vand.u32 4294901760, %v10432_v29  ;;  %v16510_v17 = vpack.c.bf16 %v19708_v31, %v19703_v62 }
 0x508   :  { %vm8734_vm10 = vcmp.gt.f32.partialorder %v8731_v47, 0.763  ;;  %v8737_v7 = vmul.f32 -0.051, %v8731_v47  ;;  %v8711_v4 = vadd.f32 %v8706_v56, %v19637_v53  ;;  %v10512_v25 = vsub.f32 %v10429_v48, %v19764_v0 }
 0x509   :  { %v10522_v56 = vsub.f32 %v10432_v29, %v19773_v60 }
 0x50a   :  { %v8740_v10 = vsel %vm8734_vm10, %v8731_v47, %v8737_v7  ;;  %v8732_v8 = vadd.f32 %v8728_v43, %v8711_v4  ;;  %v10513_v47 = vand.u32 4294901760, %v10512_v25 }
 0x50b   :  { %8744 = vst.msk [vmem:[%s20205_s9 + $0x8] sm:$0xff] %vm8742_vm2, %v8740_v10  ;;  %v10523_v7 = vand.u32 4294901760, %v10522_v56 }
 0x50c   :  { %vm8735_vm12 = vcmp.gt.f32.partialorder %v8732_v8, 0.763  ;;  %v8738_v18 = vmul.f32 -0.051, %v8732_v8  ;;  %v10514_v4 = vsub.f32 %v10512_v25, %v10513_v47 }
 0x50e   :  { %v8741_v40 = vsel %vm8735_vm12, %v8732_v8, %v8738_v18  ;;  %v10515_v10 = vand.u32 4294901760, %v10514_v4  ;;  %v10524_v8 = vsub.f32 %v10522_v56, %v10523_v7 }
 0x50f   :  { %8746 = vst.msk [vmem:[%s20205_s9 + $0x10] sm:$0x7f] %vm8745_vm11, %v8741_v40  ;;  %v16516_v40 = vpack.c.bf16 %v10541_v30, %v10534_v58 }
 0x510   :  { %v10525_v18 = vand.u32 4294901760, %v10524_v8 }
 0x545   :  { %v9853_v38 = vpop.f32.mrb[168].mxu1 }
 0x546   :  { %v9872_v49 = vsel %vm5367_vm6, %v9853_v38, 0  ;;  %v15638_v53 = vpop.f32.mrb[169].mxu1  ;;  %v13292_v38 = vld [vmem:[%s20199_s5 + $0x30] sm:$0xff] }
 0x547   :  { %v19672_v37 = vand.u32 4294901760, %v9872_v49  ;;  %v13293_v53 = vld [vmem:[%s20199_s5 + $0x38] sm:$0xff] }
 0x548   :  { %v10986_v15 = vsel %vm4245_vm3, %v13293_v53, 0  ;;  %v13296_v53 = vld [vmem:[%s20201_s6 + $0x28] sm:$0xff] }
 0x549   :  { %v9948_v52 = vsub.f32 %v9872_v49, %v19672_v37  ;;  %v9859_v11 = vpop.f32.mrb[170].mxu1  ;;  %15663 = vmatmul.mubr.f32.vlgmr.msra.gmra.mrb[174].mxu1 %v19672_v37  ;;  %v10983_v49 = vsel %vm4245_vm3, %v13292_v38, 0 }
 0x54a   :  { %v9875_v20 = vsel %vm5367_vm6, %v9859_v11, 0  ;;  %v15641_v34 = vpop.f32.mrb[171].mxu1  ;;  %15665 = vmatprep.mubr.msk.f32.mxu1 %vm17092_vm4, %v20339_v22  ;;  %16496 = vmatpush3.bf16.msra.mxu1 %v19648_v59  ;;  %v19838_v11 = vand.u32 4294901760, %v10986_v15 }
 0x54b   :  { %v9949_v46 = vand.u32 4294901760, %v9948_v52  ;;  %v19691_v23 = vand.u32 4294901760, %v9875_v20  ;;  %16500 = vmatprep.subr.bf16.mxu1 %v20341_v13 }
 0x54c   :  { %v11069_v41 = vsub.f32 %v10986_v15, %v19838_v11 }
 0x54d   :  { %v9950_v50 = vsub.f32 %v9948_v52, %v9949_v46  ;;  %v9958_v54 = vsub.f32 %v9875_v20, %v19691_v23  ;;  %v9865_v12 = vpop.f32.mrb[172].mxu1  ;;  %15666 = vmatmul.mubr.f32.gmra.mrb[176].mxu1 %v19691_v23  ;;  %v10989_v20 = vsel %vm4245_vm3, %v13294_v55, 0 }
 0x54e   :  { %v9878_v42 = vsel %vm5367_vm6, %v9865_v12, 0  ;;  %v15644_v44 = vpop.f32.mrb[173].mxu1  ;;  %15668 = vmatprep.mubr.msk.f32.mxu1 %vm17092_vm4, %v20339_v22  ;;  %v11070_v35 = vand.u32 4294901760, %v11069_v41 }
 0x54f   :  { %v9951_v9 = vand.u32 4294901760, %v9950_v50  ;;  %v9959_v1 = vand.u32 4294901760, %v9958_v54  ;;  %v19705_v24 = vand.u32 4294901760, %v9878_v42 }
 0x550   :  { %v11071_v12 = vsub.f32 %v11069_v41, %v11070_v35 }
 0x551   :  { %v9968_v57 = vsub.f32 %v9878_v42, %v19705_v24  ;;  %15650 = vmatmul.mubr.f32.vlgmr.msra.gmra.mrb[42].mxu0 %v9951_v9  ;;  %15669 = vmatmul.mubr.f32.gmra.mrb[178].mxu1 %v19705_v24  ;;  %v9960_v19 = vsub.f32 %v9958_v54, %v9959_v1 }
 0x552   :  { %16493 = vmatpush3.bf16.msra.mxu0 %v16492_v16  ;;  %15652 = vmatprep.mubr.msk.f32.mxu0 %vm17092_vm4, %v20339_v22  ;;  %v10542_v16 = vsub.f32 %v19708_v31, %v10541_v30  ;;  %v11072_v44 = vand.u32 4294901760, %v11071_v12  ;;  %v13298_v31 = vld [vmem:[%s20199_s5 + $0x50] sm:$0xff] }
 0x553   :  { %v9969_v63 = vand.u32 4294901760, %v9968_v57  ;;  %15688 = vmatprep.mubr.msk.f32.mxu1 %vm17092_vm4, %v20339_v22  ;;  %v9961_v32 = vand.u32 4294901760, %v9960_v19  ;;  %16497 = vmatprep.subr.bf16.mxu0 %v20341_v13  ;;  %v12102_v19 = vsel %vm4245_vm3, %v13298_v31, 0 }
 0x554   :  { %v19921_v58 = vand.u32 4294901760, %v12102_v19 }
 0x555   :  { %15653 = vmatmul.mubr.f32.gmra.mrb[44].mxu0 %v9961_v32  ;;  %15689 = vmatmul.mubr.f32.vlgmr.msra.gmra.mrb[180].mxu1 %v9949_v46  ;;  %v9970_v27 = vsub.f32 %v9968_v57, %v9969_v63  ;;  %v19848_v46 = vand.u32 4294901760, %v10989_v20 }
 0x556   :  { %15655 = vmatprep.mubr.msk.f32.mxu0 %vm17092_vm4, %v20339_v22  ;;  %15691 = vmatprep.mubr.msk.f32.mxu1 %vm17092_vm4, %v20339_v22 }
 0x557   :  { %v9971_v6 = vand.u32 4294901760, %v9970_v27  ;;  %16502 = vmatpush3.bf16.msra.mxu1 %v19648_v59  ;;  %v10543_v59 = vand.u32 4294901760, %v10542_v16  ;;  %v11079_v50 = vsub.f32 %v10989_v20, %v19848_v46 }
 0x558   :  { %16506 = vmatprep.subr.bf16.mxu1 %v20341_v13 }
 0x559   :  { %15656 = vmatmul.mubr.f32.gmra.mrb[46].mxu0 %v9971_v6  ;;  %15692 = vmatmul.mubr.f32.gmra.mrb[182].mxu1 %v9959_v1  ;;  %v16507_v28 = vpack.c.bf16 %v10543_v59, %v10536_v21  ;;  %v11080_v42 = vand.u32 4294901760, %v11079_v50  ;;  %v13297_v1 = vld [vmem:[%s20199_s5 + $0x48] sm:$0xff]  ;;  %v12185_v6 = vsub.f32 %v12102_v19, %v19921_v58 }
 0x55a   :  { %15675 = vmatprep.mubr.msk.f32.mxu0 %vm17092_vm4, %v20339_v22  ;;  %15694 = vmatprep.mubr.msk.f32.mxu1 %vm17092_vm4, %v20339_v22 }
 0x55b   :  { %v11081_v62 = vsub.f32 %v11079_v50, %v11080_v42  ;;  %v12186_v21 = vand.u32 4294901760, %v12185_v6 }
 0x55d   :  { %15676 = vmatmul.mubr.f32.vlgmr.msra.gmra.mrb[48].mxu0 %v9948_v52  ;;  %15695 = vmatmul.mubr.f32.gmra.mrb[184].mxu1 %v9969_v63  ;;  %v11082_v9 = vand.u32 4294901760, %v11081_v62  ;;  %v13299_v63 = vld [vmem:[%s20199_s5 + $0x58] sm:$0x7f] }
 0x55e   :  { %16499 = vmatpush3.bf16.msra.mxu0 %v19654_v5  ;;  %15678 = vmatprep.mubr.msk.f32.mxu0 %vm17092_vm4, %v20339_v22  ;;  %v19751_v5 = vand.u32 4294901760, %v10426_v51  ;;  %v12105_v30 = vsel %vm4245_vm3, %v13299_v63, 0 }
 0x55f   :  { %15714 = vmatprep.mubr.msk.f32.mxu1 %vm17092_vm4, %v20339_v22  ;;  %16503 = vmatprep.subr.bf16.mxu0 %v20341_v13  ;;  %v19928_v61 = vand.u32 4294901760, %v12105_v30 }
 0x560   :  { %v10502_v33 = vsub.f32 %v10426_v51, %v19751_v5  ;;  %v12187_v51 = vsub.f32 %v12185_v6, %v12186_v21 }
 0x561   :  { %15679 = vmatmul.mubr.f32.gmra.mrb[50].mxu0 %v9958_v54  ;;  %15715 = vmatmul.mubr.f32.vlgmr.msra.gmra.mrb[186].mxu1 %v19672_v37  ;;  %v12195_v59 = vsub.f32 %v12105_v30, %v19928_v61 }
 0x562   :  { %15681 = vmatprep.mubr.msk.f32.mxu0 %vm17092_vm4, %v20339_v22  ;;  %15717 = vmatprep.mubr.msk.f32.mxu1 %vm17092_vm4, %v20339_v22  ;;  %v10503_v39 = vand.u32 4294901760, %v10502_v33  ;;  %v12188_v48 = vand.u32 4294901760, %v12187_v51 }
 0x563   :  { %16508 = vmatpush3.bf16.msra.mxu1 %v16507_v28 }
 0x564   :  { %16512 = vmatprep.subr.bf16.mxu1 %v20341_v13  ;;  %v10504_v45 = vsub.f32 %v10502_v33, %v10503_v39 }
 0x565   :  { %15682 = vmatmul.mubr.f32.gmra.mrb[52].mxu0 %v9968_v57  ;;  %15718 = vmatmul.mubr.f32.gmra.mrb[188].mxu1 %v19691_v23 }
 0x566   :  { %15701 = vmatprep.mubr.msk.f32.mxu0 %vm17092_vm4, %v20339_v22  ;;  %15720 = vmatprep.mubr.msk.f32.mxu1 %vm17092_vm4, %v20339_v22  ;;  %v10505_v43 = vand.u32 4294901760, %v10504_v45 }
 0x569   :  { %15702 = vmatmul.mubr.f32.vlgmr.msra.gmra.mrb[54].mxu0 %v19672_v37  ;;  %15721 = vmatmul.mubr.f32.gmra.mrb[190].mxu1 %v19705_v24  ;;  %v19826_v37 = vand.u32 4294901760, %v10983_v49 }
 0x56a   :  { %16505 = vmatpush3.bf16.msra.mxu0 %v16504_v2  ;;  %15704 = vmatprep.mubr.msk.f32.mxu0 %vm17092_vm4, %v20339_v22 }
 0x56b   :  { %15740 = vmatprep.mubr.msk.f32.mxu1 %vm17092_vm4, %v20339_v22  ;;  %16509 = vmatprep.subr.bf16.mxu0 %v20341_v13  ;;  %v11059_v52 = vsub.f32 %v10983_v49, %v19826_v37  ;;  %v13295_v49 = vld [vmem:[%s20201_s6 + $0x20] sm:$0xff] }
 0x56d   :  { %15705 = vmatmul.mubr.f32.gmra.mrb[56].mxu0 %v19691_v23  ;;  %15741 = vmatmul.mubr.f32.vlgmr.msra.gmra.mrb[192].mxu1 %v19751_v5  ;;  %v11060_v34 = vand.u32 4294901760, %v11059_v52 }
 0x56e   :  { %15707 = vmatprep.mubr.msk.f32.mxu0 %vm17092_vm4, %v20339_v22  ;;  %15743 = vmatprep.mubr.msk.f32.mxu1 %vm17092_vm4, %v20339_v22 }
 0x56f   :  { %16514 = vmatpush3.bf16.msra.mxu1 %v16504_v2  ;;  %v11061_v23 = vsub.f32 %v11059_v52, %v11060_v34 }
 0x570   :  { %16518 = vmatprep.subr.bf16.mxu1 %v20341_v13 }
 0x571   :  { %15708 = vmatmul.mubr.f32.gmra.mrb[58].mxu0 %v19705_v24  ;;  %15744 = vmatmul.mubr.f32.gmra.mrb[194].mxu1 %v19764_v0  ;;  %v11062_v54 = vand.u32 4294901760, %v11061_v23  ;;  %v12099_v24 = vsel %vm4245_vm3, %v13297_v1, 0 }
 0x572   :  { %15727 = vmatprep.mubr.msk.f32.mxu0 %vm17092_vm4, %v20339_v22  ;;  %15746 = vmatprep.mubr.msk.f32.mxu1 %vm17092_vm4, %v20339_v22  ;;  %v19911_v57 = vand.u32 4294901760, %v12099_v24 }
 0x574   :  { %v12175_v32 = vsub.f32 %v12099_v24, %v19911_v57 }
 0x575   :  { %15728 = vmatmul.mubr.f32.vlgmr.msra.gmra.mrb[60].mxu0 %v10505_v43  ;;  %15747 = vmatmul.mubr.f32.gmra.mrb[196].mxu1 %v19773_v60 }
 0x576   :  { %16511 = vmatpush3.bf16.msra.mxu0 %v16510_v17  ;;  %15730 = vmatprep.mubr.msk.f32.mxu0 %vm17092_vm4, %v20339_v22  ;;  %v12176_v27 = vand.u32 4294901760, %v12175_v32 }
 0x577   :  { %15766 = vmatprep.mubr.msk.f32.mxu1 %vm17092_vm4, %v20339_v22  ;;  %16515 = vmatprep.subr.bf16.mxu0 %v20341_v13 }
 0x578   :  { %v12177_v16 = vsub.f32 %v12175_v32, %v12176_v27 }
 0x579   :  { %15731 = vmatmul.mubr.f32.gmra.mrb[62].mxu0 %v10515_v10  ;;  %15767 = vmatmul.mubr.f32.vlgmr.msra.gmra.mrb[198].mxu1 %v10503_v39 }
 0x57a   :  { %15733 = vmatprep.mubr.msk.f32.mxu0 %vm17092_vm4, %v20339_v22  ;;  %15769 = vmatprep.mubr.msk.f32.mxu1 %vm17092_vm4, %v20339_v22  ;;  %v12178_v28 = vand.u32 4294901760, %v12177_v16 }
 0x57b   :  { %16520 = vmatpush3.bf16.msra.mxu1 %v16504_v2 }
 0x57c   :  { %16539 = vmatprep.subr.bf16.mxu1 %v20341_v13 }
 0x57d   :  { %15734 = vmatmul.mubr.f32.gmra.mrb[64].mxu0 %v10525_v18  ;;  %15770 = vmatmul.mubr.f32.gmra.mrb[200].mxu1 %v10513_v47 }
 0x57e   :  { %15753 = vmatprep.mubr.msk.f32.mxu0 %vm17092_vm4, %v20339_v22  ;;  %15772 = vmatprep.mubr.msk.f32.mxu1 %vm17092_vm4, %v20339_v22 }
 0x581   :  { %15754 = vmatmul.mubr.f32.vlgmr.msra.gmra.mrb[66].mxu0 %v10502_v33  ;;  %15773 = vmatmul.mubr.f32.gmra.mrb[202].mxu1 %v10523_v7 }
 0x582   :  { %16517 = vmatpush3.bf16.msra.mxu0 %v16516_v40  ;;  %15756 = vmatprep.mubr.msk.f32.mxu0 %vm17092_vm4, %v20339_v22 }
 0x583   :  { %15792 = vmatprep.mubr.msk.f32.mxu1 %vm17092_vm4, %v20339_v22  ;;  %16521 = vmatprep.subr.bf16.mxu0 %v20341_v13 }
 0x585   :  { %15757 = vmatmul.mubr.f32.gmra.mrb[68].mxu0 %v10512_v25  ;;  %15793 = vmatmul.mubr.f32.vlgmr.msra.gmra.mrb[204].mxu1 %v19751_v5 }
 0x586   :  { %15759 = vmatprep.mubr.msk.f32.mxu0 %vm17092_vm4, %v20339_v22  ;;  %15795 = vmatprep.mubr.msk.f32.mxu1 %vm17092_vm4, %v20339_v22 }
 0x589   :  { %15760 = vmatmul.mubr.f32.gmra.mrb[70].mxu0 %v10522_v56  ;;  %15796 = vmatmul.mubr.f32.gmra.mrb[206].mxu1 %v19764_v0 }
 0x58a   :  { %15779 = vmatprep.mubr.msk.f32.mxu0 %vm17092_vm4, %v20339_v22  ;;  %15798 = vmatprep.mubr.msk.f32.mxu1 %vm17092_vm4, %v20339_v22 }
 0x58d   :  { %15780 = vmatmul.mubr.f32.vlgmr.msra.gmra.mrb[72].mxu0 %v19751_v5  ;;  %15799 = vmatmul.mubr.f32.gmra.mrb[208].mxu1 %v19773_v60  ;;  %v12196_v5 = vand.u32 4294901760, %v12195_v59 }
 0x58e   :  { %16523 = vmatpush3.bf16.msra.mxu0 %v19238_v26  ;;  %15782 = vmatprep.mubr.msk.f32.mxu0 %vm17092_vm4, %v20339_v22 }
 0x58f   :  { %16524 = vmatprep.subr.bf16.mxu0 %v20341_v13  ;;  %15883 = vmatprep.mubr.msk.f32.mxu1 %vm17092_vm4, %v20339_v22  ;;  %v12197_v2 = vsub.f32 %v12195_v59, %v12196_v5 }
 0x591   :  { %15783 = vmatmul.mubr.f32.gmra.mrb[74].mxu0 %v19764_v0  ;;  %v12198_v33 = vand.u32 4294901760, %v12197_v2 }
 0x592   :  { %15785 = vmatprep.mubr.msk.f32.mxu0 %vm17092_vm4, %v20339_v22 }
 0x595   :  { %15786 = vmatmul.mubr.f32.gmra.mrb[76].mxu0 %v19773_v60 }
 0x596   :  { %15805 = vmatprep.mubr.msk.f32.mxu0 %vm17092_vm4, %v20339_v22 }
 0x599   :  { %15806 = vmatmul.mubr.f32.vlgmr.msra.gmra.mrb[78].mxu0 %v11062_v54 }
 0x59a   :  { %16526 = vmatpush3.bf16.msra.mxu0 %v19301_v14  ;;  %15808 = vmatprep.mubr.msk.f32.mxu0 %vm17092_vm4, %v20339_v22 }
 0x59b   :  { %16527 = vmatprep.subr.bf16.mxu0 %v20341_v13 }
 0x59d   :  { %15809 = vmatmul.mubr.f32.gmra.mrb[80].mxu0 %v11072_v44 }
 0x59e   :  { %15811 = vmatprep.mubr.msk.f32.mxu0 %vm17092_vm4, %v20339_v22 }
 0x5a1   :  { %15812 = vmatmul.mubr.f32.gmra.mrb[82].mxu0 %v11082_v9 }
 0x5a2   :  { %15818 = vmatprep.mubr.msk.f32.mxu0 %vm17092_vm4, %v20339_v22 }
 0x5a5   :  { %15819 = vmatmul.mubr.f32.vlgmr.msra.gmra.mrb[78].mxu0 %v19826_v37 }
 0x5a6   :  { %16529 = vmatpush3.bf16.msra.mxu0 %v19326_v3  ;;  %15821 = vmatprep.mubr.msk.f32.mxu0 %vm17092_vm4, %v20339_v22 }
 0x5a7   :  { %16530 = vmatprep.subr.bf16.mxu0 %v20341_v13 }
 0x5a9   :  { %15822 = vmatmul.mubr.f32.gmra.mrb[80].mxu0 %v19838_v11 }
 0x5aa   :  { %15824 = vmatprep.mubr.msk.f32.mxu0 %vm17092_vm4, %v20339_v22 }
 0x5ad   :  { %15825 = vmatmul.mubr.f32.gmra.mrb[82].mxu0 %v19848_v46 }
 0x5ae   :  { %15831 = vmatprep.mubr.msk.f32.mxu0 %vm17092_vm4, %v20339_v22 }
 0x5b1   :  { %15832 = vmatmul.mubr.f32.vlgmr.msra.gmra.mrb[78].mxu0 %v11059_v52  ;;  %v11548_v52 = vand.u32 4294901760, %v13295_v49 }
 0x5b2   :  { %16532 = vmatpush3.bf16.msra.mxu0 %v19238_v26  ;;  %15834 = vmatprep.mubr.msk.f32.mxu0 %vm17092_vm4, %v20339_v22 }
 0x5b3   :  { %16533 = vmatprep.subr.bf16.mxu0 %v20341_v13 }
 0x5b5   :  { %15835 = vmatmul.mubr.f32.gmra.mrb[80].mxu0 %v11069_v41  ;;  %v20001_v41 = vsub.f32 %v13295_v49, %v11548_v52 }
 0x5b6   :  { %15837 = vmatprep.mubr.msk.f32.mxu0 %vm17092_vm4, %v20339_v22 }
 0x5b9   :  { %15838 = vmatmul.mubr.f32.gmra.mrb[82].mxu0 %v11079_v50 }
 0x5ba   :  { %15844 = vmatprep.mubr.msk.f32.mxu0 %vm17092_vm4, %v20339_v22 }
 0x5bd   :  { %15845 = vmatmul.mubr.f32.vlgmr.msra.gmra.mrb[78].mxu0 %v11060_v34 }
 0x5be   :  { %16535 = vmatpush3.bf16.msra.mxu0 %v19379_v36  ;;  %15847 = vmatprep.mubr.msk.f32.mxu0 %vm17092_vm4, %v20339_v22 }
 0x5bf   :  { %16536 = vmatprep.subr.bf16.mxu0 %v20341_v13 }
 0x5c1   :  { %15848 = vmatmul.mubr.f32.gmra.mrb[80].mxu0 %v11070_v35 }
 0x5c2   :  { %15850 = vmatprep.mubr.msk.f32.mxu0 %vm17092_vm4, %v20339_v22 }
 0x5c5   :  { %15851 = vmatmul.mubr.f32.gmra.mrb[82].mxu0 %v11080_v42  ;;  %v11647_v42 = vand.u32 4294901760, %v20001_v41 }
 0x5c6   :  { %15857 = vmatprep.mubr.msk.f32.mxu0 %vm17092_vm4, %v20339_v22 }
 0x5c7   :  { %v11648_v24 = vsub.f32 %v20001_v41, %v11647_v42 }
 0x5c9   :  { %15858 = vmatmul.mubr.f32.vlgmr.msra.gmra.mrb[78].mxu0 %v19826_v37 }
 0x5ca   :  { %16538 = vmatpush3.bf16.msra.mxu0 %v19238_v26  ;;  %15860 = vmatprep.mubr.msk.f32.mxu0 %vm17092_vm4, %v20339_v22 }
 0x5cb   :  { %16557 = vmatprep.subr.bf16.mxu0 %v20341_v13 }
 0x5cd   :  { %15861 = vmatmul.mubr.f32.gmra.mrb[80].mxu0 %v19838_v11 }
 0x5ce   :  { %15863 = vmatprep.mubr.msk.f32.mxu0 %vm17092_vm4, %v20339_v22 }
 0x5d1   :  { %15864 = vmatmul.mubr.f32.gmra.mrb[82].mxu0 %v19848_v46 }
 0x5d2   :  { %15870 = vmatprep.mubr.msk.f32.mxu0 %vm17092_vm4, %v20339_v22 }
 0x5d5   :  { %15871 = vmatmul.mubr.f32.vlgmr.msra.gmra.mrb[78].mxu0 %v19826_v37 }
 0x5d6   :  { %16559 = vmatpush3.bf16.msra.mxu0 %v19238_v26  ;;  %15873 = vmatprep.mubr.msk.f32.mxu0 %vm17092_vm4, %v20339_v22 }
 0x5d7   :  { %16560 = vmatprep.subr.bf16.mxu0 %v20341_v13 }
 0x5d9   :  { %15874 = vmatmul.mubr.f32.gmra.mrb[80].mxu0 %v19838_v11  ;;  %v11551_v11 = vand.u32 4294901760, %v13296_v53 }
 0x5da   :  { %15876 = vmatprep.mubr.msk.f32.mxu0 %vm17092_vm4, %v20339_v22 }
 0x5db   :  { %v19999_v34 = vpack.c.bf16 %v11551_v11, %v11548_v52 }
 0x5dd   :  { %15877 = vmatmul.mubr.f32.gmra.mrb[82].mxu0 %v19848_v46  ;;  %v20003_v46 = vsub.f32 %v13296_v53, %v11551_v11  ;;  %16541 = vmatpush3.bf16.msra.mxu1 %v19999_v34 }
 0x5de   :  { %15961 = vmatprep.mubr.msk.f32.mxu0 %vm17092_vm4, %v20339_v22  ;;  %16542 = vmatprep.subr.bf16.mxu1 %v20341_v13 }
 0x5df   :  { %v11654_v44 = vand.u32 4294901760, %v20003_v46 }
 0x5e1   :  { %15962 = vmatmul.mubr.f32.vlgmr.msra.gmra.mrb[84].mxu0 %v12178_v28  ;;  %v11655_v31 = vsub.f32 %v20003_v46, %v11654_v44 }
 0x5e2   :  { %16562 = vmatpush3.bf16.msra.mxu0 %v19301_v14  ;;  %15964 = vmatprep.mubr.msk.f32.mxu0 %vm17092_vm4, %v20339_v22 }
 0x5e3   :  { %16563 = vmatprep.subr.bf16.mxu0 %v20341_v13 }
 0x5e5   :  { %15965 = vmatmul.mubr.f32.gmra.mrb[86].mxu0 %v12188_v48  ;;  %v16546_v48 = vpack.c.bf16 %v20003_v46, %v20001_v41  ;;  %v13300_v41 = vld [vmem:[%s20201_s6 + $0x30] sm:$0xff]  ;;  %v13301_v46 = vld [vmem:[%s20201_s6 + $0x38] sm:$0xff] }
 0x5e6   :  { %15967 = vmatprep.mubr.msk.f32.mxu0 %vm17092_vm4, %v20339_v22 }
 0x5e9   :  { %15968 = vmatmul.mubr.f32.gmra.mrb[88].mxu0 %v12198_v33 }
 0x5ea   :  { %15974 = vmatprep.mubr.msk.f32.mxu0 %vm17092_vm4, %v20339_v22 }
 0x5ed   :  { %15975 = vmatmul.mubr.f32.vlgmr.msra.gmra.mrb[84].mxu0 %v19911_v57 }
 0x5ee   :  { %16565 = vmatpush3.bf16.msra.mxu0 %v19326_v3  ;;  %15977 = vmatprep.mubr.msk.f32.mxu0 %vm17092_vm4, %v20339_v22 }
 0x5ef   :  { %16566 = vmatprep.subr.bf16.mxu0 %v20341_v13 }
 0x5f1   :  { %15978 = vmatmul.mubr.f32.gmra.mrb[86].mxu0 %v19921_v58 }
 0x5f2   :  { %15980 = vmatprep.mubr.msk.f32.mxu0 %vm17092_vm4, %v20339_v22 }
 0x5f5   :  { %15981 = vmatmul.mubr.f32.gmra.mrb[88].mxu0 %v19928_v61 }
 0x5f6   :  { %15987 = vmatprep.mubr.msk.f32.mxu0 %vm17092_vm4, %v20339_v22 }
 0x5f9   :  { %15988 = vmatmul.mubr.f32.vlgmr.msra.gmra.mrb[84].mxu0 %v12175_v32  ;;  %v11649_v32 = vand.u32 4294901760, %v11648_v24 }
 0x5fa   :  { %16568 = vmatpush3.bf16.msra.mxu0 %v19238_v26  ;;  %15990 = vmatprep.mubr.msk.f32.mxu0 %vm17092_vm4, %v20339_v22 }
 0x5fb   :  { %16569 = vmatprep.subr.bf16.mxu0 %v20341_v13 }
 0x5fd   :  { %15991 = vmatmul.mubr.f32.gmra.mrb[86].mxu0 %v12185_v6 }
 0x5fe   :  { %15993 = vmatprep.mubr.msk.f32.mxu0 %vm17092_vm4, %v20339_v22 }
 0x601   :  { %15994 = vmatmul.mubr.f32.gmra.mrb[88].mxu0 %v12195_v59 }
 0x602   :  { %16000 = vmatprep.mubr.msk.f32.mxu0 %vm17092_vm4, %v20339_v22 }
 0x605   :  { %16001 = vmatmul.mubr.f32.vlgmr.msra.gmra.mrb[84].mxu0 %v12176_v27 }
 0x606   :  { %16571 = vmatpush3.bf16.msra.mxu0 %v19379_v36  ;;  %16003 = vmatprep.mubr.msk.f32.mxu0 %vm17092_vm4, %v20339_v22 }
 0x607   :  { %16572 = vmatprep.subr.bf16.mxu0 %v20341_v13 }
 0x609   :  { %16004 = vmatmul.mubr.f32.gmra.mrb[86].mxu0 %v12186_v21 }
 0x60a   :  { %16006 = vmatprep.mubr.msk.f32.mxu0 %vm17092_vm4, %v20339_v22 }
 0x60d   :  { %16007 = vmatmul.mubr.f32.gmra.mrb[88].mxu0 %v12196_v5 }
 0x60e   :  { %16013 = vmatprep.mubr.msk.f32.mxu0 %vm17092_vm4, %v20339_v22 }
 0x611   :  { %16014 = vmatmul.mubr.f32.vlgmr.msra.gmra.mrb[84].mxu0 %v19911_v57 }
 0x612   :  { %16574 = vmatpush3.bf16.msra.mxu0 %v19238_v26  ;;  %16016 = vmatprep.mubr.msk.f32.mxu0 %vm17092_vm4, %v20339_v22 }
 0x615   :  { %16017 = vmatmul.mubr.f32.gmra.mrb[86].mxu0 %v19921_v58 }
 0x616   :  { %16019 = vmatprep.mubr.msk.f32.mxu0 %vm17092_vm4, %v20339_v22 }
 0x619   :  { %16020 = vmatmul.mubr.f32.gmra.mrb[88].mxu0 %v19928_v61 }
 0x61a   :  { %16026 = vmatprep.mubr.msk.f32.mxu0 %vm17092_vm4, %v20339_v22 }
 0x61c   :  { %v10054_v14 = vpop.f32.mrb[174].mxu1 }
 0x61d   :  { %v15664_v3 = vpop.f32.mrb[175].mxu1  ;;  %16027 = vmatmul.mubr.f32.vlgmr.msra.gmra.mrb[84].mxu0 %v19911_v57 }
 0x61e   :  { %16029 = vmatprep.mubr.msk.f32.mxu0 %vm17092_vm4, %v20339_v22 }
 0x620   :  { %v10060_v26 = vpop.f32.mrb[176].mxu1 }
 0x621   :  { %v15667_v36 = vpop.f32.mrb[177].mxu1  ;;  %16030 = vmatmul.mubr.f32.gmra.mrb[86].mxu0 %v19921_v58  ;;  %v11656_v58 = vand.u32 4294901760, %v11655_v31 }
 0x622   :  { %16032 = vmatprep.mubr.msk.f32.mxu0 %vm17092_vm4, %v20339_v22 }
 0x624   :  { %v9953_v0 = vpop.f32.mrb[42].mxu0  ;;  %v10066_v29 = vpop.f32.mrb[178].mxu1 }
 0x625   :  { %v10055_v39 = vadd.f32 %v10054_v14, %v9953_v0  ;;  %v15651_v25 = vpop.f32.mrb[43].mxu0  ;;  %v15670_v60 = vpop.f32.mrb[179].mxu1  ;;  %16033 = vmatmul.mubr.f32.gmra.mrb[88].mxu0 %v19928_v61  ;;  %v20011_v61 = vpack.c.bf16 %v11656_v58, %v11649_v32 }
 0x628   :  { %v9963_v45 = vpop.f32.mrb[44].mxu0  ;;  %v10231_v47 = vpop.f32.mrb[180].mxu1 }
 0x629   :  { %v10061_v56 = vadd.f32 %v10060_v26, %v9963_v45  ;;  %v15654_v17 = vpop.f32.mrb[45].mxu0  ;;  %v15690_v43 = vpop.f32.mrb[181].mxu1 }
 0x62c   :  { %v9973_v7 = vpop.f32.mrb[46].mxu0  ;;  %v10239_v4 = vpop.f32.mrb[182].mxu1 }
 0x62d   :  { %v10067_v10 = vadd.f32 %v10066_v29, %v9973_v7  ;;  %v15657_v8 = vpop.f32.mrb[47].mxu0  ;;  %v15693_v18 = vpop.f32.mrb[183].mxu1 }
 0x630   :  { %v10142_v40 = vpop.f32.mrb[48].mxu0  ;;  %v10247_v38 = vpop.f32.mrb[184].mxu1 }
 0x631   :  { %v10143_v37 = vadd.f32 %v10142_v40, %v10055_v39  ;;  %v15677_v15 = vpop.f32.mrb[49].mxu0  ;;  %v15696_v55 = vpop.f32.mrb[185].mxu1 }
 0x633   :  { %v10232_v20 = vadd.f32 %v10231_v47, %v10143_v37 }
 0x634   :  { %v10149_v23 = vpop.f32.mrb[50].mxu0  ;;  %v10409_v35 = vpop.f32.mrb[186].mxu1 }
 0x635   :  { %v10150_v50 = vadd.f32 %v10149_v23, %v10061_v56  ;;  %v15680_v54 = vpop.f32.mrb[51].mxu0  ;;  %v15716_v12 = vpop.f32.mrb[187].mxu1 }
 0x637   :  { %v10240_v62 = vadd.f32 %v10239_v4, %v10150_v50 }
 0x638   :  { %v10156_v9 = vpop.f32.mrb[52].mxu0  ;;  %v10415_v1 = vpop.f32.mrb[188].mxu1 }
 0x639   :  { %v10157_v57 = vadd.f32 %v10156_v9, %v10067_v10  ;;  %v15683_v19 = vpop.f32.mrb[53].mxu0  ;;  %v15719_v63 = vpop.f32.mrb[189].mxu1 }
 0x63b   :  { %v10248_v30 = vadd.f32 %v10247_v38, %v10157_v57 }
 0x63c   :  { %v10324_v27 = vpop.f32.mrb[54].mxu0  ;;  %v10421_v6 = vpop.f32.mrb[190].mxu1 }
 0x63d   :  { %v10325_v16 = vadd.f32 %v10324_v27, %v10232_v20  ;;  %v15703_v21 = vpop.f32.mrb[55].mxu0  ;;  %v15722_v59 = vpop.f32.mrb[191].mxu1 }
 0x63f   :  { %v10410_v28 = vadd.f32 %v10409_v35, %v10325_v16 }
 0x640   :  { %v10330_v51 = vpop.f32.mrb[56].mxu0  ;;  %v10608_v5 = vpop.f32.mrb[192].mxu1 }
 0x641   :  { %v10331_v2 = vadd.f32 %v10330_v51, %v10240_v62  ;;  %v15706_v33 = vpop.f32.mrb[57].mxu0  ;;  %v15742_v14 = vpop.f32.mrb[193].mxu1  ;;  %v20015_v62 = vpack.c.bf16 %v11654_v44, %v11647_v42 }
 0x643   :  { %v10416_v3 = vadd.f32 %v10415_v1, %v10331_v2 }
 0x644   :  { %v10336_v26 = vpop.f32.mrb[58].mxu0  ;;  %v10614_v36 = vpop.f32.mrb[194].mxu1 }
 0x645   :  { %v10337_v0 = vadd.f32 %v10336_v26, %v10248_v30  ;;  %v15709_v29 = vpop.f32.mrb[59].mxu0  ;;  %v15745_v39 = vpop.f32.mrb[195].mxu1 }
 0x647   :  { %v10422_v25 = vadd.f32 %v10421_v6, %v10337_v0 }
 0x648   :  { %v10507_v60 = vpop.f32.mrb[60].mxu0  ;;  %v10620_v45 = vpop.f32.mrb[196].mxu1 }
 0x649   :  { %v10508_v47 = vadd.f32 %v10507_v60, %v10410_v28  ;;  %v15729_v56 = vpop.f32.mrb[61].mxu0  ;;  %v15748_v17 = vpop.f32.mrb[197].mxu1 }
 0x64b   :  { %v10609_v43 = vadd.f32 %v10608_v5, %v10508_v47 }
 0x64c   :  { %v10517_v7 = vpop.f32.mrb[62].mxu0  ;;  %v10785_v4 = vpop.f32.mrb[198].mxu1 }
 0x64d   :  { %v10518_v10 = vadd.f32 %v10517_v7, %v10416_v3  ;;  %v15732_v8 = vpop.f32.mrb[63].mxu0  ;;  %v15768_v18 = vpop.f32.mrb[199].mxu1 }
 0x64f   :  { %v10615_v40 = vadd.f32 %v10614_v36, %v10518_v10 }
 0x650   :  { %v10527_v38 = vpop.f32.mrb[64].mxu0  ;;  %v10793_v49 = vpop.f32.mrb[200].mxu1 }
 0x651   :  { %v10528_v53 = vadd.f32 %v10527_v38, %v10422_v25  ;;  %v15735_v37 = vpop.f32.mrb[65].mxu0  ;;  %v15771_v15 = vpop.f32.mrb[201].mxu1 }
 0x653   :  { %v10621_v55 = vadd.f32 %v10620_v45, %v10528_v53 }
 0x654   :  { %v10696_v52 = vpop.f32.mrb[66].mxu0  ;;  %v10801_v11 = vpop.f32.mrb[202].mxu1 }
 0x655   :  { %v10697_v20 = vadd.f32 %v10696_v52, %v10609_v43  ;;  %v15755_v23 = vpop.f32.mrb[67].mxu0  ;;  %v15774_v35 = vpop.f32.mrb[203].mxu1  ;;  %v13212_v52 = vld [vmem:[%s20204_s7 + $0x8] sm:$0xff] }
 0x656   :  { %13221 = vperm.xlu0 %17089, %v13212_v52  }
 0x657   :  { %v10786_v50 = vadd.f32 %v10785_v4, %v10697_v20  ;;  %v12667_v20 = vand.u32 4294901760, %v13301_v46 }
 0x658   :  { %v10703_v54 = vpop.f32.mrb[68].mxu0  ;;  %v10963_v12 = vpop.f32.mrb[204].mxu1 }
 0x659   :  { %v10704_v9 = vadd.f32 %v10703_v54, %v10615_v40  ;;  %v15758_v1 = vpop.f32.mrb[69].mxu0  ;;  %v15794_v24 = vpop.f32.mrb[205].mxu1  ;;  %v20097_v35 = vsub.f32 %v13301_v46, %v12667_v20 }
 0x65b   :  { %v10794_v31 = vadd.f32 %v10793_v49, %v10704_v9  ;;  %v12770_v54 = vand.u32 4294901760, %v20097_v35 }
 0x65c   :  { %v10710_v57 = vpop.f32.mrb[70].mxu0  ;;  %v10969_v19 = vpop.f32.mrb[206].mxu1 }
 0x65d   :  { %v10711_v63 = vadd.f32 %v10710_v57, %v10621_v55  ;;  %v15761_v32 = vpop.f32.mrb[71].mxu0  ;;  %v15797_v58 = vpop.f32.mrb[207].mxu1  ;;  %v12771_v24 = vsub.f32 %v20097_v35, %v12770_v54 }
 0x65f   :  { %v10802_v30 = vadd.f32 %v10801_v11, %v10711_v63  ;;  %v13213_v11 = vld [vmem:[%s20204_s7 + $0x10] sm:$0x7f] }
 0x660   :  { %v10878_v27 = vpop.f32.mrb[72].mxu0  ;;  %v10975_v6 = vpop.f32.mrb[208].mxu1 }
 0x661   :  { %v10879_v16 = vadd.f32 %v10878_v27, %v10786_v50  ;;  %v15781_v21 = vpop.f32.mrb[73].mxu0  ;;  %v15800_v59 = vpop.f32.mrb[209].mxu1 }
 0x663   :  { %v20017_v28 = vadd.f32 %v10963_v12, %v10879_v16 }
 0x664   :  { %v10884_v51 = vpop.f32.mrb[74].mxu0 }
 0x665   :  { %v10885_v42 = vadd.f32 %v10884_v51, %v10794_v31  ;;  %v15784_v44 = vpop.f32.mrb[75].mxu0 }
 0x667   :  { %v20019_v5 = vadd.f32 %v10969_v19, %v10885_v42 }
 0x668   :  { %v10890_v2 = vpop.f32.mrb[76].mxu0 }
 0x669   :  { %v10891_v33 = vadd.f32 %v10890_v2, %v10802_v30  ;;  %v15787_v14 = vpop.f32.mrb[77].mxu0  ;;  %v12772_v30 = vand.u32 4294901760, %v12771_v24 }
 0x66b   :  { %v20021_v3 = vadd.f32 %v10975_v6, %v10891_v33 }
 0x6a8   :  { %v11520_v26 = vpop.f32.mrb[78].mxu0 }
 0x6a9   :  { %v11539_v36 = vsel %vm5367_vm6, %v11520_v26, 0  ;;  %v15872_v0 = vpop.f32.mrb[79].mxu0 }
 0x6aa   :  { %v20024_v29 = vand.u32 4294901760, %v11539_v36 }
 0x6ac   :  { %v11615_v39 = vsub.f32 %v11539_v36, %v20024_v29  ;;  %v11526_v25 = vpop.f32.mrb[80].mxu0 }
 0x6ad   :  { %v11542_v60 = vsel %vm5367_vm6, %v11526_v25, 0  ;;  %v15875_v45 = vpop.f32.mrb[81].mxu0 }
 0x6ae   :  { %v11616_v47 = vand.u32 4294901760, %v11615_v39  ;;  %v20028_v56 = vand.u32 4294901760, %v11542_v60 }
 0x6b0   :  { %v11617_v17 = vsub.f32 %v11615_v39, %v11616_v47  ;;  %v11625_v43 = vsub.f32 %v11542_v60, %v20028_v56  ;;  %v11532_v7 = vpop.f32.mrb[82].mxu0 }
 0x6b1   :  { %v11545_v4 = vsel %vm5367_vm6, %v11532_v7, 0  ;;  %v15878_v10 = vpop.f32.mrb[83].mxu0 }
 0x6b2   :  { %v11618_v8 = vand.u32 4294901760, %v11617_v17  ;;  %v11626_v18 = vand.u32 4294901760, %v11625_v43  ;;  %v20032_v40 = vand.u32 4294901760, %v11545_v4 }
 0x6b4   :  { %v11635_v38 = vsub.f32 %v11545_v4, %v20032_v40  ;;  %15884 = vmatmul.mubr.f32.vlgmr.msra.gmra.mrb[210].mxu1 %v11618_v8  ;;  %v11627_v49 = vsub.f32 %v11625_v43, %v11626_v18 }
 0x6b5   :  { %16544 = vmatpush3.bf16.msra.mxu1 %v20011_v61  ;;  %15886 = vmatprep.mubr.msk.f32.mxu1 %vm17092_vm4, %v20339_v22  ;;  %v13211_v61 = vld [vmem:[%s20204_s7] sm:$0xff] }
 0x6b6   :  { %v11636_v53 = vand.u32 4294901760, %v11635_v38  ;;  %v11628_v37 = vand.u32 4294901760, %v11627_v49  ;;  %16545 = vmatprep.subr.bf16.mxu1 %v20341_v13  ;;  %13216 = vperm.xlu1 %17090, %v13211_v61  }
 0x6b8   :  { %15887 = vmatmul.mubr.f32.gmra.mrb[212].mxu1 %v11628_v37  ;;  %v11637_v15 = vsub.f32 %v11635_v38, %v11636_v53 }
 0x6b9   :  { %15889 = vmatprep.mubr.msk.f32.mxu1 %vm17092_vm4, %v20339_v22 }
 0x6ba   :  { %v11638_v55 = vand.u32 4294901760, %v11637_v15  ;;  %13226 = vperm.xlu1 %17090, %v13213_v11  }
 0x6bc   :  { %15890 = vmatmul.mubr.f32.gmra.mrb[214].mxu1 %v11638_v55 }
 0x6bd   :  { %15896 = vmatprep.mubr.msk.f32.mxu1 %vm17092_vm4, %v20339_v22 }
 0x6c0   :  { %15897 = vmatmul.mubr.f32.vlgmr.msra.gmra.mrb[216].mxu1 %v20024_v29 }
 0x6c1   :  { %16547 = vmatpush3.bf16.msra.mxu1 %v16546_v48  ;;  %15899 = vmatprep.mubr.msk.f32.mxu1 %vm17092_vm4, %v20339_v22  ;;  %v12664_v48 = vand.u32 4294901760, %v13300_v41 }
 0x6c2   :  { %16548 = vmatprep.subr.bf16.mxu1 %v20341_v13 }
 0x6c3   :  { %v20095_v23 = vsub.f32 %v13300_v41, %v12664_v48 }
 0x6c4   :  { %15900 = vmatmul.mubr.f32.gmra.mrb[218].mxu1 %v20028_v56 }
 0x6c5   :  { %15902 = vmatprep.mubr.msk.f32.mxu1 %vm17092_vm4, %v20339_v22  ;;  %v12763_v50 = vand.u32 4294901760, %v20095_v23  ;;  %v16582_v60 = vpack.c.bf16 %v20097_v35, %v20095_v23 }
 0x6c7   :  { %v12764_v1 = vsub.f32 %v20095_v23, %v12763_v50  ;;  %v16588_v45 = vpack.c.bf16 %v12770_v54, %v12763_v50 }
 0x6c8   :  { %15903 = vmatmul.mubr.f32.gmra.mrb[220].mxu1 %v20032_v40 }
 0x6c9   :  { %15909 = vmatprep.mubr.msk.f32.mxu1 %vm17092_vm4, %v20339_v22  ;;  %v12765_v58 = vand.u32 4294901760, %v12764_v1 }
 0x6cb   :  { %v16579_v44 = vpack.c.bf16 %v12772_v30, %v12765_v58 }
 0x6cc   :  { %15910 = vmatmul.mubr.f32.vlgmr.msra.gmra.mrb[222].mxu1 %v11615_v39 }
 0x6cd   :  { %16550 = vmatpush3.bf16.msra.mxu1 %v19999_v34  ;;  %15912 = vmatprep.mubr.msk.f32.mxu1 %vm17092_vm4, %v20339_v22 }
 0x6ce   :  { %16551 = vmatprep.subr.bf16.mxu1 %v20341_v13 }
 0x6d0   :  { %15913 = vmatmul.mubr.f32.gmra.mrb[224].mxu1 %v11625_v43 }
 0x6d1   :  { %15915 = vmatprep.mubr.msk.f32.mxu1 %vm17092_vm4, %v20339_v22 }
 0x6d4   :  { %15916 = vmatmul.mubr.f32.gmra.mrb[226].mxu1 %v11635_v38 }
 0x6d5   :  { %15922 = vmatprep.mubr.msk.f32.mxu1 %vm17092_vm4, %v20339_v22 }
 0x6d8   :  { %15923 = vmatmul.mubr.f32.vlgmr.msra.gmra.mrb[228].mxu1 %v11616_v47 }
 0x6d9   :  { %16553 = vmatpush3.bf16.msra.mxu1 %v20015_v62  ;;  %15925 = vmatprep.mubr.msk.f32.mxu1 %vm17092_vm4, %v20339_v22 }
 0x6da   :  { %16554 = vmatprep.subr.bf16.mxu1 %v20341_v13 }
 0x6dc   :  { %15926 = vmatmul.mubr.f32.gmra.mrb[230].mxu1 %v11626_v18 }
 0x6dd   :  { %15928 = vmatprep.mubr.msk.f32.mxu1 %vm17092_vm4, %v20339_v22 }
 0x6e0   :  { %15929 = vmatmul.mubr.f32.gmra.mrb[232].mxu1 %v11636_v53 }
 0x6e1   :  { %15935 = vmatprep.mubr.msk.f32.mxu1 %vm17092_vm4, %v20339_v22 }
 0x6e4   :  { %15936 = vmatmul.mubr.f32.vlgmr.msra.gmra.mrb[234].mxu1 %v20024_v29 }
 0x6e5   :  { %16556 = vmatpush3.bf16.msra.mxu1 %v19999_v34  ;;  %15938 = vmatprep.mubr.msk.f32.mxu1 %vm17092_vm4, %v20339_v22  ;;  %v20102_v34 = vpack.c.bf16 %v12667_v20, %v12664_v48 }
 0x6e6   :  { %16575 = vmatprep.subr.bf16.mxu1 %v20341_v13 }
 0x6e8   :  { %15939 = vmatmul.mubr.f32.gmra.mrb[236].mxu1 %v20028_v56 }
 0x6e9   :  { %15941 = vmatprep.mubr.msk.f32.mxu1 %vm17092_vm4, %v20339_v22 }
 0x6ec   :  { %15942 = vmatmul.mubr.f32.gmra.mrb[238].mxu1 %v20032_v40 }
 0x6ed   :  { %15948 = vmatprep.mubr.msk.f32.mxu1 %vm17092_vm4, %v20339_v22 }
 0x6f0   :  { %15949 = vmatmul.mubr.f32.vlgmr.msra.gmra.mrb[240].mxu1 %v20024_v29  ;;  %v12636_v12 = vpop.f32.mrb[84].mxu0 }
 0x6f1   :  { %v12655_v62 = vsel %vm5367_vm6, %v12636_v12, 0  ;;  %v16028_v9 = vpop.f32.mrb[85].mxu0  ;;  %16577 = vmatpush3.bf16.msra.mxu1 %v20102_v34  ;;  %15951 = vmatprep.mubr.msk.f32.mxu1 %vm17092_vm4, %v20339_v22 }
 0x6f2   :  { %v20117_v31 = vand.u32 4294901760, %v12655_v62  ;;  %16578 = vmatprep.subr.bf16.mxu1 %v20341_v13 }
 0x6f4   :  { %v12731_v57 = vsub.f32 %v12655_v62, %v20117_v31  ;;  %15952 = vmatmul.mubr.f32.gmra.mrb[242].mxu1 %v20028_v56  ;;  %v12642_v19 = vpop.f32.mrb[86].mxu0 }
 0x6f5   :  { %v12658_v63 = vsel %vm5367_vm6, %v12642_v19, 0  ;;  %v16031_v32 = vpop.f32.mrb[87].mxu0  ;;  %15954 = vmatprep.mubr.msk.f32.mxu1 %vm17092_vm4, %v20339_v22 }
 0x6f6   :  { %v12732_v27 = vand.u32 4294901760, %v12731_v57  ;;  %v12740_v6 = vand.u32 4294901760, %v12658_v63 }
 0x6f8   :  { %v12733_v16 = vsub.f32 %v12731_v57, %v12732_v27  ;;  %v12741_v21 = vsub.f32 %v12658_v63, %v12740_v6  ;;  %15955 = vmatmul.mubr.f32.gmra.mrb[244].mxu1 %v20032_v40  ;;  %v12648_v59 = vpop.f32.mrb[88].mxu0 }
 0x6f9   :  { %v12661_v51 = vsel %vm5367_vm6, %v12648_v59, 0  ;;  %v16034_v42 = vpop.f32.mrb[89].mxu0  ;;  %16039 = vmatprep.mubr.msk.f32.mxu1 %vm17092_vm4, %v20339_v22 }
 0x6fa   :  { %v12734_v2 = vand.u32 4294901760, %v12733_v16  ;;  %v12742_v33 = vand.u32 4294901760, %v12741_v21  ;;  %v12750_v14 = vand.u32 4294901760, %v12661_v51 }
 0x6fc   :  { %v12751_v26 = vsub.f32 %v12661_v51, %v12750_v14  ;;  %16040 = vmatmul.mubr.f32.vlgmr.msra.gmra.mrb[246].mxu1 %v12734_v2  ;;  %v12743_v36 = vsub.f32 %v12741_v21, %v12742_v33 }
 0x6fd   :  { %16580 = vmatpush3.bf16.msra.mxu1 %v16579_v44  ;;  %16042 = vmatprep.mubr.msk.f32.mxu1 %vm17092_vm4, %v20339_v22 }
 0x6fe   :  { %v12752_v0 = vand.u32 4294901760, %v12751_v26  ;;  %v12744_v29 = vand.u32 4294901760, %v12743_v36  ;;  %16581 = vmatprep.subr.bf16.mxu1 %v20341_v13 }
 0x700   :  { %16043 = vmatmul.mubr.f32.gmra.mrb[248].mxu1 %v12744_v29  ;;  %v12753_v39 = vsub.f32 %v12751_v26, %v12752_v0 }
 0x701   :  { %16045 = vmatprep.mubr.msk.f32.mxu1 %vm17092_vm4, %v20339_v22 }
 0x702   :  { %v12754_v25 = vand.u32 4294901760, %v12753_v39 }
 0x704   :  { %16046 = vmatmul.mubr.f32.gmra.mrb[250].mxu1 %v12754_v25 }
 0x705   :  { %16052 = vmatprep.mubr.msk.f32.mxu1 %vm17092_vm4, %v20339_v22 }
 0x708   :  { %16053 = vmatmul.mubr.f32.vlgmr.msra.gmra.mrb[252].mxu1 %v20117_v31 }
 0x709   :  { %16583 = vmatpush3.bf16.msra.mxu1 %v16582_v60  ;;  %16055 = vmatprep.mubr.msk.f32.mxu1 %vm17092_vm4, %v20339_v22 }
 0x70a   :  { %16584 = vmatprep.subr.bf16.mxu1 %v20341_v13 }
 0x70c   :  { %16056 = vmatmul.mubr.f32.gmra.mrb[254].mxu1 %v12740_v6 }
 0x70d   :  { %16058 = vmatprep.mubr.msk.f32.mxu1 %vm17092_vm4, %v20339_v22 }
 0x710   :  { %16059 = vmatmul.mubr.f32.gmra.mrb[0].mxu1 %v12750_v14 }
 0x711   :  { %16065 = vmatprep.mubr.msk.f32.mxu1 %vm17092_vm4, %v20339_v22 }
 0x714   :  { %16066 = vmatmul.mubr.f32.vlgmr.msra.gmra.mrb[2].mxu1 %v12731_v57 }
 0x715   :  { %16586 = vmatpush3.bf16.msra.mxu1 %v20102_v34  ;;  %16068 = vmatprep.mubr.msk.f32.mxu1 %vm17092_vm4, %v20339_v22 }
 0x716   :  { %16587 = vmatprep.subr.bf16.mxu1 %v20341_v13 }
 0x718   :  { %16069 = vmatmul.mubr.f32.gmra.mrb[4].mxu1 %v12741_v21 }
 0x719   :  { %16071 = vmatprep.mubr.msk.f32.mxu1 %vm17092_vm4, %v20339_v22 }
 0x71c   :  { %16072 = vmatmul.mubr.f32.gmra.mrb[6].mxu1 %v12751_v26 }
 0x71d   :  { %16078 = vmatprep.mubr.msk.f32.mxu1 %vm17092_vm4, %v20339_v22 }
 0x720   :  { %16079 = vmatmul.mubr.f32.vlgmr.msra.gmra.mrb[8].mxu1 %v12732_v27 }
 0x721   :  { %16589 = vmatpush3.bf16.msra.mxu1 %v16588_v45  ;;  %16081 = vmatprep.mubr.msk.f32.mxu1 %vm17092_vm4, %v20339_v22 }
 0x722   :  { %16590 = vmatprep.subr.bf16.mxu1 %v20341_v13 }
 0x724   :  { %16082 = vmatmul.mubr.f32.gmra.mrb[10].mxu1 %v12742_v33 }
 0x725   :  { %16084 = vmatprep.mubr.msk.f32.mxu1 %vm17092_vm4, %v20339_v22 }
 0x728   :  { %16085 = vmatmul.mubr.f32.gmra.mrb[12].mxu1 %v12752_v0 }
 0x729   :  { %16091 = vmatprep.mubr.msk.f32.mxu1 %vm17092_vm4, %v20339_v22 }
 0x72c   :  { %16092 = vmatmul.mubr.f32.vlgmr.msra.gmra.mrb[14].mxu1 %v20117_v31 }
 0x72d   :  { %16592 = vmatpush3.bf16.msra.mxu1 %v20102_v34  ;;  %16094 = vmatprep.mubr.msk.f32.mxu1 %vm17092_vm4, %v20339_v22 }
 0x730   :  { %16095 = vmatmul.mubr.f32.gmra.mrb[16].mxu1 %v12740_v6 }
 0x731   :  { %16097 = vmatprep.mubr.msk.f32.mxu1 %vm17092_vm4, %v20339_v22 }
 0x734   :  { %16098 = vmatmul.mubr.f32.gmra.mrb[18].mxu1 %v12750_v14 }
 0x735   :  { %16104 = vmatprep.mubr.msk.f32.mxu1 %vm17092_vm4, %v20339_v22 }
 0x738   :  { %16105 = vmatmul.mubr.f32.vlgmr.msra.gmra.mrb[20].mxu1 %v20117_v31 }
 0x739   :  { %16107 = vmatprep.mubr.msk.f32.mxu1 %vm17092_vm4, %v20339_v22 }
 0x73c   :  { %16108 = vmatmul.mubr.f32.gmra.mrb[22].mxu1 %v12740_v6 }
 0x73d   :  { %16110 = vmatprep.mubr.msk.f32.mxu1 %vm17092_vm4, %v20339_v22 }
 0x740   :  { %16111 = vmatmul.mubr.f32.gmra.mrb[24].mxu1 %v12750_v14 }
 0x787   :  { %v11620_v13 = vpop.f32.mrb[210].mxu1 }
 0x788   :  { %v15885_v47 = vpop.f32.mrb[211].mxu1 }
 0x78b   :  { %v11630_v56 = vpop.f32.mrb[212].mxu1 }
 0x78c   :  { %v15888_v17 = vpop.f32.mrb[213].mxu1 }
 0x78f   :  { %v11640_v43 = vpop.f32.mrb[214].mxu1 }
 0x790   :  { %v15891_v7 = vpop.f32.mrb[215].mxu1 }
 0x793   :  { %v11721_v4 = vpop.f32.mrb[216].mxu1 }
 0x794   :  { %v11722_v10 = vadd.f32 %v11721_v4, %v11620_v13  ;;  %v15898_v8 = vpop.f32.mrb[217].mxu1 }
 0x797   :  { %v11727_v18 = vpop.f32.mrb[218].mxu1 }
 0x798   :  { %v11728_v40 = vadd.f32 %v11727_v18, %v11630_v56  ;;  %v15901_v38 = vpop.f32.mrb[219].mxu1 }
 0x79b   :  { %v11733_v49 = vpop.f32.mrb[220].mxu1 }
 0x79c   :  { %v11734_v53 = vadd.f32 %v11733_v49, %v11640_v43  ;;  %v15904_v37 = vpop.f32.mrb[221].mxu1 }
 0x79f   :  { %v11809_v15 = vpop.f32.mrb[222].mxu1 }
 0x7a0   :  { %v11810_v55 = vadd.f32 %v11809_v15, %v11722_v10  ;;  %v15911_v61 = vpop.f32.mrb[223].mxu1 }
 0x7a3   :  { %v11816_v22 = vpop.f32.mrb[224].mxu1 }
 0x7a4   :  { %v11817_v52 = vadd.f32 %v11816_v22, %v11728_v40  ;;  %v15914_v11 = vpop.f32.mrb[225].mxu1 }
 0x7a7   :  { %v11823_v41 = vpop.f32.mrb[226].mxu1 }
 0x7a8   :  { %v11824_v46 = vadd.f32 %v11823_v41, %v11734_v53  ;;  %v15917_v48 = vpop.f32.mrb[227].mxu1 }
 0x7ab   :  { %v11898_v20 = vpop.f32.mrb[228].mxu1 }
 0x7ac   :  { %v11899_v23 = vadd.f32 %v11898_v20, %v11810_v55  ;;  %v15924_v35 = vpop.f32.mrb[229].mxu1 }
 0x7af   :  { %v11906_v34 = vpop.f32.mrb[230].mxu1 }
 0x7b0   :  { %v11907_v50 = vadd.f32 %v11906_v34, %v11817_v52  ;;  %v15927_v54 = vpop.f32.mrb[231].mxu1 }
 0x7b3   :  { %v11914_v12 = vpop.f32.mrb[232].mxu1 }
 0x7b4   :  { %v11915_v62 = vadd.f32 %v11914_v12, %v11824_v46  ;;  %v15930_v9 = vpop.f32.mrb[233].mxu1 }
 0x7b7   :  { %v11991_v1 = vpop.f32.mrb[234].mxu1 }
 0x7b8   :  { %v11992_v24 = vadd.f32 %v11991_v1, %v11899_v23  ;;  %v15937_v31 = vpop.f32.mrb[235].mxu1 }
 0x7bb   :  { %v11997_v57 = vpop.f32.mrb[236].mxu1 }
 0x7bc   :  { %v11998_v19 = vadd.f32 %v11997_v57, %v11907_v50  ;;  %v15940_v63 = vpop.f32.mrb[237].mxu1  ;;  %v13217_v57 = vpop.permute.xlu1 %13216 }
 0x7bf   :  { %v12003_v32 = vpop.f32.mrb[238].mxu1 }
 0x7c0   :  { %v12004_v58 = vadd.f32 %v12003_v32, %v11915_v62  ;;  %v15943_v30 = vpop.f32.mrb[239].mxu1 }
 0x7c3   :  { %v12076_v27 = vpop.f32.mrb[240].mxu1 }
 0x7c4   :  { %v12077_v6 = vadd.f32 %v12076_v27, %v11992_v24  ;;  %v15950_v16 = vpop.f32.mrb[241].mxu1 }
 0x7c6   :  { %v12092_v21 = vadd.f32 %v12077_v6, %v20017_v28  ;;  %v13222_v6 = vpop.permute.xlu0 %13221 }
 0x7c7   :  { %v12082_v59 = vpop.f32.mrb[242].mxu1 }
 0x7c8   :  { %v12083_v51 = vadd.f32 %v12082_v59, %v11998_v19  ;;  %v15953_v42 = vpop.f32.mrb[243].mxu1 }
 0x7ca   :  { %v12093_v44 = vadd.f32 %v12083_v51, %v20019_v5 }
 0x7cb   :  { %v12088_v2 = vpop.f32.mrb[244].mxu1 }
 0x7cc   :  { %v12089_v33 = vadd.f32 %v12088_v2, %v12004_v58  ;;  %v15956_v14 = vpop.f32.mrb[245].mxu1 }
 0x7cd   :  { %v13227_v14 = vpop.permute.xlu1 %13226 }
 0x7ce   :  { %v20181_v26 = vadd.f32 %v12089_v33, %v20021_v3 }
 0x7cf   :  { %v12736_v36 = vpop.f32.mrb[246].mxu1 }
 0x7d0   :  { %v16041_v0 = vpop.f32.mrb[247].mxu1 }
 0x7d3   :  { %v12746_v29 = vpop.f32.mrb[248].mxu1 }
 0x7d4   :  { %v16044_v39 = vpop.f32.mrb[249].mxu1 }
 0x7d7   :  { %v12756_v25 = vpop.f32.mrb[250].mxu1 }
 0x7d8   :  { %v16047_v60 = vpop.f32.mrb[251].mxu1 }
 0x7db   :  { %v12837_v45 = vpop.f32.mrb[252].mxu1 }
 0x7dc   :  { %v12838_v13 = vadd.f32 %v12837_v45, %v12736_v36  ;;  %v16054_v28 = vpop.f32.mrb[253].mxu1 }
 0x7df   :  { %v12843_v47 = vpop.f32.mrb[254].mxu1 }
 0x7e0   :  { %v12844_v56 = vadd.f32 %v12843_v47, %v12746_v29  ;;  %v16057_v17 = vpop.f32.mrb[255].mxu1 }
 0x7e3   :  { %v12849_v43 = vpop.f32.mrb[0].mxu1 }
 0x7e4   :  { %v12850_v5 = vadd.f32 %v12849_v43, %v12756_v25  ;;  %v16060_v7 = vpop.f32.mrb[1].mxu1 }
 0x7e7   :  { %v12925_v4 = vpop.f32.mrb[2].mxu1 }
 0x7e8   :  { %v12926_v10 = vadd.f32 %v12925_v4, %v12838_v13  ;;  %v16067_v8 = vpop.f32.mrb[3].mxu1 }
 0x7eb   :  { %v12932_v3 = vpop.f32.mrb[4].mxu1 }
 0x7ec   :  { %v12933_v18 = vadd.f32 %v12932_v3, %v12844_v56  ;;  %v16070_v40 = vpop.f32.mrb[5].mxu1 }
 0x7ef   :  { %v12939_v38 = vpop.f32.mrb[6].mxu1 }
 0x7f0   :  { %v12940_v49 = vadd.f32 %v12939_v38, %v12850_v5  ;;  %v16073_v53 = vpop.f32.mrb[7].mxu1 }
 0x7f3   :  { %v13014_v37 = vpop.f32.mrb[8].mxu1 }
 0x7f4   :  { %v13015_v15 = vadd.f32 %v13014_v37, %v12926_v10  ;;  %v16080_v55 = vpop.f32.mrb[9].mxu1 }
 0x7f7   :  { %v13022_v61 = vpop.f32.mrb[10].mxu1 }
 0x7f8   :  { %v13023_v22 = vadd.f32 %v13022_v61, %v12933_v18  ;;  %v16083_v52 = vpop.f32.mrb[11].mxu1 }
 0x7fb   :  { %v13030_v11 = vpop.f32.mrb[12].mxu1 }
 0x7fc   :  { %v13031_v41 = vadd.f32 %v13030_v11, %v12940_v49  ;;  %v16086_v46 = vpop.f32.mrb[13].mxu1 }
 0x7ff   :  { %v13107_v48 = vpop.f32.mrb[14].mxu1 }
 0x800   :  { %v13108_v20 = vadd.f32 %v13107_v48, %v13015_v15  ;;  %v16093_v23 = vpop.f32.mrb[15].mxu1 }
 0x803   :  { %v13113_v35 = vpop.f32.mrb[16].mxu1 }
 0x804   :  { %v13114_v34 = vadd.f32 %v13113_v35, %v13023_v22  ;;  %v16096_v50 = vpop.f32.mrb[17].mxu1 }
 0x807   :  { %v13119_v54 = vpop.f32.mrb[18].mxu1 }
 0x808   :  { %v13120_v12 = vadd.f32 %v13119_v54, %v13031_v41  ;;  %v16099_v62 = vpop.f32.mrb[19].mxu1 }
 0x80b   :  { %v13192_v9 = vpop.f32.mrb[20].mxu1 }
 0x80c   :  { %v13193_v1 = vadd.f32 %v13192_v9, %v13108_v20  ;;  %v16106_v24 = vpop.f32.mrb[21].mxu1 }
 0x80e   :  { %v13208_v31 = vadd.f32 %v13193_v1, %v12092_v21 }
 0x80f   :  { %v13198_v19 = vpop.f32.mrb[22].mxu1 }
 0x810   :  { %v13229_v63 = vadd.f32 %v13217_v57, %v13208_v31  ;;  %v13199_v32 = vadd.f32 %v13198_v19, %v13114_v34  ;;  %v16109_v58 = vpop.f32.mrb[23].mxu1 }
 0x812   :  { %vm13232_vm3 = vcmp.gt.f32.partialorder %v13229_v63, 0.763  ;;  %v13235_v30 = vmul.f32 -0.051, %v13229_v63  ;;  %v13209_v27 = vadd.f32 %v13199_v32, %v12093_v44 }
 0x813   :  { %v13204_v16 = vpop.f32.mrb[24].mxu1 }
 0x814   :  { %v13238_v59 = vsel %vm13232_vm3, %v13229_v63, %v13235_v30  ;;  %v13230_v51 = vadd.f32 %v13222_v6, %v13209_v27  ;;  %v13205_v42 = vadd.f32 %v13204_v16, %v13120_v12  ;;  %v16112_v2 = vpop.f32.mrb[25].mxu1 }
 0x815   :  { %13302 = vst.msk [vmem:[%s20205_s9 + $0x18] sm:$0xff] %vm8742_vm2, %v13238_v59 }
 0x816   :  { %vm13233_vm4 = vcmp.gt.f32.partialorder %v13230_v51, 0.763  ;;  %v13236_v21 = vmul.f32 -0.051, %v13230_v51  ;;  %v13210_v33 = vadd.f32 %v13205_v42, %v20181_v26 }
 0x818   :  { %v13239_v36 = vsel %vm13233_vm4, %v13230_v51, %v13236_v21  ;;  %v13231_v0 = vadd.f32 %v13227_v14, %v13210_v33 }
 0x819   :  { %13303 = vst.msk [vmem:[%s20205_s9 + $0x20] sm:$0xff] %vm8742_vm2, %v13239_v36 }
 0x81a   :  { %vm13234_vm6 = vcmp.gt.f32.partialorder %v13231_v0, 0.763  ;;  %v13237_v44 = vmul.f32 -0.051, %v13231_v0 }
 0x81c   :  { %v13240_v29 = vsel %vm13234_vm6, %v13231_v0, %v13237_v44 }
 0x81d   :  { %13304 = vst.msk [vmem:[%s20205_s9 + $0x28] sm:$0x7f] %vm8745_vm11, %v13240_v29 }

</bundles_post_ra>
